<compile_context>
chip_gen: v5e
topology: v5e:2x2
jax: 0.10.0
libtpu: 0.0.40
codegen_flags: <defaults>
</compile_context>

<pallas_src>
import functools

import jax
import jax.numpy as jnp
from jax.experimental import pallas as pl
from jax.experimental.pallas import tpu as pltpu


# -----------------------------------------------------------------------------
# Fused multi-stage kernel (one batch element per grid step).
# -----------------------------------------------------------------------------
def _mstcn_kernel(num_stages, num_layers, use_roll,
                  x_ref, m_ref,
                  w_in1, b_in1, wd1, bd1, w11, b11, wo1, bo1,
                  w_in2, b_in2, wd2, bd2, w12, b12, wo2, bo2,
                  o_ref):
    T = x_ref.shape[-1]
    F = w_in1.shape[0]          # num_f_maps
    C = o_ref.shape[2]          # num_classes

    m = m_ref[0]                                   # (1, T)  == mask[:, 0:1, :]
    m_f = jnp.broadcast_to(m, (F, T))              # hoisted residual mask
    m_c = jnp.broadcast_to(m, (C, T))              # hoisted output mask
    t_idx = jax.lax.broadcasted_iota(jnp.int32, (F, T), 1)

    def shift_taps(h, d):
        """h_prev[:, t] = h[:, t-d], h_next[:, t] = h[:, t+d], zero padded."""
        if use_roll:
            # XLU lane rotation + VPU mask (frees the vld/vst slots).
            h_prev = jnp.where(t_idx >= d, pltpu.roll(h, d, axis=1), 0.0)
            h_next = jnp.where(t_idx < T - d, pltpu.roll(h, T - d, axis=1), 0.0)
        else:
            z = jnp.zeros((F, d), dtype=h.dtype)
            h_prev = jnp.concatenate([z, h[:, :T - d]], axis=1)
            h_next = jnp.concatenate([h[:, d:], z], axis=1)
        return h_prev, h_next

    def run_stage(h_in, w_in, b_in, wd_l, bd_l, w1_l, b1_l, wo, bo):
        # conv_1x1 (Cin -> F)
        h = jnp.dot(w_in, h_in, preferred_element_type=jnp.float32) + b_in
        # DilatedResidualLayer stack (static unroll; dilation = 2**l)
        for l in range(num_layers):
            d = 2 ** l
            h_prev, h_next = shift_taps(h, d)
            xin = jnp.concatenate([h_prev, h, h_next], axis=0)          # (3F, T)
            y = jnp.dot(wd_l(l), xin, preferred_element_type=jnp.float32) + bd_l(l)
            y = jnp.maximum(y, 0.0)                                     # ReLU
            y = jnp.dot(w1_l(l), y, preferred_element_type=jnp.float32) + b1_l(l)
            # nn.Dropout == identity in eval mode
            h = (h + y) * m_f                                           # residual * mask
        # conv_out (F -> C), masked
        return (jnp.dot(wo, h, preferred_element_type=jnp.float32) + bo) * m_c

    # ---- stage 1 (input dim may differ from num_classes) ----
    out = run_stage(x_ref[0],
                    w_in1[...], b_in1[...],
                    lambda l: wd1[l], lambda l: bd1[l],
                    lambda l: w11[l], lambda l: b11[l],
                    wo1[...], bo1[...])
    o_ref[0, 0] = out.astype(o_ref.dtype)

    # ---- stages 2..S (stacked parameters, static indexing) ----
    for s in range(1, num_stages):
        si = s - 1
        out = run_stage(out * m_c,                                      # out * mask
                        w_in2[si], b_in2[si],
                        lambda l, si=si: wd2[si, l], lambda l, si=si: bd2[si, l],
                        lambda l, si=si: w12[si, l], lambda l, si=si: b12[si, l],
                        wo2[si], bo2[si])
        o_ref[s, 0] = out.astype(o_ref.dtype)


# -----------------------------------------------------------------------------
# Wrapper: one fused pallas_call for the whole multi-stage forward.
# -----------------------------------------------------------------------------
def multi_stage_forward(x_bct, mask_bct, all_params, num_layers):
    """x_bct: (B, dim, T); mask_bct: (B, num_classes, T).
    Returns (num_stages, B, num_classes, T)."""
    B, Din, T = x_bct.shape
    num_stages = len(all_params)
    C, F = all_params[0]["w_out"].shape
    assert 2 ** (num_layers - 1) < T, "max dilation must be < T"

    m_b1t = mask_bct[:, 0:1, :]                    # (B, 1, T)
    use_roll = (T % 128 == 0)                      # lane-aligned -> pltpu.roll path

    p1 = all_params[0]
    if num_stages > 1:
        rest = all_params[1:]
        stacked = {k: jnp.stack([p[k] for p in rest], axis=0) for k in rest[0]}
    else:  # dummies (never read); keep ref shapes non-degenerate
        stacked = jax.tree_util.tree_map(
            lambda a: jnp.zeros((1,) + a.shape, a.dtype), p1)

    args = (x_bct, m_b1t,
            p1["w_in"], p1["b_in"], p1["wd"], p1["bd"],
            p1["w1"], p1["b1"], p1["w_out"], p1["b_out"],
            stacked["w_in"], stacked["b_in"], stacked["wd"], stacked["bd"],
            stacked["w1"], stacked["b1"], stacked["w_out"], stacked["b_out"])

    def w_spec(a):  # whole-array block, DMA'd once (constant index map)
        n = a.ndim
        return pl.BlockSpec(a.shape, lambda b, _n=n: (0,) * _n)

    in_specs = [pl.BlockSpec((1, Din, T), lambda b: (b, 0, 0)),     # x
                pl.BlockSpec((1, 1, T), lambda b: (b, 0, 0))]       # mask
    in_specs += [w_spec(a) for a in args[2:]]

    out_specs = pl.BlockSpec((num_stages, 1, C, T), lambda b: (0, b, 0, 0))

    # Advisory cost estimate (flops = 2*M*K*N per matmul).
    L = num_layers
    per_b = 2 * T * (F * Din + L * 4 * F * F + C * F)
    per_b += (num_stages - 1) * 2 * T * (F * C + L * 4 * F * F + C * F)
    flops = int(B * per_b)
    bytes_accessed = int(sum(int(a.size) * a.dtype.itemsize for a in args)
                         + num_stages * B * C * T * 4)

    kernel = functools.partial(_mstcn_kernel, num_stages, num_layers, use_roll)

    return pl.pallas_call(
        kernel,
        out_shape=jax.ShapeDtypeStruct((num_stages, B, C, T), jnp.float32),
        grid=(B,),
        in_specs=in_specs,
        out_specs=out_specs,
        compiler_params=pltpu.CompilerParams(dimension_semantics=("parallel",)),
        cost_estimate=pl.CostEstimate(flops=flops, transcendentals=0,
                                      bytes_accessed=bytes_accessed),
    )(*args)


# -----------------------------------------------------------------------------
# Deterministic parameter init (synthetic; shapes follow the nn.Module __init__).
# Channels-first matrices: conv weight (Cout, Cin), bias (Cout, 1).
# The dilated conv weight is pre-fused: wd[l] = [W(t-d) | W(t) | W(t+d)]  (F, 3F)
# (i.e. PyTorch weight[:, :, 0], [:, :, 1], [:, :, 2] concatenated on the in-axis).
# -----------------------------------------------------------------------------
def init_stage_params(key, num_layers, num_f_maps, in_dim, num_classes):
    F, D, C, L = num_f_maps, in_dim, num_classes, num_layers
    k = jax.random.split(key, 8)
    s = 0.1
    return {
        "w_in":  jax.random.normal(k[0], (F, D), jnp.float32) * s,       # conv_1x1
        "b_in":  jax.random.normal(k[1], (F, 1), jnp.float32) * s,
        "wd":    jax.random.normal(k[2], (L, F, 3 * F), jnp.float32) * s,  # fused k=3 dilated
        "bd":    jax.random.normal(k[3], (L, F, 1), jnp.float32) * s,
        "w1":    jax.random.normal(k[4], (L, F, F), jnp.float32) * s,      # layer conv_1x1
        "b1":    jax.random.normal(k[5], (L, F, 1), jnp.float32) * s,
        "w_out": jax.random.normal(k[6], (C, F), jnp.float32) * s,         # conv_out
        "b_out": jax.random.normal(k[7], (C, 1), jnp.float32) * s,
    }


# -----------------------------------------------------------------------------
# Pure-JAX reference (same math, no Pallas) for correctness checking.
# -----------------------------------------------------------------------------
def _ref_stage(x_bct, m_b1t, p, num_layers):
    T = x_bct.shape[-1]
    h = jnp.einsum("fd,bdt->bft", p["w_in"], x_bct) + p["b_in"][None]
    for l in range(num_layers):
        d = 2 ** l
        hp = jnp.pad(h, ((0, 0), (0, 0), (d, d)))
        x_m = hp[:, :, 0:T]            # h[t-d]
        x_c = hp[:, :, d:d + T]        # h[t]
        x_p = hp[:, :, 2 * d:2 * d + T]  # h[t+d]
        xin = jnp.concatenate([x_m, x_c, x_p], axis=1)
        y = jnp.einsum("fg,bgt->bft", p["wd"][l], xin) + p["bd"][l][None]
        y = jnp.maximum(y, 0.0)
        y = jnp.einsum("fg,bgt->bft", p["w1"][l], y) + p["b1"][l][None]
        h = (h + y) * m_b1t
    return (jnp.einsum("cf,bft->bct", p["w_out"], h) + p["b_out"][None]) * m_b1t


def _ref_multi_stage(x_bct, mask_bct, all_params, num_layers):
    m = mask_bct[:, 0:1, :]
    out = _ref_stage(x_bct, m, all_params[0], num_layers)
    outs = [out]
    for p in all_params[1:]:
        out = _ref_stage(out * m, m, p, num_layers)
        outs.append(out)
    return jnp.stack(outs, axis=0)


# -----------------------------------------------------------------------------
if __name__ == "__main__":
    num_stages = 3
    num_layers = 4          # dilations 1, 2, 4, 8
    num_f_maps = 32
    dim = 32
    num_classes = 8
    B, T = 2, 128           # T multiple of 128 -> lane-dense stores + roll path

    root = jax.random.PRNGKey(0)
    kx, kp = jax.random.split(root)

    stage_keys = jax.random.split(kp, num_stages)
    all_params = [init_stage_params(stage_keys[0], num_layers, num_f_maps, dim, num_classes)]
    for s in range(1, num_stages):
        all_params.append(
            init_stage_params(stage_keys[s], num_layers, num_f_maps, num_classes, num_classes))

    # inputs in PyTorch NCT convention
    x = jax.random.normal(kx, (B, dim, T), jnp.float32)
    lens = jnp.array([T, 3 * T // 4])                      # second sequence is shorter
    t_ids = jnp.arange(T)[None, :]
    mask = (t_ids < lens[:, None]).astype(jnp.float32)     # (B, T)
    mask = jnp.broadcast_to(mask[:, None, :], (B, num_classes, T))

    out = jax.block_until_ready(multi_stage_forward(x, mask, all_params, num_layers))
    assert out.shape == (num_stages, B, num_classes, T), out.shape

    ref = jax.block_until_ready(_ref_multi_stage(x, mask, all_params, num_layers))
    err = float(jnp.max(jnp.abs(out - ref)))
    assert err < 1e-3, err

    print("KERNEL_OK")
</pallas_src>

<mosaic_0001>
module attributes {stable_mosaic.version = 11 : i64} {
  func.func @_mstcn_kernel(%arg0: i32, %arg1: memref<1x32x128xf32, #tpu.memory_space<vmem>>, %arg2: memref<1x1x128xf32, #tpu.memory_space<vmem>>, %arg3: memref<32x32xf32, #tpu.memory_space<vmem>>, %arg4: memref<32x1xf32, #tpu.memory_space<vmem>>, %arg5: memref<4x32x96xf32, #tpu.memory_space<vmem>>, %arg6: memref<4x32x1xf32, #tpu.memory_space<vmem>>, %arg7: memref<4x32x32xf32, #tpu.memory_space<vmem>>, %arg8: memref<4x32x1xf32, #tpu.memory_space<vmem>>, %arg9: memref<8x32xf32, #tpu.memory_space<vmem>>, %arg10: memref<8x1xf32, #tpu.memory_space<vmem>>, %arg11: memref<2x32x8xf32, #tpu.memory_space<vmem>>, %arg12: memref<2x32x1xf32, #tpu.memory_space<vmem>>, %arg13: memref<2x4x32x96xf32, #tpu.memory_space<vmem>>, %arg14: memref<2x4x32x1xf32, #tpu.memory_space<vmem>>, %arg15: memref<2x4x32x32xf32, #tpu.memory_space<vmem>>, %arg16: memref<2x4x32x1xf32, #tpu.memory_space<vmem>>, %arg17: memref<2x8x32xf32, #tpu.memory_space<vmem>>, %arg18: memref<2x8x1xf32, #tpu.memory_space<vmem>>, %arg19: memref<3x1x8x128xf32, #tpu.memory_space<vmem>>) attributes {dimension_semantics = [#tpu.dimension_semantics<parallel>], iteration_bounds = array<i64: 2>, scalar_prefetch = 0 : i64, scratch_operands = 0 : i64, tpu.core_type = #tpu.core_type<tc>, window_params = [{transform_indices = @transform_0, window_bounds = array<i64: 1, 32, 128>}, {transform_indices = @transform_1, window_bounds = array<i64: 1, 1, 128>}, {pipeline_mode = #tpu.pipeline_mode<synchronous>, transform_indices = @transform_2, window_bounds = array<i64: 32, 32>}, {pipeline_mode = #tpu.pipeline_mode<synchronous>, transform_indices = @transform_3, window_bounds = array<i64: 32, 1>}, {pipeline_mode = #tpu.pipeline_mode<synchronous>, transform_indices = @transform_4, window_bounds = array<i64: 4, 32, 96>}, {pipeline_mode = #tpu.pipeline_mode<synchronous>, transform_indices = @transform_5, window_bounds = array<i64: 4, 32, 1>}, {pipeline_mode = #tpu.pipeline_mode<synchronous>, transform_indices = @transform_6, window_bounds = array<i64: 4, 32, 32>}, {pipeline_mode = #tpu.pipeline_mode<synchronous>, transform_indices = @transform_7, window_bounds = array<i64: 4, 32, 1>}, {pipeline_mode = #tpu.pipeline_mode<synchronous>, transform_indices = @transform_8, window_bounds = array<i64: 8, 32>}, {pipeline_mode = #tpu.pipeline_mode<synchronous>, transform_indices = @transform_9, window_bounds = array<i64: 8, 1>}, {pipeline_mode = #tpu.pipeline_mode<synchronous>, transform_indices = @transform_10, window_bounds = array<i64: 2, 32, 8>}, {pipeline_mode = #tpu.pipeline_mode<synchronous>, transform_indices = @transform_11, window_bounds = array<i64: 2, 32, 1>}, {pipeline_mode = #tpu.pipeline_mode<synchronous>, transform_indices = @transform_12, window_bounds = array<i64: 2, 4, 32, 96>}, {pipeline_mode = #tpu.pipeline_mode<synchronous>, transform_indices = @transform_13, window_bounds = array<i64: 2, 4, 32, 1>}, {pipeline_mode = #tpu.pipeline_mode<synchronous>, transform_indices = @transform_14, window_bounds = array<i64: 2, 4, 32, 32>}, {pipeline_mode = #tpu.pipeline_mode<synchronous>, transform_indices = @transform_15, window_bounds = array<i64: 2, 4, 32, 1>}, {pipeline_mode = #tpu.pipeline_mode<synchronous>, transform_indices = @transform_16, window_bounds = array<i64: 2, 8, 32>}, {pipeline_mode = #tpu.pipeline_mode<synchronous>, transform_indices = @transform_17, window_bounds = array<i64: 2, 8, 1>}, {transform_indices = @transform_18, window_bounds = array<i64: 3, 1, 8, 128>}]} {
    %c0 = arith.constant 0 : index
    %c0_0 = arith.constant 0 : index
    %c0_1 = arith.constant 0 : index
    %0 = vector.load %arg2[%c0, %c0_0, %c0_1] : memref<1x1x128xf32, #tpu.memory_space<vmem>>, vector<1x1x128xf32>
    %1 = vector.shape_cast %0 : vector<1x1x128xf32> to vector<1x128xf32>
    %2 = vector.shape_cast %1 : vector<1x128xf32> to vector<1x128xf32>
    %3 = vector.broadcast %2 : vector<1x128xf32> to vector<32x128xf32>
    %4 = vector.shape_cast %1 : vector<1x128xf32> to vector<1x128xf32>
    %5 = vector.broadcast %4 : vector<1x128xf32> to vector<8x128xf32>
    %6 = tpu.iota {dimensions = array<i32: 1>} : vector<32x128xi32>
    %c0_2 = arith.constant 0 : index
    %c0_3 = arith.constant 0 : index
    %c0_4 = arith.constant 0 : index
    %7 = vector.load %arg1[%c0_2, %c0_3, %c0_4] : memref<1x32x128xf32, #tpu.memory_space<vmem>>, vector<1x32x128xf32>
    %8 = vector.shape_cast %7 : vector<1x32x128xf32> to vector<32x128xf32>
    %c0_5 = arith.constant 0 : index
    %c0_6 = arith.constant 0 : index
    %9 = vector.load %arg3[%c0_5, %c0_6] : memref<32x32xf32, #tpu.memory_space<vmem>>, vector<32x32xf32>
    %c0_7 = arith.constant 0 : index
    %c0_8 = arith.constant 0 : index
    %10 = vector.load %arg4[%c0_7, %c0_8] : memref<32x1xf32, #tpu.memory_space<vmem>>, vector<32x1xf32>
    %c0_9 = arith.constant 0 : index
    %c0_10 = arith.constant 0 : index
    %11 = vector.load %arg9[%c0_9, %c0_10] : memref<8x32xf32, #tpu.memory_space<vmem>>, vector<8x32xf32>
    %c0_11 = arith.constant 0 : index
    %c0_12 = arith.constant 0 : index
    %12 = vector.load %arg10[%c0_11, %c0_12] : memref<8x1xf32, #tpu.memory_space<vmem>>, vector<8x1xf32>
    %cst = arith.constant dense<0.000000e+00> : vector<32x128xf32>
    %13 = tpu.matmul %9, %8, %cst {dimension_numbers = #tpu.dot_dimension_numbers<[1], [0], [0], [1], [0, 0, 1, 1], [], []>} : vector<32x32xf32>, vector<32x128xf32>, vector<32x128xf32> -> vector<32x128xf32>
    %14 = vector.broadcast %10 : vector<32x1xf32> to vector<32x128xf32>
    %15 = arith.addf %13, %14 : vector<32x128xf32>
    %c1_i32 = arith.constant 1 : i32
    %16 = vector.broadcast %c1_i32 : i32 to vector<32x128xi32>
    %17 = arith.cmpi sge, %6, %16 : vector<32x128xi32>
    %c1_i32_13 = arith.constant 1 : i32
    %18 = tpu.dynamic_rotate %15 by %c1_i32_13 dim 1 : vector<32x128xf32>, i32 -> vector<32x128xf32>
    %cst_14 = arith.constant 0.000000e+00 : f32
    %19 = vector.broadcast %cst_14 : f32 to vector<32x128xf32>
    %20 = arith.select %17, %18, %19 : vector<32x128xi1>, vector<32x128xf32>
    %c127_i32 = arith.constant 127 : i32
    %21 = vector.broadcast %c127_i32 : i32 to vector<32x128xi32>
    %22 = arith.cmpi slt, %6, %21 : vector<32x128xi32>
    %c127_i32_15 = arith.constant 127 : i32
    %23 = tpu.dynamic_rotate %15 by %c127_i32_15 dim 1 : vector<32x128xf32>, i32 -> vector<32x128xf32>
    %cst_16 = arith.constant 0.000000e+00 : f32
    %24 = vector.broadcast %cst_16 : f32 to vector<32x128xf32>
    %25 = arith.select %22, %23, %24 : vector<32x128xi1>, vector<32x128xf32>
    %26 = tpu.concatenate %20, %15, %25 in 0 : vector<32x128xf32>, vector<32x128xf32>, vector<32x128xf32> -> vector<96x128xf32>
    %c0_17 = arith.constant 0 : index
    %c0_18 = arith.constant 0 : index
    %c0_19 = arith.constant 0 : index
    %27 = vector.load %arg5[%c0_17, %c0_18, %c0_19] : memref<4x32x96xf32, #tpu.memory_space<vmem>>, vector<1x32x96xf32>
    %28 = vector.shape_cast %27 : vector<1x32x96xf32> to vector<32x96xf32>
    %cst_20 = arith.constant dense<0.000000e+00> : vector<32x128xf32>
    %29 = tpu.matmul %28, %26, %cst_20 {dimension_numbers = #tpu.dot_dimension_numbers<[1], [0], [0], [1], [0, 0, 1, 1], [], []>} : vector<32x96xf32>, vector<96x128xf32>, vector<32x128xf32> -> vector<32x128xf32>
    %c0_21 = arith.constant 0 : index
    %c0_22 = arith.constant 0 : index
    %c0_23 = arith.constant 0 : index
    %30 = vector.load %arg6[%c0_21, %c0_22, %c0_23] : memref<4x32x1xf32, #tpu.memory_space<vmem>>, vector<1x32x1xf32>
    %31 = vector.shape_cast %30 : vector<1x32x1xf32> to vector<32x1xf32>
    %32 = vector.broadcast %31 : vector<32x1xf32> to vector<32x128xf32>
    %33 = arith.addf %29, %32 : vector<32x128xf32>
    %cst_24 = arith.constant 0.000000e+00 : f32
    %34 = vector.broadcast %cst_24 : f32 to vector<32x128xf32>
    %35 = arith.maximumf %33, %34 : vector<32x128xf32>
    %c0_25 = arith.constant 0 : index
    %c0_26 = arith.constant 0 : index
    %c0_27 = arith.constant 0 : index
    %36 = vector.load %arg7[%c0_25, %c0_26, %c0_27] : memref<4x32x32xf32, #tpu.memory_space<vmem>>, vector<1x32x32xf32>
    %37 = vector.shape_cast %36 : vector<1x32x32xf32> to vector<32x32xf32>
    %cst_28 = arith.constant dense<0.000000e+00> : vector<32x128xf32>
    %38 = tpu.matmul %37, %35, %cst_28 {dimension_numbers = #tpu.dot_dimension_numbers<[1], [0], [0], [1], [0, 0, 1, 1], [], []>} : vector<32x32xf32>, vector<32x128xf32>, vector<32x128xf32> -> vector<32x128xf32>
    %c0_29 = arith.constant 0 : index
    %c0_30 = arith.constant 0 : index
    %c0_31 = arith.constant 0 : index
    %39 = vector.load %arg8[%c0_29, %c0_30, %c0_31] : memref<4x32x1xf32, #tpu.memory_space<vmem>>, vector<1x32x1xf32>
    %40 = vector.shape_cast %39 : vector<1x32x1xf32> to vector<32x1xf32>
    %41 = vector.broadcast %40 : vector<32x1xf32> to vector<32x128xf32>
    %42 = arith.addf %38, %41 : vector<32x128xf32>
    %43 = arith.addf %15, %42 : vector<32x128xf32>
    %44 = arith.mulf %43, %3 : vector<32x128xf32>
    %c2_i32 = arith.constant 2 : i32
    %45 = vector.broadcast %c2_i32 : i32 to vector<32x128xi32>
    %46 = arith.cmpi sge, %6, %45 : vector<32x128xi32>
    %c2_i32_32 = arith.constant 2 : i32
    %47 = tpu.dynamic_rotate %44 by %c2_i32_32 dim 1 : vector<32x128xf32>, i32 -> vector<32x128xf32>
    %cst_33 = arith.constant 0.000000e+00 : f32
    %48 = vector.broadcast %cst_33 : f32 to vector<32x128xf32>
    %49 = arith.select %46, %47, %48 : vector<32x128xi1>, vector<32x128xf32>
    %c126_i32 = arith.constant 126 : i32
    %50 = vector.broadcast %c126_i32 : i32 to vector<32x128xi32>
    %51 = arith.cmpi slt, %6, %50 : vector<32x128xi32>
    %c126_i32_34 = arith.constant 126 : i32
    %52 = tpu.dynamic_rotate %44 by %c126_i32_34 dim 1 : vector<32x128xf32>, i32 -> vector<32x128xf32>
    %cst_35 = arith.constant 0.000000e+00 : f32
    %53 = vector.broadcast %cst_35 : f32 to vector<32x128xf32>
    %54 = arith.select %51, %52, %53 : vector<32x128xi1>, vector<32x128xf32>
    %55 = tpu.concatenate %49, %44, %54 in 0 : vector<32x128xf32>, vector<32x128xf32>, vector<32x128xf32> -> vector<96x128xf32>
    %c1 = arith.constant 1 : index
    %c0_36 = arith.constant 0 : index
    %c0_37 = arith.constant 0 : index
    %56 = vector.load %arg5[%c1, %c0_36, %c0_37] : memref<4x32x96xf32, #tpu.memory_space<vmem>>, vector<1x32x96xf32>
    %57 = vector.shape_cast %56 : vector<1x32x96xf32> to vector<32x96xf32>
    %cst_38 = arith.constant dense<0.000000e+00> : vector<32x128xf32>
    %58 = tpu.matmul %57, %55, %cst_38 {dimension_numbers = #tpu.dot_dimension_numbers<[1], [0], [0], [1], [0, 0, 1, 1], [], []>} : vector<32x96xf32>, vector<96x128xf32>, vector<32x128xf32> -> vector<32x128xf32>
    %c1_39 = arith.constant 1 : index
    %c0_40 = arith.constant 0 : index
    %c0_41 = arith.constant 0 : index
    %59 = vector.load %arg6[%c1_39, %c0_40, %c0_41] : memref<4x32x1xf32, #tpu.memory_space<vmem>>, vector<1x32x1xf32>
    %60 = vector.shape_cast %59 : vector<1x32x1xf32> to vector<32x1xf32>
    %61 = vector.broadcast %60 : vector<32x1xf32> to vector<32x128xf32>
    %62 = arith.addf %58, %61 : vector<32x128xf32>
    %cst_42 = arith.constant 0.000000e+00 : f32
    %63 = vector.broadcast %cst_42 : f32 to vector<32x128xf32>
    %64 = arith.maximumf %62, %63 : vector<32x128xf32>
    %c1_43 = arith.constant 1 : index
    %c0_44 = arith.constant 0 : index
    %c0_45 = arith.constant 0 : index
    %65 = vector.load %arg7[%c1_43, %c0_44, %c0_45] : memref<4x32x32xf32, #tpu.memory_space<vmem>>, vector<1x32x32xf32>
    %66 = vector.shape_cast %65 : vector<1x32x32xf32> to vector<32x32xf32>
    %cst_46 = arith.constant dense<0.000000e+00> : vector<32x128xf32>
    %67 = tpu.matmul %66, %64, %cst_46 {dimension_numbers = #tpu.dot_dimension_numbers<[1], [0], [0], [1], [0, 0, 1, 1], [], []>} : vector<32x32xf32>, vector<32x128xf32>, vector<32x128xf32> -> vector<32x128xf32>
    %c1_47 = arith.constant 1 : index
    %c0_48 = arith.constant 0 : index
    %c0_49 = arith.constant 0 : index
    %68 = vector.load %arg8[%c1_47, %c0_48, %c0_49] : memref<4x32x1xf32, #tpu.memory_space<vmem>>, vector<1x32x1xf32>
    %69 = vector.shape_cast %68 : vector<1x32x1xf32> to vector<32x1xf32>
    %70 = vector.broadcast %69 : vector<32x1xf32> to vector<32x128xf32>
    %71 = arith.addf %67, %70 : vector<32x128xf32>
    %72 = arith.addf %44, %71 : vector<32x128xf32>
    %73 = arith.mulf %72, %3 : vector<32x128xf32>
    %c4_i32 = arith.constant 4 : i32
    %74 = vector.broadcast %c4_i32 : i32 to vector<32x128xi32>
    %75 = arith.cmpi sge, %6, %74 : vector<32x128xi32>
    %c4_i32_50 = arith.constant 4 : i32
    %76 = tpu.dynamic_rotate %73 by %c4_i32_50 dim 1 : vector<32x128xf32>, i32 -> vector<32x128xf32>
    %cst_51 = arith.constant 0.000000e+00 : f32
    %77 = vector.broadcast %cst_51 : f32 to vector<32x128xf32>
    %78 = arith.select %75, %76, %77 : vector<32x128xi1>, vector<32x128xf32>
    %c124_i32 = arith.constant 124 : i32
    %79 = vector.broadcast %c124_i32 : i32 to vector<32x128xi32>
    %80 = arith.cmpi slt, %6, %79 : vector<32x128xi32>
    %c124_i32_52 = arith.constant 124 : i32
    %81 = tpu.dynamic_rotate %73 by %c124_i32_52 dim 1 : vector<32x128xf32>, i32 -> vector<32x128xf32>
    %cst_53 = arith.constant 0.000000e+00 : f32
    %82 = vector.broadcast %cst_53 : f32 to vector<32x128xf32>
    %83 = arith.select %80, %81, %82 : vector<32x128xi1>, vector<32x128xf32>
    %84 = tpu.concatenate %78, %73, %83 in 0 : vector<32x128xf32>, vector<32x128xf32>, vector<32x128xf32> -> vector<96x128xf32>
    %c2 = arith.constant 2 : index
    %c0_54 = arith.constant 0 : index
    %c0_55 = arith.constant 0 : index
    %85 = vector.load %arg5[%c2, %c0_54, %c0_55] : memref<4x32x96xf32, #tpu.memory_space<vmem>>, vector<1x32x96xf32>
    %86 = vector.shape_cast %85 : vector<1x32x96xf32> to vector<32x96xf32>
    %cst_56 = arith.constant dense<0.000000e+00> : vector<32x128xf32>
    %87 = tpu.matmul %86, %84, %cst_56 {dimension_numbers = #tpu.dot_dimension_numbers<[1], [0], [0], [1], [0, 0, 1, 1], [], []>} : vector<32x96xf32>, vector<96x128xf32>, vector<32x128xf32> -> vector<32x128xf32>
    %c2_57 = arith.constant 2 : index
    %c0_58 = arith.constant 0 : index
    %c0_59 = arith.constant 0 : index
    %88 = vector.load %arg6[%c2_57, %c0_58, %c0_59] : memref<4x32x1xf32, #tpu.memory_space<vmem>>, vector<1x32x1xf32>
    %89 = vector.shape_cast %88 : vector<1x32x1xf32> to vector<32x1xf32>
    %90 = vector.broadcast %89 : vector<32x1xf32> to vector<32x128xf32>
    %91 = arith.addf %87, %90 : vector<32x128xf32>
    %cst_60 = arith.constant 0.000000e+00 : f32
    %92 = vector.broadcast %cst_60 : f32 to vector<32x128xf32>
    %93 = arith.maximumf %91, %92 : vector<32x128xf32>
    %c2_61 = arith.constant 2 : index
    %c0_62 = arith.constant 0 : index
    %c0_63 = arith.constant 0 : index
    %94 = vector.load %arg7[%c2_61, %c0_62, %c0_63] : memref<4x32x32xf32, #tpu.memory_space<vmem>>, vector<1x32x32xf32>
    %95 = vector.shape_cast %94 : vector<1x32x32xf32> to vector<32x32xf32>
    %cst_64 = arith.constant dense<0.000000e+00> : vector<32x128xf32>
    %96 = tpu.matmul %95, %93, %cst_64 {dimension_numbers = #tpu.dot_dimension_numbers<[1], [0], [0], [1], [0, 0, 1, 1], [], []>} : vector<32x32xf32>, vector<32x128xf32>, vector<32x128xf32> -> vector<32x128xf32>
    %c2_65 = arith.constant 2 : index
    %c0_66 = arith.constant 0 : index
    %c0_67 = arith.constant 0 : index
    %97 = vector.load %arg8[%c2_65, %c0_66, %c0_67] : memref<4x32x1xf32, #tpu.memory_space<vmem>>, vector<1x32x1xf32>
    %98 = vector.shape_cast %97 : vector<1x32x1xf32> to vector<32x1xf32>
    %99 = vector.broadcast %98 : vector<32x1xf32> to vector<32x128xf32>
    %100 = arith.addf %96, %99 : vector<32x128xf32>
    %101 = arith.addf %73, %100 : vector<32x128xf32>
    %102 = arith.mulf %101, %3 : vector<32x128xf32>
    %c8_i32 = arith.constant 8 : i32
    %103 = vector.broadcast %c8_i32 : i32 to vector<32x128xi32>
    %104 = arith.cmpi sge, %6, %103 : vector<32x128xi32>
    %c8_i32_68 = arith.constant 8 : i32
    %105 = tpu.dynamic_rotate %102 by %c8_i32_68 dim 1 : vector<32x128xf32>, i32 -> vector<32x128xf32>
    %cst_69 = arith.constant 0.000000e+00 : f32
    %106 = vector.broadcast %cst_69 : f32 to vector<32x128xf32>
    %107 = arith.select %104, %105, %106 : vector<32x128xi1>, vector<32x128xf32>
    %c120_i32 = arith.constant 120 : i32
    %108 = vector.broadcast %c120_i32 : i32 to vector<32x128xi32>
    %109 = arith.cmpi slt, %6, %108 : vector<32x128xi32>
    %c120_i32_70 = arith.constant 120 : i32
    %110 = tpu.dynamic_rotate %102 by %c120_i32_70 dim 1 : vector<32x128xf32>, i32 -> vector<32x128xf32>
    %cst_71 = arith.constant 0.000000e+00 : f32
    %111 = vector.broadcast %cst_71 : f32 to vector<32x128xf32>
    %112 = arith.select %109, %110, %111 : vector<32x128xi1>, vector<32x128xf32>
    %113 = tpu.concatenate %107, %102, %112 in 0 : vector<32x128xf32>, vector<32x128xf32>, vector<32x128xf32> -> vector<96x128xf32>
    %c3 = arith.constant 3 : index
    %c0_72 = arith.constant 0 : index
    %c0_73 = arith.constant 0 : index
    %114 = vector.load %arg5[%c3, %c0_72, %c0_73] : memref<4x32x96xf32, #tpu.memory_space<vmem>>, vector<1x32x96xf32>
    %115 = vector.shape_cast %114 : vector<1x32x96xf32> to vector<32x96xf32>
    %cst_74 = arith.constant dense<0.000000e+00> : vector<32x128xf32>
    %116 = tpu.matmul %115, %113, %cst_74 {dimension_numbers = #tpu.dot_dimension_numbers<[1], [0], [0], [1], [0, 0, 1, 1], [], []>} : vector<32x96xf32>, vector<96x128xf32>, vector<32x128xf32> -> vector<32x128xf32>
    %c3_75 = arith.constant 3 : index
    %c0_76 = arith.constant 0 : index
    %c0_77 = arith.constant 0 : index
    %117 = vector.load %arg6[%c3_75, %c0_76, %c0_77] : memref<4x32x1xf32, #tpu.memory_space<vmem>>, vector<1x32x1xf32>
    %118 = vector.shape_cast %117 : vector<1x32x1xf32> to vector<32x1xf32>
    %119 = vector.broadcast %118 : vector<32x1xf32> to vector<32x128xf32>
    %120 = arith.addf %116, %119 : vector<32x128xf32>
    %cst_78 = arith.constant 0.000000e+00 : f32
    %121 = vector.broadcast %cst_78 : f32 to vector<32x128xf32>
    %122 = arith.maximumf %120, %121 : vector<32x128xf32>
    %c3_79 = arith.constant 3 : index
    %c0_80 = arith.constant 0 : index
    %c0_81 = arith.constant 0 : index
    %123 = vector.load %arg7[%c3_79, %c0_80, %c0_81] : memref<4x32x32xf32, #tpu.memory_space<vmem>>, vector<1x32x32xf32>
    %124 = vector.shape_cast %123 : vector<1x32x32xf32> to vector<32x32xf32>
    %cst_82 = arith.constant dense<0.000000e+00> : vector<32x128xf32>
    %125 = tpu.matmul %124, %122, %cst_82 {dimension_numbers = #tpu.dot_dimension_numbers<[1], [0], [0], [1], [0, 0, 1, 1], [], []>} : vector<32x32xf32>, vector<32x128xf32>, vector<32x128xf32> -> vector<32x128xf32>
    %c3_83 = arith.constant 3 : index
    %c0_84 = arith.constant 0 : index
    %c0_85 = arith.constant 0 : index
    %126 = vector.load %arg8[%c3_83, %c0_84, %c0_85] : memref<4x32x1xf32, #tpu.memory_space<vmem>>, vector<1x32x1xf32>
    %127 = vector.shape_cast %126 : vector<1x32x1xf32> to vector<32x1xf32>
    %128 = vector.broadcast %127 : vector<32x1xf32> to vector<32x128xf32>
    %129 = arith.addf %125, %128 : vector<32x128xf32>
    %130 = arith.addf %102, %129 : vector<32x128xf32>
    %131 = arith.mulf %130, %3 : vector<32x128xf32>
    %cst_86 = arith.constant dense<0.000000e+00> : vector<8x128xf32>
    %132 = tpu.matmul %11, %131, %cst_86 {dimension_numbers = #tpu.dot_dimension_numbers<[1], [0], [0], [1], [0, 0, 1, 1], [], []>} : vector<8x32xf32>, vector<32x128xf32>, vector<8x128xf32> -> vector<8x128xf32>
    %133 = vector.broadcast %12 : vector<8x1xf32> to vector<8x128xf32>
    %134 = arith.addf %132, %133 : vector<8x128xf32>
    %135 = arith.mulf %134, %5 : vector<8x128xf32>
    %c0_87 = arith.constant 0 : index
    %c0_88 = arith.constant 0 : index
    %c0_89 = arith.constant 0 : index
    %c0_90 = arith.constant 0 : index
    %136 = vector.load %arg19[%c0_87, %c0_88, %c0_89, %c0_90] : memref<3x1x8x128xf32, #tpu.memory_space<vmem>>, vector<1x1x8x128xf32>
    %137 = vector.shape_cast %136 : vector<1x1x8x128xf32> to vector<8x128xf32>
    %138 = vector.shape_cast %135 : vector<8x128xf32> to vector<1x1x8x128xf32>
    tpu.vector_store %arg19[%c0_87, %c0_88, %c0_89, %c0_90], %138 {strides = array<i32>} : memref<3x1x8x128xf32, #tpu.memory_space<vmem>>, vector<1x1x8x128xf32>,
    %139 = arith.mulf %135, %5 : vector<8x128xf32>
    %c0_91 = arith.constant 0 : index
    %c0_92 = arith.constant 0 : index
    %c0_93 = arith.constant 0 : index
    %140 = vector.load %arg11[%c0_91, %c0_92, %c0_93] : memref<2x32x8xf32, #tpu.memory_space<vmem>>, vector<1x32x8xf32>
    %141 = vector.shape_cast %140 : vector<1x32x8xf32> to vector<32x8xf32>
    %c0_94 = arith.constant 0 : index
    %c0_95 = arith.constant 0 : index
    %c0_96 = arith.constant 0 : index
    %142 = vector.load %arg12[%c0_94, %c0_95, %c0_96] : memref<2x32x1xf32, #tpu.memory_space<vmem>>, vector<1x32x1xf32>
    %143 = vector.shape_cast %142 : vector<1x32x1xf32> to vector<32x1xf32>
    %c0_97 = arith.constant 0 : index
    %c0_98 = arith.constant 0 : index
    %c0_99 = arith.constant 0 : index
    %144 = vector.load %arg17[%c0_97, %c0_98, %c0_99] : memref<2x8x32xf32, #tpu.memory_space<vmem>>, vector<1x8x32xf32>
    %145 = vector.shape_cast %144 : vector<1x8x32xf32> to vector<8x32xf32>
    %c0_100 = arith.constant 0 : index
    %c0_101 = arith.constant 0 : index
    %c0_102 = arith.constant 0 : index
    %146 = vector.load %arg18[%c0_100, %c0_101, %c0_102] : memref<2x8x1xf32, #tpu.memory_space<vmem>>, vector<1x8x1xf32>
    %147 = vector.shape_cast %146 : vector<1x8x1xf32> to vector<8x1xf32>
    %cst_103 = arith.constant dense<0.000000e+00> : vector<32x128xf32>
    %148 = tpu.matmul %141, %139, %cst_103 {dimension_numbers = #tpu.dot_dimension_numbers<[1], [0], [0], [1], [0, 0, 1, 1], [], []>} : vector<32x8xf32>, vector<8x128xf32>, vector<32x128xf32> -> vector<32x128xf32>
    %149 = vector.broadcast %143 : vector<32x1xf32> to vector<32x128xf32>
    %150 = arith.addf %148, %149 : vector<32x128xf32>
    %c1_i32_104 = arith.constant 1 : i32
    %151 = vector.broadcast %c1_i32_104 : i32 to vector<32x128xi32>
    %152 = arith.cmpi sge, %6, %151 : vector<32x128xi32>
    %c1_i32_105 = arith.constant 1 : i32
    %153 = tpu.dynamic_rotate %150 by %c1_i32_105 dim 1 : vector<32x128xf32>, i32 -> vector<32x128xf32>
    %cst_106 = arith.constant 0.000000e+00 : f32
    %154 = vector.broadcast %cst_106 : f32 to vector<32x128xf32>
    %155 = arith.select %152, %153, %154 : vector<32x128xi1>, vector<32x128xf32>
    %c127_i32_107 = arith.constant 127 : i32
    %156 = vector.broadcast %c127_i32_107 : i32 to vector<32x128xi32>
    %157 = arith.cmpi slt, %6, %156 : vector<32x128xi32>
    %c127_i32_108 = arith.constant 127 : i32
    %158 = tpu.dynamic_rotate %150 by %c127_i32_108 dim 1 : vector<32x128xf32>, i32 -> vector<32x128xf32>
    %cst_109 = arith.constant 0.000000e+00 : f32
    %159 = vector.broadcast %cst_109 : f32 to vector<32x128xf32>
    %160 = arith.select %157, %158, %159 : vector<32x128xi1>, vector<32x128xf32>
    %161 = tpu.concatenate %155, %150, %160 in 0 : vector<32x128xf32>, vector<32x128xf32>, vector<32x128xf32> -> vector<96x128xf32>
    %c0_110 = arith.constant 0 : index
    %c0_111 = arith.constant 0 : index
    %c0_112 = arith.constant 0 : index
    %c0_113 = arith.constant 0 : index
    %162 = vector.load %arg13[%c0_110, %c0_111, %c0_112, %c0_113] : memref<2x4x32x96xf32, #tpu.memory_space<vmem>>, vector<1x1x32x96xf32>
    %163 = vector.shape_cast %162 : vector<1x1x32x96xf32> to vector<32x96xf32>
    %cst_114 = arith.constant dense<0.000000e+00> : vector<32x128xf32>
    %164 = tpu.matmul %163, %161, %cst_114 {dimension_numbers = #tpu.dot_dimension_numbers<[1], [0], [0], [1], [0, 0, 1, 1], [], []>} : vector<32x96xf32>, vector<96x128xf32>, vector<32x128xf32> -> vector<32x128xf32>
    %c0_115 = arith.constant 0 : index
    %c0_116 = arith.constant 0 : index
    %c0_117 = arith.constant 0 : index
    %c0_118 = arith.constant 0 : index
    %165 = vector.load %arg14[%c0_115, %c0_116, %c0_117, %c0_118] : memref<2x4x32x1xf32, #tpu.memory_space<vmem>>, vector<1x1x32x1xf32>
    %166 = vector.shape_cast %165 : vector<1x1x32x1xf32> to vector<32x1xf32>
    %167 = vector.broadcast %166 : vector<32x1xf32> to vector<32x128xf32>
    %168 = arith.addf %164, %167 : vector<32x128xf32>
    %cst_119 = arith.constant 0.000000e+00 : f32
    %169 = vector.broadcast %cst_119 : f32 to vector<32x128xf32>
    %170 = arith.maximumf %168, %169 : vector<32x128xf32>
    %c0_120 = arith.constant 0 : index
    %c0_121 = arith.constant 0 : index
    %c0_122 = arith.constant 0 : index
    %c0_123 = arith.constant 0 : index
    %171 = vector.load %arg15[%c0_120, %c0_121, %c0_122, %c0_123] : memref<2x4x32x32xf32, #tpu.memory_space<vmem>>, vector<1x1x32x32xf32>
    %172 = vector.shape_cast %171 : vector<1x1x32x32xf32> to vector<32x32xf32>
    %cst_124 = arith.constant dense<0.000000e+00> : vector<32x128xf32>
    %173 = tpu.matmul %172, %170, %cst_124 {dimension_numbers = #tpu.dot_dimension_numbers<[1], [0], [0], [1], [0, 0, 1, 1], [], []>} : vector<32x32xf32>, vector<32x128xf32>, vector<32x128xf32> -> vector<32x128xf32>
    %c0_125 = arith.constant 0 : index
    %c0_126 = arith.constant 0 : index
    %c0_127 = arith.constant 0 : index
    %c0_128 = arith.constant 0 : index
    %174 = vector.load %arg16[%c0_125, %c0_126, %c0_127, %c0_128] : memref<2x4x32x1xf32, #tpu.memory_space<vmem>>, vector<1x1x32x1xf32>
    %175 = vector.shape_cast %174 : vector<1x1x32x1xf32> to vector<32x1xf32>
    %176 = vector.broadcast %175 : vector<32x1xf32> to vector<32x128xf32>
    %177 = arith.addf %173, %176 : vector<32x128xf32>
    %178 = arith.addf %150, %177 : vector<32x128xf32>
    %179 = arith.mulf %178, %3 : vector<32x128xf32>
    %c2_i32_129 = arith.constant 2 : i32
    %180 = vector.broadcast %c2_i32_129 : i32 to vector<32x128xi32>
    %181 = arith.cmpi sge, %6, %180 : vector<32x128xi32>
    %c2_i32_130 = arith.constant 2 : i32
    %182 = tpu.dynamic_rotate %179 by %c2_i32_130 dim 1 : vector<32x128xf32>, i32 -> vector<32x128xf32>
    %cst_131 = arith.constant 0.000000e+00 : f32
    %183 = vector.broadcast %cst_131 : f32 to vector<32x128xf32>
    %184 = arith.select %181, %182, %183 : vector<32x128xi1>, vector<32x128xf32>
    %c126_i32_132 = arith.constant 126 : i32
    %185 = vector.broadcast %c126_i32_132 : i32 to vector<32x128xi32>
    %186 = arith.cmpi slt, %6, %185 : vector<32x128xi32>
    %c126_i32_133 = arith.constant 126 : i32
    %187 = tpu.dynamic_rotate %179 by %c126_i32_133 dim 1 : vector<32x128xf32>, i32 -> vector<32x128xf32>
    %cst_134 = arith.constant 0.000000e+00 : f32
    %188 = vector.broadcast %cst_134 : f32 to vector<32x128xf32>
    %189 = arith.select %186, %187, %188 : vector<32x128xi1>, vector<32x128xf32>
    %190 = tpu.concatenate %184, %179, %189 in 0 : vector<32x128xf32>, vector<32x128xf32>, vector<32x128xf32> -> vector<96x128xf32>
    %c0_135 = arith.constant 0 : index
    %c1_136 = arith.constant 1 : index
    %c0_137 = arith.constant 0 : index
    %c0_138 = arith.constant 0 : index
    %191 = vector.load %arg13[%c0_135, %c1_136, %c0_137, %c0_138] : memref<2x4x32x96xf32, #tpu.memory_space<vmem>>, vector<1x1x32x96xf32>
    %192 = vector.shape_cast %191 : vector<1x1x32x96xf32> to vector<32x96xf32>
    %cst_139 = arith.constant dense<0.000000e+00> : vector<32x128xf32>
    %193 = tpu.matmul %192, %190, %cst_139 {dimension_numbers = #tpu.dot_dimension_numbers<[1], [0], [0], [1], [0, 0, 1, 1], [], []>} : vector<32x96xf32>, vector<96x128xf32>, vector<32x128xf32> -> vector<32x128xf32>
    %c0_140 = arith.constant 0 : index
    %c1_141 = arith.constant 1 : index
    %c0_142 = arith.constant 0 : index
    %c0_143 = arith.constant 0 : index
    %194 = vector.load %arg14[%c0_140, %c1_141, %c0_142, %c0_143] : memref<2x4x32x1xf32, #tpu.memory_space<vmem>>, vector<1x1x32x1xf32>
    %195 = vector.shape_cast %194 : vector<1x1x32x1xf32> to vector<32x1xf32>
    %196 = vector.broadcast %195 : vector<32x1xf32> to vector<32x128xf32>
    %197 = arith.addf %193, %196 : vector<32x128xf32>
    %cst_144 = arith.constant 0.000000e+00 : f32
    %198 = vector.broadcast %cst_144 : f32 to vector<32x128xf32>
    %199 = arith.maximumf %197, %198 : vector<32x128xf32>
    %c0_145 = arith.constant 0 : index
    %c1_146 = arith.constant 1 : index
    %c0_147 = arith.constant 0 : index
    %c0_148 = arith.constant 0 : index
    %200 = vector.load %arg15[%c0_145, %c1_146, %c0_147, %c0_148] : memref<2x4x32x32xf32, #tpu.memory_space<vmem>>, vector<1x1x32x32xf32>
    %201 = vector.shape_cast %200 : vector<1x1x32x32xf32> to vector<32x32xf32>
    %cst_149 = arith.constant dense<0.000000e+00> : vector<32x128xf32>
    %202 = tpu.matmul %201, %199, %cst_149 {dimension_numbers = #tpu.dot_dimension_numbers<[1], [0], [0], [1], [0, 0, 1, 1], [], []>} : vector<32x32xf32>, vector<32x128xf32>, vector<32x128xf32> -> vector<32x128xf32>
    %c0_150 = arith.constant 0 : index
    %c1_151 = arith.constant 1 : index
    %c0_152 = arith.constant 0 : index
    %c0_153 = arith.constant 0 : index
    %203 = vector.load %arg16[%c0_150, %c1_151, %c0_152, %c0_153] : memref<2x4x32x1xf32, #tpu.memory_space<vmem>>, vector<1x1x32x1xf32>
    %204 = vector.shape_cast %203 : vector<1x1x32x1xf32> to vector<32x1xf32>
    %205 = vector.broadcast %204 : vector<32x1xf32> to vector<32x128xf32>
    %206 = arith.addf %202, %205 : vector<32x128xf32>
    %207 = arith.addf %179, %206 : vector<32x128xf32>
    %208 = arith.mulf %207, %3 : vector<32x128xf32>
    %c4_i32_154 = arith.constant 4 : i32
    %209 = vector.broadcast %c4_i32_154 : i32 to vector<32x128xi32>
    %210 = arith.cmpi sge, %6, %209 : vector<32x128xi32>
    %c4_i32_155 = arith.constant 4 : i32
    %211 = tpu.dynamic_rotate %208 by %c4_i32_155 dim 1 : vector<32x128xf32>, i32 -> vector<32x128xf32>
    %cst_156 = arith.constant 0.000000e+00 : f32
    %212 = vector.broadcast %cst_156 : f32 to vector<32x128xf32>
    %213 = arith.select %210, %211, %212 : vector<32x128xi1>, vector<32x128xf32>
    %c124_i32_157 = arith.constant 124 : i32
    %214 = vector.broadcast %c124_i32_157 : i32 to vector<32x128xi32>
    %215 = arith.cmpi slt, %6, %214 : vector<32x128xi32>
    %c124_i32_158 = arith.constant 124 : i32
    %216 = tpu.dynamic_rotate %208 by %c124_i32_158 dim 1 : vector<32x128xf32>, i32 -> vector<32x128xf32>
    %cst_159 = arith.constant 0.000000e+00 : f32
    %217 = vector.broadcast %cst_159 : f32 to vector<32x128xf32>
    %218 = arith.select %215, %216, %217 : vector<32x128xi1>, vector<32x128xf32>
    %219 = tpu.concatenate %213, %208, %218 in 0 : vector<32x128xf32>, vector<32x128xf32>, vector<32x128xf32> -> vector<96x128xf32>
    %c0_160 = arith.constant 0 : index
    %c2_161 = arith.constant 2 : index
    %c0_162 = arith.constant 0 : index
    %c0_163 = arith.constant 0 : index
    %220 = vector.load %arg13[%c0_160, %c2_161, %c0_162, %c0_163] : memref<2x4x32x96xf32, #tpu.memory_space<vmem>>, vector<1x1x32x96xf32>
    %221 = vector.shape_cast %220 : vector<1x1x32x96xf32> to vector<32x96xf32>
    %cst_164 = arith.constant dense<0.000000e+00> : vector<32x128xf32>
    %222 = tpu.matmul %221, %219, %cst_164 {dimension_numbers = #tpu.dot_dimension_numbers<[1], [0], [0], [1], [0, 0, 1, 1], [], []>} : vector<32x96xf32>, vector<96x128xf32>, vector<32x128xf32> -> vector<32x128xf32>
    %c0_165 = arith.constant 0 : index
    %c2_166 = arith.constant 2 : index
    %c0_167 = arith.constant 0 : index
    %c0_168 = arith.constant 0 : index
    %223 = vector.load %arg14[%c0_165, %c2_166, %c0_167, %c0_168] : memref<2x4x32x1xf32, #tpu.memory_space<vmem>>, vector<1x1x32x1xf32>
    %224 = vector.shape_cast %223 : vector<1x1x32x1xf32> to vector<32x1xf32>
    %225 = vector.broadcast %224 : vector<32x1xf32> to vector<32x128xf32>
    %226 = arith.addf %222, %225 : vector<32x128xf32>
    %cst_169 = arith.constant 0.000000e+00 : f32
    %227 = vector.broadcast %cst_169 : f32 to vector<32x128xf32>
    %228 = arith.maximumf %226, %227 : vector<32x128xf32>
    %c0_170 = arith.constant 0 : index
    %c2_171 = arith.constant 2 : index
    %c0_172 = arith.constant 0 : index
    %c0_173 = arith.constant 0 : index
    %229 = vector.load %arg15[%c0_170, %c2_171, %c0_172, %c0_173] : memref<2x4x32x32xf32, #tpu.memory_space<vmem>>, vector<1x1x32x32xf32>
    %230 = vector.shape_cast %229 : vector<1x1x32x32xf32> to vector<32x32xf32>
    %cst_174 = arith.constant dense<0.000000e+00> : vector<32x128xf32>
    %231 = tpu.matmul %230, %228, %cst_174 {dimension_numbers = #tpu.dot_dimension_numbers<[1], [0], [0], [1], [0, 0, 1, 1], [], []>} : vector<32x32xf32>, vector<32x128xf32>, vector<32x128xf32> -> vector<32x128xf32>
    %c0_175 = arith.constant 0 : index
    %c2_176 = arith.constant 2 : index
    %c0_177 = arith.constant 0 : index
    %c0_178 = arith.constant 0 : index
    %232 = vector.load %arg16[%c0_175, %c2_176, %c0_177, %c0_178] : memref<2x4x32x1xf32, #tpu.memory_space<vmem>>, vector<1x1x32x1xf32>
    %233 = vector.shape_cast %232 : vector<1x1x32x1xf32> to vector<32x1xf32>
    %234 = vector.broadcast %233 : vector<32x1xf32> to vector<32x128xf32>
    %235 = arith.addf %231, %234 : vector<32x128xf32>
    %236 = arith.addf %208, %235 : vector<32x128xf32>
    %237 = arith.mulf %236, %3 : vector<32x128xf32>
    %c8_i32_179 = arith.constant 8 : i32
    %238 = vector.broadcast %c8_i32_179 : i32 to vector<32x128xi32>
    %239 = arith.cmpi sge, %6, %238 : vector<32x128xi32>
    %c8_i32_180 = arith.constant 8 : i32
    %240 = tpu.dynamic_rotate %237 by %c8_i32_180 dim 1 : vector<32x128xf32>, i32 -> vector<32x128xf32>
    %cst_181 = arith.constant 0.000000e+00 : f32
    %241 = vector.broadcast %cst_181 : f32 to vector<32x128xf32>
    %242 = arith.select %239, %240, %241 : vector<32x128xi1>, vector<32x128xf32>
    %c120_i32_182 = arith.constant 120 : i32
    %243 = vector.broadcast %c120_i32_182 : i32 to vector<32x128xi32>
    %244 = arith.cmpi slt, %6, %243 : vector<32x128xi32>
    %c120_i32_183 = arith.constant 120 : i32
    %245 = tpu.dynamic_rotate %237 by %c120_i32_183 dim 1 : vector<32x128xf32>, i32 -> vector<32x128xf32>
    %cst_184 = arith.constant 0.000000e+00 : f32
    %246 = vector.broadcast %cst_184 : f32 to vector<32x128xf32>
    %247 = arith.select %244, %245, %246 : vector<32x128xi1>, vector<32x128xf32>
    %248 = tpu.concatenate %242, %237, %247 in 0 : vector<32x128xf32>, vector<32x128xf32>, vector<32x128xf32> -> vector<96x128xf32>
    %c0_185 = arith.constant 0 : index
    %c3_186 = arith.constant 3 : index
    %c0_187 = arith.constant 0 : index
    %c0_188 = arith.constant 0 : index
    %249 = vector.load %arg13[%c0_185, %c3_186, %c0_187, %c0_188] : memref<2x4x32x96xf32, #tpu.memory_space<vmem>>, vector<1x1x32x96xf32>
    %250 = vector.shape_cast %249 : vector<1x1x32x96xf32> to vector<32x96xf32>
    %cst_189 = arith.constant dense<0.000000e+00> : vector<32x128xf32>
    %251 = tpu.matmul %250, %248, %cst_189 {dimension_numbers = #tpu.dot_dimension_numbers<[1], [0], [0], [1], [0, 0, 1, 1], [], []>} : vector<32x96xf32>, vector<96x128xf32>, vector<32x128xf32> -> vector<32x128xf32>
    %c0_190 = arith.constant 0 : index
    %c3_191 = arith.constant 3 : index
    %c0_192 = arith.constant 0 : index
    %c0_193 = arith.constant 0 : index
    %252 = vector.load %arg14[%c0_190, %c3_191, %c0_192, %c0_193] : memref<2x4x32x1xf32, #tpu.memory_space<vmem>>, vector<1x1x32x1xf32>
    %253 = vector.shape_cast %252 : vector<1x1x32x1xf32> to vector<32x1xf32>
    %254 = vector.broadcast %253 : vector<32x1xf32> to vector<32x128xf32>
    %255 = arith.addf %251, %254 : vector<32x128xf32>
    %cst_194 = arith.constant 0.000000e+00 : f32
    %256 = vector.broadcast %cst_194 : f32 to vector<32x128xf32>
    %257 = arith.maximumf %255, %256 : vector<32x128xf32>
    %c0_195 = arith.constant 0 : index
    %c3_196 = arith.constant 3 : index
    %c0_197 = arith.constant 0 : index
    %c0_198 = arith.constant 0 : index
    %258 = vector.load %arg15[%c0_195, %c3_196, %c0_197, %c0_198] : memref<2x4x32x32xf32, #tpu.memory_space<vmem>>, vector<1x1x32x32xf32>
    %259 = vector.shape_cast %258 : vector<1x1x32x32xf32> to vector<32x32xf32>
    %cst_199 = arith.constant dense<0.000000e+00> : vector<32x128xf32>
    %260 = tpu.matmul %259, %257, %cst_199 {dimension_numbers = #tpu.dot_dimension_numbers<[1], [0], [0], [1], [0, 0, 1, 1], [], []>} : vector<32x32xf32>, vector<32x128xf32>, vector<32x128xf32> -> vector<32x128xf32>
    %c0_200 = arith.constant 0 : index
    %c3_201 = arith.constant 3 : index
    %c0_202 = arith.constant 0 : index
    %c0_203 = arith.constant 0 : index
    %261 = vector.load %arg16[%c0_200, %c3_201, %c0_202, %c0_203] : memref<2x4x32x1xf32, #tpu.memory_space<vmem>>, vector<1x1x32x1xf32>
    %262 = vector.shape_cast %261 : vector<1x1x32x1xf32> to vector<32x1xf32>
    %263 = vector.broadcast %262 : vector<32x1xf32> to vector<32x128xf32>
    %264 = arith.addf %260, %263 : vector<32x128xf32>
    %265 = arith.addf %237, %264 : vector<32x128xf32>
    %266 = arith.mulf %265, %3 : vector<32x128xf32>
    %cst_204 = arith.constant dense<0.000000e+00> : vector<8x128xf32>
    %267 = tpu.matmul %145, %266, %cst_204 {dimension_numbers = #tpu.dot_dimension_numbers<[1], [0], [0], [1], [0, 0, 1, 1], [], []>} : vector<8x32xf32>, vector<32x128xf32>, vector<8x128xf32> -> vector<8x128xf32>
    %268 = vector.broadcast %147 : vector<8x1xf32> to vector<8x128xf32>
    %269 = arith.addf %267, %268 : vector<8x128xf32>
    %270 = arith.mulf %269, %5 : vector<8x128xf32>
    %c1_205 = arith.constant 1 : index
    %c0_206 = arith.constant 0 : index
    %c0_207 = arith.constant 0 : index
    %c0_208 = arith.constant 0 : index
    %271 = vector.load %arg19[%c1_205, %c0_206, %c0_207, %c0_208] : memref<3x1x8x128xf32, #tpu.memory_space<vmem>>, vector<1x1x8x128xf32>
    %272 = vector.shape_cast %271 : vector<1x1x8x128xf32> to vector<8x128xf32>
    %273 = vector.shape_cast %270 : vector<8x128xf32> to vector<1x1x8x128xf32>
    tpu.vector_store %arg19[%c1_205, %c0_206, %c0_207, %c0_208], %273 {strides = array<i32>} : memref<3x1x8x128xf32, #tpu.memory_space<vmem>>, vector<1x1x8x128xf32>,
    %274 = arith.mulf %270, %5 : vector<8x128xf32>
    %c1_209 = arith.constant 1 : index
    %c0_210 = arith.constant 0 : index
    %c0_211 = arith.constant 0 : index
    %275 = vector.load %arg11[%c1_209, %c0_210, %c0_211] : memref<2x32x8xf32, #tpu.memory_space<vmem>>, vector<1x32x8xf32>
    %276 = vector.shape_cast %275 : vector<1x32x8xf32> to vector<32x8xf32>
    %c1_212 = arith.constant 1 : index
    %c0_213 = arith.constant 0 : index
    %c0_214 = arith.constant 0 : index
    %277 = vector.load %arg12[%c1_212, %c0_213, %c0_214] : memref<2x32x1xf32, #tpu.memory_space<vmem>>, vector<1x32x1xf32>
    %278 = vector.shape_cast %277 : vector<1x32x1xf32> to vector<32x1xf32>
    %c1_215 = arith.constant 1 : index
    %c0_216 = arith.constant 0 : index
    %c0_217 = arith.constant 0 : index
    %279 = vector.load %arg17[%c1_215, %c0_216, %c0_217] : memref<2x8x32xf32, #tpu.memory_space<vmem>>, vector<1x8x32xf32>
    %280 = vector.shape_cast %279 : vector<1x8x32xf32> to vector<8x32xf32>
    %c1_218 = arith.constant 1 : index
    %c0_219 = arith.constant 0 : index
    %c0_220 = arith.constant 0 : index
    %281 = vector.load %arg18[%c1_218, %c0_219, %c0_220] : memref<2x8x1xf32, #tpu.memory_space<vmem>>, vector<1x8x1xf32>
    %282 = vector.shape_cast %281 : vector<1x8x1xf32> to vector<8x1xf32>
    %cst_221 = arith.constant dense<0.000000e+00> : vector<32x128xf32>
    %283 = tpu.matmul %276, %274, %cst_221 {dimension_numbers = #tpu.dot_dimension_numbers<[1], [0], [0], [1], [0, 0, 1, 1], [], []>} : vector<32x8xf32>, vector<8x128xf32>, vector<32x128xf32> -> vector<32x128xf32>
    %284 = vector.broadcast %278 : vector<32x1xf32> to vector<32x128xf32>
    %285 = arith.addf %283, %284 : vector<32x128xf32>
    %c1_i32_222 = arith.constant 1 : i32
    %286 = vector.broadcast %c1_i32_222 : i32 to vector<32x128xi32>
    %287 = arith.cmpi sge, %6, %286 : vector<32x128xi32>
    %c1_i32_223 = arith.constant 1 : i32
    %288 = tpu.dynamic_rotate %285 by %c1_i32_223 dim 1 : vector<32x128xf32>, i32 -> vector<32x128xf32>
    %cst_224 = arith.constant 0.000000e+00 : f32
    %289 = vector.broadcast %cst_224 : f32 to vector<32x128xf32>
    %290 = arith.select %287, %288, %289 : vector<32x128xi1>, vector<32x128xf32>
    %c127_i32_225 = arith.constant 127 : i32
    %291 = vector.broadcast %c127_i32_225 : i32 to vector<32x128xi32>
    %292 = arith.cmpi slt, %6, %291 : vector<32x128xi32>
    %c127_i32_226 = arith.constant 127 : i32
    %293 = tpu.dynamic_rotate %285 by %c127_i32_226 dim 1 : vector<32x128xf32>, i32 -> vector<32x128xf32>
    %cst_227 = arith.constant 0.000000e+00 : f32
    %294 = vector.broadcast %cst_227 : f32 to vector<32x128xf32>
    %295 = arith.select %292, %293, %294 : vector<32x128xi1>, vector<32x128xf32>
    %296 = tpu.concatenate %290, %285, %295 in 0 : vector<32x128xf32>, vector<32x128xf32>, vector<32x128xf32> -> vector<96x128xf32>
    %c1_228 = arith.constant 1 : index
    %c0_229 = arith.constant 0 : index
    %c0_230 = arith.constant 0 : index
    %c0_231 = arith.constant 0 : index
    %297 = vector.load %arg13[%c1_228, %c0_229, %c0_230, %c0_231] : memref<2x4x32x96xf32, #tpu.memory_space<vmem>>, vector<1x1x32x96xf32>
    %298 = vector.shape_cast %297 : vector<1x1x32x96xf32> to vector<32x96xf32>
    %cst_232 = arith.constant dense<0.000000e+00> : vector<32x128xf32>
    %299 = tpu.matmul %298, %296, %cst_232 {dimension_numbers = #tpu.dot_dimension_numbers<[1], [0], [0], [1], [0, 0, 1, 1], [], []>} : vector<32x96xf32>, vector<96x128xf32>, vector<32x128xf32> -> vector<32x128xf32>
    %c1_233 = arith.constant 1 : index
    %c0_234 = arith.constant 0 : index
    %c0_235 = arith.constant 0 : index
    %c0_236 = arith.constant 0 : index
    %300 = vector.load %arg14[%c1_233, %c0_234, %c0_235, %c0_236] : memref<2x4x32x1xf32, #tpu.memory_space<vmem>>, vector<1x1x32x1xf32>
    %301 = vector.shape_cast %300 : vector<1x1x32x1xf32> to vector<32x1xf32>
    %302 = vector.broadcast %301 : vector<32x1xf32> to vector<32x128xf32>
    %303 = arith.addf %299, %302 : vector<32x128xf32>
    %cst_237 = arith.constant 0.000000e+00 : f32
    %304 = vector.broadcast %cst_237 : f32 to vector<32x128xf32>
    %305 = arith.maximumf %303, %304 : vector<32x128xf32>
    %c1_238 = arith.constant 1 : index
    %c0_239 = arith.constant 0 : index
    %c0_240 = arith.constant 0 : index
    %c0_241 = arith.constant 0 : index
    %306 = vector.load %arg15[%c1_238, %c0_239, %c0_240, %c0_241] : memref<2x4x32x32xf32, #tpu.memory_space<vmem>>, vector<1x1x32x32xf32>
    %307 = vector.shape_cast %306 : vector<1x1x32x32xf32> to vector<32x32xf32>
    %cst_242 = arith.constant dense<0.000000e+00> : vector<32x128xf32>
    %308 = tpu.matmul %307, %305, %cst_242 {dimension_numbers = #tpu.dot_dimension_numbers<[1], [0], [0], [1], [0, 0, 1, 1], [], []>} : vector<32x32xf32>, vector<32x128xf32>, vector<32x128xf32> -> vector<32x128xf32>
    %c1_243 = arith.constant 1 : index
    %c0_244 = arith.constant 0 : index
    %c0_245 = arith.constant 0 : index
    %c0_246 = arith.constant 0 : index
    %309 = vector.load %arg16[%c1_243, %c0_244, %c0_245, %c0_246] : memref<2x4x32x1xf32, #tpu.memory_space<vmem>>, vector<1x1x32x1xf32>
    %310 = vector.shape_cast %309 : vector<1x1x32x1xf32> to vector<32x1xf32>
    %311 = vector.broadcast %310 : vector<32x1xf32> to vector<32x128xf32>
    %312 = arith.addf %308, %311 : vector<32x128xf32>
    %313 = arith.addf %285, %312 : vector<32x128xf32>
    %314 = arith.mulf %313, %3 : vector<32x128xf32>
    %c2_i32_247 = arith.constant 2 : i32
    %315 = vector.broadcast %c2_i32_247 : i32 to vector<32x128xi32>
    %316 = arith.cmpi sge, %6, %315 : vector<32x128xi32>
    %c2_i32_248 = arith.constant 2 : i32
    %317 = tpu.dynamic_rotate %314 by %c2_i32_248 dim 1 : vector<32x128xf32>, i32 -> vector<32x128xf32>
    %cst_249 = arith.constant 0.000000e+00 : f32
    %318 = vector.broadcast %cst_249 : f32 to vector<32x128xf32>
    %319 = arith.select %316, %317, %318 : vector<32x128xi1>, vector<32x128xf32>
    %c126_i32_250 = arith.constant 126 : i32
    %320 = vector.broadcast %c126_i32_250 : i32 to vector<32x128xi32>
    %321 = arith.cmpi slt, %6, %320 : vector<32x128xi32>
    %c126_i32_251 = arith.constant 126 : i32
    %322 = tpu.dynamic_rotate %314 by %c126_i32_251 dim 1 : vector<32x128xf32>, i32 -> vector<32x128xf32>
    %cst_252 = arith.constant 0.000000e+00 : f32
    %323 = vector.broadcast %cst_252 : f32 to vector<32x128xf32>
    %324 = arith.select %321, %322, %323 : vector<32x128xi1>, vector<32x128xf32>
    %325 = tpu.concatenate %319, %314, %324 in 0 : vector<32x128xf32>, vector<32x128xf32>, vector<32x128xf32> -> vector<96x128xf32>
    %c1_253 = arith.constant 1 : index
    %c1_254 = arith.constant 1 : index
    %c0_255 = arith.constant 0 : index
    %c0_256 = arith.constant 0 : index
    %326 = vector.load %arg13[%c1_253, %c1_254, %c0_255, %c0_256] : memref<2x4x32x96xf32, #tpu.memory_space<vmem>>, vector<1x1x32x96xf32>
    %327 = vector.shape_cast %326 : vector<1x1x32x96xf32> to vector<32x96xf32>
    %cst_257 = arith.constant dense<0.000000e+00> : vector<32x128xf32>
    %328 = tpu.matmul %327, %325, %cst_257 {dimension_numbers = #tpu.dot_dimension_numbers<[1], [0], [0], [1], [0, 0, 1, 1], [], []>} : vector<32x96xf32>, vector<96x128xf32>, vector<32x128xf32> -> vector<32x128xf32>
    %c1_258 = arith.constant 1 : index
    %c1_259 = arith.constant 1 : index
    %c0_260 = arith.constant 0 : index
    %c0_261 = arith.constant 0 : index
    %329 = vector.load %arg14[%c1_258, %c1_259, %c0_260, %c0_261] : memref<2x4x32x1xf32, #tpu.memory_space<vmem>>, vector<1x1x32x1xf32>
    %330 = vector.shape_cast %329 : vector<1x1x32x1xf32> to vector<32x1xf32>
    %331 = vector.broadcast %330 : vector<32x1xf32> to vector<32x128xf32>
    %332 = arith.addf %328, %331 : vector<32x128xf32>
    %cst_262 = arith.constant 0.000000e+00 : f32
    %333 = vector.broadcast %cst_262 : f32 to vector<32x128xf32>
    %334 = arith.maximumf %332, %333 : vector<32x128xf32>
    %c1_263 = arith.constant 1 : index
    %c1_264 = arith.constant 1 : index
    %c0_265 = arith.constant 0 : index
    %c0_266 = arith.constant 0 : index
    %335 = vector.load %arg15[%c1_263, %c1_264, %c0_265, %c0_266] : memref<2x4x32x32xf32, #tpu.memory_space<vmem>>, vector<1x1x32x32xf32>
    %336 = vector.shape_cast %335 : vector<1x1x32x32xf32> to vector<32x32xf32>
    %cst_267 = arith.constant dense<0.000000e+00> : vector<32x128xf32>
    %337 = tpu.matmul %336, %334, %cst_267 {dimension_numbers = #tpu.dot_dimension_numbers<[1], [0], [0], [1], [0, 0, 1, 1], [], []>} : vector<32x32xf32>, vector<32x128xf32>, vector<32x128xf32> -> vector<32x128xf32>
    %c1_268 = arith.constant 1 : index
    %c1_269 = arith.constant 1 : index
    %c0_270 = arith.constant 0 : index
    %c0_271 = arith.constant 0 : index
    %338 = vector.load %arg16[%c1_268, %c1_269, %c0_270, %c0_271] : memref<2x4x32x1xf32, #tpu.memory_space<vmem>>, vector<1x1x32x1xf32>
    %339 = vector.shape_cast %338 : vector<1x1x32x1xf32> to vector<32x1xf32>
    %340 = vector.broadcast %339 : vector<32x1xf32> to vector<32x128xf32>
    %341 = arith.addf %337, %340 : vector<32x128xf32>
    %342 = arith.addf %314, %341 : vector<32x128xf32>
    %343 = arith.mulf %342, %3 : vector<32x128xf32>
    %c4_i32_272 = arith.constant 4 : i32
    %344 = vector.broadcast %c4_i32_272 : i32 to vector<32x128xi32>
    %345 = arith.cmpi sge, %6, %344 : vector<32x128xi32>
    %c4_i32_273 = arith.constant 4 : i32
    %346 = tpu.dynamic_rotate %343 by %c4_i32_273 dim 1 : vector<32x128xf32>, i32 -> vector<32x128xf32>
    %cst_274 = arith.constant 0.000000e+00 : f32
    %347 = vector.broadcast %cst_274 : f32 to vector<32x128xf32>
    %348 = arith.select %345, %346, %347 : vector<32x128xi1>, vector<32x128xf32>
    %c124_i32_275 = arith.constant 124 : i32
    %349 = vector.broadcast %c124_i32_275 : i32 to vector<32x128xi32>
    %350 = arith.cmpi slt, %6, %349 : vector<32x128xi32>
    %c124_i32_276 = arith.constant 124 : i32
    %351 = tpu.dynamic_rotate %343 by %c124_i32_276 dim 1 : vector<32x128xf32>, i32 -> vector<32x128xf32>
    %cst_277 = arith.constant 0.000000e+00 : f32
    %352 = vector.broadcast %cst_277 : f32 to vector<32x128xf32>
    %353 = arith.select %350, %351, %352 : vector<32x128xi1>, vector<32x128xf32>
    %354 = tpu.concatenate %348, %343, %353 in 0 : vector<32x128xf32>, vector<32x128xf32>, vector<32x128xf32> -> vector<96x128xf32>
    %c1_278 = arith.constant 1 : index
    %c2_279 = arith.constant 2 : index
    %c0_280 = arith.constant 0 : index
    %c0_281 = arith.constant 0 : index
    %355 = vector.load %arg13[%c1_278, %c2_279, %c0_280, %c0_281] : memref<2x4x32x96xf32, #tpu.memory_space<vmem>>, vector<1x1x32x96xf32>
    %356 = vector.shape_cast %355 : vector<1x1x32x96xf32> to vector<32x96xf32>
    %cst_282 = arith.constant dense<0.000000e+00> : vector<32x128xf32>
    %357 = tpu.matmul %356, %354, %cst_282 {dimension_numbers = #tpu.dot_dimension_numbers<[1], [0], [0], [1], [0, 0, 1, 1], [], []>} : vector<32x96xf32>, vector<96x128xf32>, vector<32x128xf32> -> vector<32x128xf32>
    %c1_283 = arith.constant 1 : index
    %c2_284 = arith.constant 2 : index
    %c0_285 = arith.constant 0 : index
    %c0_286 = arith.constant 0 : index
    %358 = vector.load %arg14[%c1_283, %c2_284, %c0_285, %c0_286] : memref<2x4x32x1xf32, #tpu.memory_space<vmem>>, vector<1x1x32x1xf32>
    %359 = vector.shape_cast %358 : vector<1x1x32x1xf32> to vector<32x1xf32>
    %360 = vector.broadcast %359 : vector<32x1xf32> to vector<32x128xf32>
    %361 = arith.addf %357, %360 : vector<32x128xf32>
    %cst_287 = arith.constant 0.000000e+00 : f32
    %362 = vector.broadcast %cst_287 : f32 to vector<32x128xf32>
    %363 = arith.maximumf %361, %362 : vector<32x128xf32>
    %c1_288 = arith.constant 1 : index
    %c2_289 = arith.constant 2 : index
    %c0_290 = arith.constant 0 : index
    %c0_291 = arith.constant 0 : index
    %364 = vector.load %arg15[%c1_288, %c2_289, %c0_290, %c0_291] : memref<2x4x32x32xf32, #tpu.memory_space<vmem>>, vector<1x1x32x32xf32>
    %365 = vector.shape_cast %364 : vector<1x1x32x32xf32> to vector<32x32xf32>
    %cst_292 = arith.constant dense<0.000000e+00> : vector<32x128xf32>
    %366 = tpu.matmul %365, %363, %cst_292 {dimension_numbers = #tpu.dot_dimension_numbers<[1], [0], [0], [1], [0, 0, 1, 1], [], []>} : vector<32x32xf32>, vector<32x128xf32>, vector<32x128xf32> -> vector<32x128xf32>
    %c1_293 = arith.constant 1 : index
    %c2_294 = arith.constant 2 : index
    %c0_295 = arith.constant 0 : index
    %c0_296 = arith.constant 0 : index
    %367 = vector.load %arg16[%c1_293, %c2_294, %c0_295, %c0_296] : memref<2x4x32x1xf32, #tpu.memory_space<vmem>>, vector<1x1x32x1xf32>
    %368 = vector.shape_cast %367 : vector<1x1x32x1xf32> to vector<32x1xf32>
    %369 = vector.broadcast %368 : vector<32x1xf32> to vector<32x128xf32>
    %370 = arith.addf %366, %369 : vector<32x128xf32>
    %371 = arith.addf %343, %370 : vector<32x128xf32>
    %372 = arith.mulf %371, %3 : vector<32x128xf32>
    %c8_i32_297 = arith.constant 8 : i32
    %373 = vector.broadcast %c8_i32_297 : i32 to vector<32x128xi32>
    %374 = arith.cmpi sge, %6, %373 : vector<32x128xi32>
    %c8_i32_298 = arith.constant 8 : i32
    %375 = tpu.dynamic_rotate %372 by %c8_i32_298 dim 1 : vector<32x128xf32>, i32 -> vector<32x128xf32>
    %cst_299 = arith.constant 0.000000e+00 : f32
    %376 = vector.broadcast %cst_299 : f32 to vector<32x128xf32>
    %377 = arith.select %374, %375, %376 : vector<32x128xi1>, vector<32x128xf32>
    %c120_i32_300 = arith.constant 120 : i32
    %378 = vector.broadcast %c120_i32_300 : i32 to vector<32x128xi32>
    %379 = arith.cmpi slt, %6, %378 : vector<32x128xi32>
    %c120_i32_301 = arith.constant 120 : i32
    %380 = tpu.dynamic_rotate %372 by %c120_i32_301 dim 1 : vector<32x128xf32>, i32 -> vector<32x128xf32>
    %cst_302 = arith.constant 0.000000e+00 : f32
    %381 = vector.broadcast %cst_302 : f32 to vector<32x128xf32>
    %382 = arith.select %379, %380, %381 : vector<32x128xi1>, vector<32x128xf32>
    %383 = tpu.concatenate %377, %372, %382 in 0 : vector<32x128xf32>, vector<32x128xf32>, vector<32x128xf32> -> vector<96x128xf32>
    %c1_303 = arith.constant 1 : index
    %c3_304 = arith.constant 3 : index
    %c0_305 = arith.constant 0 : index
    %c0_306 = arith.constant 0 : index
    %384 = vector.load %arg13[%c1_303, %c3_304, %c0_305, %c0_306] : memref<2x4x32x96xf32, #tpu.memory_space<vmem>>, vector<1x1x32x96xf32>
    %385 = vector.shape_cast %384 : vector<1x1x32x96xf32> to vector<32x96xf32>
    %cst_307 = arith.constant dense<0.000000e+00> : vector<32x128xf32>
    %386 = tpu.matmul %385, %383, %cst_307 {dimension_numbers = #tpu.dot_dimension_numbers<[1], [0], [0], [1], [0, 0, 1, 1], [], []>} : vector<32x96xf32>, vector<96x128xf32>, vector<32x128xf32> -> vector<32x128xf32>
    %c1_308 = arith.constant 1 : index
    %c3_309 = arith.constant 3 : index
    %c0_310 = arith.constant 0 : index
    %c0_311 = arith.constant 0 : index
    %387 = vector.load %arg14[%c1_308, %c3_309, %c0_310, %c0_311] : memref<2x4x32x1xf32, #tpu.memory_space<vmem>>, vector<1x1x32x1xf32>
    %388 = vector.shape_cast %387 : vector<1x1x32x1xf32> to vector<32x1xf32>
    %389 = vector.broadcast %388 : vector<32x1xf32> to vector<32x128xf32>
    %390 = arith.addf %386, %389 : vector<32x128xf32>
    %cst_312 = arith.constant 0.000000e+00 : f32
    %391 = vector.broadcast %cst_312 : f32 to vector<32x128xf32>
    %392 = arith.maximumf %390, %391 : vector<32x128xf32>
    %c1_313 = arith.constant 1 : index
    %c3_314 = arith.constant 3 : index
    %c0_315 = arith.constant 0 : index
    %c0_316 = arith.constant 0 : index
    %393 = vector.load %arg15[%c1_313, %c3_314, %c0_315, %c0_316] : memref<2x4x32x32xf32, #tpu.memory_space<vmem>>, vector<1x1x32x32xf32>
    %394 = vector.shape_cast %393 : vector<1x1x32x32xf32> to vector<32x32xf32>
    %cst_317 = arith.constant dense<0.000000e+00> : vector<32x128xf32>
    %395 = tpu.matmul %394, %392, %cst_317 {dimension_numbers = #tpu.dot_dimension_numbers<[1], [0], [0], [1], [0, 0, 1, 1], [], []>} : vector<32x32xf32>, vector<32x128xf32>, vector<32x128xf32> -> vector<32x128xf32>
    %c1_318 = arith.constant 1 : index
    %c3_319 = arith.constant 3 : index
    %c0_320 = arith.constant 0 : index
    %c0_321 = arith.constant 0 : index
    %396 = vector.load %arg16[%c1_318, %c3_319, %c0_320, %c0_321] : memref<2x4x32x1xf32, #tpu.memory_space<vmem>>, vector<1x1x32x1xf32>
    %397 = vector.shape_cast %396 : vector<1x1x32x1xf32> to vector<32x1xf32>
    %398 = vector.broadcast %397 : vector<32x1xf32> to vector<32x128xf32>
    %399 = arith.addf %395, %398 : vector<32x128xf32>
    %400 = arith.addf %372, %399 : vector<32x128xf32>
    %401 = arith.mulf %400, %3 : vector<32x128xf32>
    %cst_322 = arith.constant dense<0.000000e+00> : vector<8x128xf32>
    %402 = tpu.matmul %280, %401, %cst_322 {dimension_numbers = #tpu.dot_dimension_numbers<[1], [0], [0], [1], [0, 0, 1, 1], [], []>} : vector<8x32xf32>, vector<32x128xf32>, vector<8x128xf32> -> vector<8x128xf32>
    %403 = vector.broadcast %282 : vector<8x1xf32> to vector<8x128xf32>
    %404 = arith.addf %402, %403 : vector<8x128xf32>
    %405 = arith.mulf %404, %5 : vector<8x128xf32>
    %c2_323 = arith.constant 2 : index
    %c0_324 = arith.constant 0 : index
    %c0_325 = arith.constant 0 : index
    %c0_326 = arith.constant 0 : index
    %406 = vector.load %arg19[%c2_323, %c0_324, %c0_325, %c0_326] : memref<3x1x8x128xf32, #tpu.memory_space<vmem>>, vector<1x1x8x128xf32>
    %407 = vector.shape_cast %406 : vector<1x1x8x128xf32> to vector<8x128xf32>
    %408 = vector.shape_cast %405 : vector<8x128xf32> to vector<1x1x8x128xf32>
    tpu.vector_store %arg19[%c2_323, %c0_324, %c0_325, %c0_326], %408 {strides = array<i32>} : memref<3x1x8x128xf32, #tpu.memory_space<vmem>>, vector<1x1x8x128xf32>,
    return
  }
  func.func @transform_0(%arg0: i32) -> (i32, i32, i32) {
    %c0_i32 = arith.constant 0 : i32
    %c0_i32_0 = arith.constant 0 : i32
    %c0_i32_1 = arith.constant 0 : i32
    return %arg0, %c0_i32, %c0_i32_0 : i32, i32, i32
  }
  func.func @transform_1(%arg0: i32) -> (i32, i32, i32) {
    %c0_i32 = arith.constant 0 : i32
    %c0_i32_0 = arith.constant 0 : i32
    %c0_i32_1 = arith.constant 0 : i32
    return %arg0, %c0_i32, %c0_i32_0 : i32, i32, i32
  }
  func.func @transform_2(%arg0: i32) -> (i32, i32) {
    %c0_i32 = arith.constant 0 : i32
    %c0_i32_0 = arith.constant 0 : i32
    %c0_i32_1 = arith.constant 0 : i32
    return %c0_i32, %c0_i32_0 : i32, i32
  }
  func.func @transform_3(%arg0: i32) -> (i32, i32) {
    %c0_i32 = arith.constant 0 : i32
    %c0_i32_0 = arith.constant 0 : i32
    %c0_i32_1 = arith.constant 0 : i32
    return %c0_i32, %c0_i32_0 : i32, i32
  }
  func.func @transform_4(%arg0: i32) -> (i32, i32, i32) {
    %c0_i32 = arith.constant 0 : i32
    %c0_i32_0 = arith.constant 0 : i32
    %c0_i32_1 = arith.constant 0 : i32
    %c0_i32_2 = arith.constant 0 : i32
    return %c0_i32, %c0_i32_0, %c0_i32_1 : i32, i32, i32
  }
  func.func @transform_5(%arg0: i32) -> (i32, i32, i32) {
    %c0_i32 = arith.constant 0 : i32
    %c0_i32_0 = arith.constant 0 : i32
    %c0_i32_1 = arith.constant 0 : i32
    %c0_i32_2 = arith.constant 0 : i32
    return %c0_i32, %c0_i32_0, %c0_i32_1 : i32, i32, i32
  }
  func.func @transform_6(%arg0: i32) -> (i32, i32, i32) {
    %c0_i32 = arith.constant 0 : i32
    %c0_i32_0 = arith.constant 0 : i32
    %c0_i32_1 = arith.constant 0 : i32
    %c0_i32_2 = arith.constant 0 : i32
    return %c0_i32, %c0_i32_0, %c0_i32_1 : i32, i32, i32
  }
  func.func @transform_7(%arg0: i32) -> (i32, i32, i32) {
    %c0_i32 = arith.constant 0 : i32
    %c0_i32_0 = arith.constant 0 : i32
    %c0_i32_1 = arith.constant 0 : i32
    %c0_i32_2 = arith.constant 0 : i32
    return %c0_i32, %c0_i32_0, %c0_i32_1 : i32, i32, i32
  }
  func.func @transform_8(%arg0: i32) -> (i32, i32) {
    %c0_i32 = arith.constant 0 : i32
    %c0_i32_0 = arith.constant 0 : i32
    %c0_i32_1 = arith.constant 0 : i32
    return %c0_i32, %c0_i32_0 : i32, i32
  }
  func.func @transform_9(%arg0: i32) -> (i32, i32) {
    %c0_i32 = arith.constant 0 : i32
    %c0_i32_0 = arith.constant 0 : i32
    %c0_i32_1 = arith.constant 0 : i32
    return %c0_i32, %c0_i32_0 : i32, i32
  }
  func.func @transform_10(%arg0: i32) -> (i32, i32, i32) {
    %c0_i32 = arith.constant 0 : i32
    %c0_i32_0 = arith.constant 0 : i32
    %c0_i32_1 = arith.constant 0 : i32
    %c0_i32_2 = arith.constant 0 : i32
    return %c0_i32, %c0_i32_0, %c0_i32_1 : i32, i32, i32
  }
  func.func @transform_11(%arg0: i32) -> (i32, i32, i32) {
    %c0_i32 = arith.constant 0 : i32
    %c0_i32_0 = arith.constant 0 : i32
    %c0_i32_1 = arith.constant 0 : i32
    %c0_i32_2 = arith.constant 0 : i32
    return %c0_i32, %c0_i32_0, %c0_i32_1 : i32, i32, i32
  }
  func.func @transform_12(%arg0: i32) -> (i32, i32, i32, i32) {
    %c0_i32 = arith.constant 0 : i32
    %c0_i32_0 = arith.constant 0 : i32
    %c0_i32_1 = arith.constant 0 : i32
    %c0_i32_2 = arith.constant 0 : i32
    %c0_i32_3 = arith.constant 0 : i32
    return %c0_i32, %c0_i32_0, %c0_i32_1, %c0_i32_2 : i32, i32, i32, i32
  }
  func.func @transform_13(%arg0: i32) -> (i32, i32, i32, i32) {
    %c0_i32 = arith.constant 0 : i32
    %c0_i32_0 = arith.constant 0 : i32
    %c0_i32_1 = arith.constant 0 : i32
    %c0_i32_2 = arith.constant 0 : i32
    %c0_i32_3 = arith.constant 0 : i32
    return %c0_i32, %c0_i32_0, %c0_i32_1, %c0_i32_2 : i32, i32, i32, i32
  }
  func.func @transform_14(%arg0: i32) -> (i32, i32, i32, i32) {
    %c0_i32 = arith.constant 0 : i32
    %c0_i32_0 = arith.constant 0 : i32
    %c0_i32_1 = arith.constant 0 : i32
    %c0_i32_2 = arith.constant 0 : i32
    %c0_i32_3 = arith.constant 0 : i32
    return %c0_i32, %c0_i32_0, %c0_i32_1, %c0_i32_2 : i32, i32, i32, i32
  }
  func.func @transform_15(%arg0: i32) -> (i32, i32, i32, i32) {
    %c0_i32 = arith.constant 0 : i32
    %c0_i32_0 = arith.constant 0 : i32
    %c0_i32_1 = arith.constant 0 : i32
    %c0_i32_2 = arith.constant 0 : i32
    %c0_i32_3 = arith.constant 0 : i32
    return %c0_i32, %c0_i32_0, %c0_i32_1, %c0_i32_2 : i32, i32, i32, i32
  }
  func.func @transform_16(%arg0: i32) -> (i32, i32, i32) {
    %c0_i32 = arith.constant 0 : i32
    %c0_i32_0 = arith.constant 0 : i32
    %c0_i32_1 = arith.constant 0 : i32
    %c0_i32_2 = arith.constant 0 : i32
    return %c0_i32, %c0_i32_0, %c0_i32_1 : i32, i32, i32
  }
  func.func @transform_17(%arg0: i32) -> (i32, i32, i32) {
    %c0_i32 = arith.constant 0 : i32
    %c0_i32_0 = arith.constant 0 : i32
    %c0_i32_1 = arith.constant 0 : i32
    %c0_i32_2 = arith.constant 0 : i32
    return %c0_i32, %c0_i32_0, %c0_i32_1 : i32, i32, i32
  }
  func.func @transform_18(%arg0: i32) -> (i32, i32, i32, i32) {
    %c0_i32 = arith.constant 0 : i32
    %c0_i32_0 = arith.constant 0 : i32
    %c0_i32_1 = arith.constant 0 : i32
    %c0_i32_2 = arith.constant 0 : i32
    return %c0_i32, %arg0, %c0_i32_0, %c0_i32_1 : i32, i32, i32, i32
  }
}

</mosaic_0001>

<bundles_post_ra>
// kernel: tpu_custom_call.1
= control target key start
LH: loop header
LB: loop body
LE: loop exit
PB: predicated region body
PF: predicated region fallthrough
CT: control target
= control target key end

     0   :  { %s5308_s0 = inlined_call_operand.vmem [shape: f32[2,32,128], index: 0, kind: input, shape index: {}]   ;;  %s5309_s1 = inlined_call_operand.vmem [shape: f32[2,1,128], index: 1, kind: input, shape index: {}]   ;;  %s5310_s2 = inlined_call_operand.vmem [shape: f32[32,32], index: 2, kind: input, shape index: {}]   ;;  %s5311_s3 = inlined_call_operand.vmem [shape: f32[32,1], index: 3, kind: input, shape index: {}]   ;;  %s5312_s4 = inlined_call_operand.vmem [shape: f32[4,32,96], index: 4, kind: input, shape index: {}]   ;;  %s5313_s5 = inlined_call_operand.vmem [shape: f32[4,32,1], index: 5, kind: input, shape index: {}]   ;;  %s5314_s6 = inlined_call_operand.vmem [shape: f32[4,32,32], index: 6, kind: input, shape index: {}]   ;;  %s5315_s7 = inlined_call_operand.vmem [shape: f32[4,32,1], index: 7, kind: input, shape index: {}]   ;;  %s5316_s8 = inlined_call_operand.vmem [shape: f32[8,32], index: 8, kind: input, shape index: {}]   ;;  %s5317_s9 = inlined_call_operand.vmem [shape: f32[8,1], index: 9, kind: input, shape index: {}]   ;;  %s5318_s10 = inlined_call_operand.vmem [shape: f32[2,32,8], index: 10, kind: input, shape index: {}]   ;;  %s5319_s11 = inlined_call_operand.vmem [shape: f32[2,32,1], index: 11, kind: input, shape index: {}]   ;;  %s5320_s12 = inlined_call_operand.vmem [shape: f32[2,4,32,96], index: 12, kind: input, shape index: {}]   ;;  %s5321_s13 = inlined_call_operand.vmem [shape: f32[2,4,32,1], index: 13, kind: input, shape index: {}]   ;;  %s5322_s14 = inlined_call_operand.vmem [shape: f32[2,4,32,32], index: 14, kind: input, shape index: {}]   ;;  %s5323_s15 = inlined_call_operand.vmem [shape: f32[2,4,32,1], index: 15, kind: input, shape index: {}]   ;;  %s5324_s16 = inlined_call_operand.vmem [shape: f32[2,8,32], index: 16, kind: input, shape index: {}]   ;;  %s5325_s17 = inlined_call_operand.vmem [shape: f32[2,8,1], index: 17, kind: input, shape index: {}]   ;;  %s5326_s18 = inlined_call_operand.hbm [shape: f32[3,2,8,128], index: 18, kind: output, shape index: {}]  }
   0x1   :  { %5355 = sst [smem:[#allocation12_spill]] %s5308_s0 }
   0x2   :  { %5356 = sst [smem:[#allocation13_spill]] %s5309_s1 }
   0x3   :  { %5357 = sst [smem:[#allocation14_spill]] %s5310_s2 }
   0x4   :  { %5358 = sst [smem:[#allocation15_spill]] %s5311_s3 }
   0x5   :  { %5359 = sst [smem:[#allocation16_spill]] %s5312_s4 }
   0x6   :  { %5360 = sst [smem:[#allocation17_spill]] %s5313_s5 }
   0x7   :  { %5361 = sst [smem:[#allocation18_spill]] %s5314_s6 }
   0x8   :  { %5362 = sst [smem:[#allocation19_spill]] %s5326_s18 }
   0x9   :  { %23 = vsyncpa [#allocation3], 0 }
   0xa   :  { %25 = vsyncpa [#allocation3 + $0x1], 0  ;;  %s3762_s27 = smov 0   ;;  %s3764_s28 = smov 0  }
   0xb   :  { %s3766_s29 = smov 0   ;;  %s3768_s30 = smov 0  }
   0xc LB: > { %5363 = sst [smem:[#allocation5_spill]] %s3642_s27  ;;  %s3783_s0 = sadd.s32 4294967295, %s3654_s30   ;;  %s3654_s30 = sphi %s3768_s30, %s5394_s30   ;;  %s3650_s29 = sphi %s3766_s29, %s5396_s29   ;;  %s3646_s28 = sphi %s3764_s28, %s5398_s28   ;;  %s3642_s27 = sphi %s3762_s27, %s5397_s27  }
   0xd   : > { %5364 = sst [smem:[#allocation6_spill]] %s3650_s29  ;;  %s3134_s19 = sadd.s32 4294967294, %s3654_s30  }
   0xe   : > { %5365 = sst [smem:[#allocation7_spill]] %s3654_s30  ;;  %s3787_s1 = sadd.s32 1, %s3654_s30  }
   0xf   : > { %5366 = sst [smem:[#allocation8_spill]] %s3787_s1  ;;  %s426_s20 = sadd.s32 1, %s3650_s29 }
  0x10   : > { %s423_s21 = ssub.s32 %s3654_s30, %s3787_s1  ;;  %p436_p0 = scmp.ne.s32.totalorder %s3650_s29, %s3646_s28 }
  0x11   : > { %p424_p1 = scmp.eq.s32.totalorder %s423_s21, 0  ;;  %p437_p2 = scmp.eq.s32.totalorder %s3783_s0, 1 }
  0x12   : > { %p442_p3 = scmp.ne.s32.totalorder %s3646_s28, %s3642_s27  ;;  %p443_p4 = scmp.eq.s32.totalorder %s3134_s19, 1 }
  0x13   : > { %s3798_s22 = scalar_select %p424_p1, %s3650_s29, %s426_s20  }
  0x14   : > { %p3800_p5 = por %p437_p2, %p436_p0  ;;  %p3804_p6 = por %p443_p4, %p442_p3 }
  0x15   : > { %5367 = sst [smem:[#allocation9_spill]] %s3798_s22  ;;  %p3137_p7 = scmp.ge.s32.totalorder %s3654_s30, 1 }
  0x16   : > { %s5368_s2 = scalar_select %p3800_p5, 1, 0 }
  0x17   : > { %s5370_s23 = scalar_select %p3804_p6, 1, 0 }
  0x18   : > { %5369 = sst [smem:[#allocation10_spill]] %s5368_s2  ;;  %p523_p8 = scmp.lt.s32.totalorder %s3654_s30, 3 }
  0x19   : > { %5371 = sst [smem:[#allocation11_spill]] %s5370_s23 }
  0x1a   : > { %p524_p9 = pnand %p3137_p7, %p523_p8 }
  0x1b   : > { %p580_p10 = scmp.lt.s32.totalorder (!%p524_p9), %s3783_s0, 1  ;;  %s5372_s3 = sld [smem:[#allocation15_spill]] (!%p524_p9) }
  0x1c   : > { %527 = sbr.rel (%p524_p9) target bundleno = 6432 (0x1920), region = 92  ;;  %s5373_s1 = sld [smem:[#allocation13_spill]] (!%p524_p9) }
  0x1d   : > { %s5374_s25 = sld [smem:[#allocation12_spill]] (!%p524_p9)  ;;  %s5352_s24 = smov (!%p524_p9), 127  }
  0x1e   : > { %s5376_s5 = sld [smem:[#allocation17_spill]] (!%p524_p9)  ;;  %s5345_s29 = smov (!%p524_p9), 126  }
  0x1f   : > { %s5377_s4 = sld [smem:[#allocation16_spill]] (!%p524_p9)  ;;  %s5337_s27 = smov (!%p524_p9), 2  }
  0x20   : > { %s5378_s6 = sld [smem:[#allocation18_spill]] (!%p524_p9)  ;;  %s5339_s22 = smov (!%p524_p9), 124  }
  0x21   : > { %v603_v0 = vld [vmem:[%s5372_s3 + $0x8] sm:$0xff]  ;;  %v3656_v1 = vmov 0   ;;  %v605_v2 = vld [vmem:[%s5372_s3 + $0x18] sm:$0xff]  ;;  %s581_s20 = scalar_select %p580_p10, %s3783_s0, 1  ;;  %v602_v5 = vld [vmem:[%s5372_s3] sm:$0xff]  ;;  %vm628_vm0 = vcmask 261120   ;;  %v592_v31 = vlaneseq }
  0x22   : > { %3587 = vset.pattern.permute.xlu1 %v3656_v1  ;;  %3586 = vset.pattern.permute.xlu0 %v3656_v1  ;;  %v604_v6 = vld [vmem:[%s5372_s3 + $0x10] sm:$0xff]  ;;  %v777_v27 = vld [vmem:[%s5315_s7 + $0x18] sm:$0xff]  ;;  %v774_v29 = vld [vmem:[%s5315_s7] sm:$0xff]  ;;  %vm724_vm3 = vcmask 785408   ;;  %s5343_s2 = smov 4   ;;  %vm1448_vm10 = vcmask 64512  }
  0x23   : > { %615 = vperm.xlu1 %3587, %v603_v0   ;;  %625 = vperm.xlu0 %3586, %v605_v2   ;;  %s3522_s21 = sshll.u32 %s581_s20, 5  ;;  %s3821_s23 = scalar_lea.vmem %s5373_s1, %s581_s20  ;;  %v775_v30 = vld [vmem:[%s5315_s7 + $0x8] sm:$0xff]  ;;  %v3890_v32 = vand.u32 127, %v592_v31  ;;  %v776_v43 = vld [vmem:[%s5315_s7 + $0x10] sm:$0xff]  ;;  %v3184_v31 = vld [vmem:[%s5315_s7 + $0x20] sm:$0xff] }
  0x24   : > { %3588 = vset.pattern.permute.xlu2 %v3656_v1  ;;  %s584_s30 = scalar_lea.vmem %s5374_s25, %s3522_s21  ;;  %s5375_s1 = sld [smem:[#allocation14_spill]]  ;;  %v702_v22 = vld [vmem:[%s5376_s5 + $0x10] sm:$0xff]  ;;  %v703_v25 = vld [vmem:[%s5376_s5 + $0x18] sm:$0xff]  ;;  %v700_v28 = vld [vmem:[%s5376_s5] sm:$0xff] }
  0x25   : > { %v597_v3 = vld [vmem:[%s584_s30 + $0x18] sm:$0xff]  ;;  %v596_v4 = vld [vmem:[%s584_s30 + $0x10] sm:$0xff]  ;;  %v595_v7 = vld [vmem:[%s584_s30 + $0x8] sm:$0xff]  ;;  %s5350_s25 = smov 1   ;;  %vm683_vm1 = vcmp.lt.s32.totalorder %v3890_v32, 127  ;;  %vm670_vm2 = vcmp.ge.s32.totalorder %v3890_v32, 1 }
  0x26   : > { %653 = vmatpush.msra.mxu0 %v597_v3  ;;  %v594_v8 = vld [vmem:[%s584_s30] sm:$0xff]  ;;  %v701_v38 = vld [vmem:[%s5376_s5 + $0x8] sm:$0xff]  ;;  %v698_v45 = vld [vmem:[%s5377_s4 + $0x10] sm:$0xff]  ;;  %vm860_vm4 = vcmp.lt.s32.totalorder %v3890_v32, 126  ;;  %vm847_vm5 = vcmp.ge.s32.totalorder %v3890_v32, 2  ;;  %vm1040_vm6 = vcmp.lt.s32.totalorder %v3890_v32, 124 }
  0x27   : > { %v696_v41 = vld [vmem:[%s5377_s4] sm:$0xff]  ;;  %v697_v44 = vld [vmem:[%s5377_s4 + $0x8] sm:$0xff]  ;;  %v699_v46 = vld [vmem:[%s5377_s4 + $0x18] sm:$0xff]  ;;  %vm1027_vm7 = vcmp.ge.s32.totalorder %v3890_v32, 4  ;;  %vm1220_vm8 = vcmp.lt.s32.totalorder %v3890_v32, 120  ;;  %vm1207_vm9 = vcmp.ge.s32.totalorder %v3890_v32, 8 }
  0x28   : > { %654 = vmatpush.msra.mxu0 %v596_v4  ;;  %v770_v63 = vld [vmem:[%s5378_s6] sm:$0xff]  ;;  %v771_v0 = vld [vmem:[%s5378_s6 + $0x8] sm:$0xff]  ;;  %v772_v1 = vld [vmem:[%s5378_s6 + $0x10] sm:$0xff]  ;;  %s5349_s20 = sand.u32 1, %s3646_s28   ;;  %s5379_s21 = smov 126  }
  0x29   : > { %v773_v2 = vld [vmem:[%s5378_s6 + $0x18] sm:$0xff]  ;;  %s5380_s26 = smov 2  }
  0x2a   : > { %655 = vmatpush.msra.mxu0 %v595_v7  ;;  %v598_v9 = vld [vmem:[%s5375_s1] sm:$0xff]  ;;  %v599_v10 = vld [vmem:[%s5375_s1 + $0x8] sm:$0xff]  ;;  %v600_v11 = vld [vmem:[%s5375_s1 + $0x10] sm:$0xff] }
  0x2b   : > { %610 = vperm.xlu1 %3587, %v602_v5   ;;  %620 = vperm.xlu0 %3586, %v604_v6   ;;  %v601_v12 = vld [vmem:[%s5375_s1 + $0x18] sm:$0xff]  ;;  %v3953_v7 = vld [vmem:[%s3821_s23] ss:$0 sm:$0xff]  ;;  %s5383_s1 = smov 120  }
  0x2c   : > { %656 = vmatpush.msra.mxu0 %v594_v8 }
  0x2d   : > { %3140 = vmatmul.msk.f32.vlgmr.msra.gmra.mxu0 %vm628_vm0, %v598_v9 }
  0x35   : > { %3141 = vmatmul.msk.f32.gmra.mxu0 %vm628_vm0, %v599_v10 }
  0x3d   : > { %3142 = vmatmul.msk.f32.gmra.mxu0 %vm628_vm0, %v600_v11 }
  0x45   : > { %3143 = vmatmul.msk.f32.gmra.mxu0 %vm628_vm0, %v601_v12 }
  0x95   : > { %v616_v13 = vpop.permute.xlu1 %615  ;;  %v626_v17 = vpop.permute.xlu0 %625 }
  0x9d   : > { %v611_v14 = vpop.permute.xlu1 %610  ;;  %v621_v20 = vpop.permute.xlu0 %620 }
  0xaa   : > { %v658_v15 = vpop.f32.mrf.mxu0 }
  0xab   : > { %v3848_v16 = vadd.f32 %v658_v15, %v611_v14 }
  0xad   : > { %684 = vrot.lane.b32.xlu1 %v3848_v16, %s5352_s24 }
  0xb2   : > { %v661_v18 = vpop.f32.mrf.mxu0 }
  0xb3   : > { %v3852_v19 = vadd.f32 %v661_v18, %v616_v13 }
  0xb5   : > { %686 = vrot.lane.b32.xlu0 %v3852_v19, %s5352_s24  ;;  %673 = vrot.lane.b32.xlu1 %v3852_v19, %s5350_s25 }
  0xba   : > { %v664_v21 = vpop.f32.mrf.mxu0 }
  0xbb   : > { %v3861_v23 = vadd.f32 %v664_v21, %v621_v20  ;;  %v3167_v21 = vld [vmem:[%s5376_s5 + $0x38] sm:$0xff] }
  0xbd   : > { %675 = vrot.lane.b32.xlu0 %v3861_v23, %s5350_s25  ;;  %716 = vperm.xlu1 %3587, %v702_v22  }
  0xc2   : > { %v667_v24 = vpop.f32.mrf.mxu0 }
  0xc3   : > { %v3868_v26 = vadd.f32 %v667_v24, %v626_v17 }
  0xc5   : > { %690 = vrot.lane.b32.xlu2 %v3868_v26, %s5352_s24  ;;  %721 = vperm.xlu0 %3586, %v703_v25   ;;  %v3164_v25 = vld [vmem:[%s5376_s5 + $0x20] sm:$0xff] }
  0xc6   : > { %795 = vperm.xlu1 %3587, %v777_v27   ;;  %v3185_v27 = vld [vmem:[%s5315_s7 + $0x28] sm:$0xff] }
  0xcd   : > { %688 = vrot.lane.b32.xlu2 %v3861_v23, %s5352_s24  ;;  %706 = vperm.xlu0 %3586, %v700_v28   ;;  %v3186_v28 = vld [vmem:[%s5315_s7 + $0x30] sm:$0xff] }
  0xce   : > { %780 = vperm.xlu1 %3587, %v774_v29   ;;  %v3166_v29 = vld [vmem:[%s5376_s5 + $0x30] sm:$0xff] }
  0xd5   : > { %677 = vrot.lane.b32.xlu2 %v3868_v26, %s5350_s25  ;;  %785 = vperm.xlu0 %3586, %v775_v30   ;;  %v3187_v30 = vld [vmem:[%s5315_s7 + $0x38] sm:$0xff] }
  0xdd   : > { %671 = vrot.lane.b32.xlu2 %v3848_v16, %s5350_s25 }
  0xe5   : > { %711 = vperm.xlu2 %3588, %v701_v38  }
  0xed   : > { %790 = vperm.xlu2 %3588, %v776_v43   ;;  %v3162_v43 = vld [vmem:[%s5377_s4 + $0x30] sm:$0xff] }
 0x11f   : > { %v691_v33 = vpop.permute.xlu2 %690  ;;  %v685_v36 = vpop.permute.xlu1 %684 }
 0x120   : > { %3144 = vmatpush.msk.msra.mxu1 %vm683_vm1, %v691_v33 }
 0x127   : > { %v689_v34 = vpop.permute.xlu2 %688  ;;  %v687_v35 = vpop.permute.xlu0 %686 }
 0x128   : > { %3145 = vmatpush.msk.msra.mxu1 %vm683_vm1, %v689_v34  ;;  %v674_v40 = vpop.permute.xlu1 %673 }
 0x12a   : > { %3146 = vmatpush.msk.msra.mxu1 %vm683_vm1, %v687_v35 }
 0x12c   : > { %3147 = vmatpush.msk.msra.mxu1 %vm683_vm1, %v685_v36 }
 0x12e   : > { %745 = vmatpush.msra.mxu1 %v3868_v26 }
 0x12f   : > { %v678_v37 = vpop.permute.xlu2 %677  ;;  %v676_v39 = vpop.permute.xlu0 %675 }
 0x130   : > { %746 = vmatpush.msra.mxu1 %v3861_v23  ;;  %v717_v51 = vpop.permute.xlu1 %716 }
 0x132   : > { %747 = vmatpush.msra.mxu1 %v3852_v19 }
 0x134   : > { %748 = vmatpush.msra.mxu1 %v3848_v16 }
 0x136   : > { %3148 = vmatpush.msk.msra.mxu1 %vm670_vm2, %v678_v37 }
 0x137   : > { %v672_v42 = vpop.permute.xlu2 %671  ;;  %v722_v50 = vpop.permute.xlu0 %721 }
 0x138   : > { %3149 = vmatpush.msk.msra.mxu1 %vm670_vm2, %v676_v39  ;;  %v796_v13 = vpop.permute.xlu1 %795 }
 0x13a   : > { %3150 = vmatpush.msk.msra.mxu1 %vm670_vm2, %v674_v40  ;;  %v3160_v40 = vld [vmem:[%s5377_s4 + $0x20] sm:$0xff] }
 0x13c   : > { %3151 = vmatpush.msk.msra.mxu1 %vm670_vm2, %v672_v42 }
 0x13d   : > { %3152 = vmatmul.msk.f32.vlgmr.msra.gmra.mxu1 %vm724_vm3, %v696_v41  ;;  %v3161_v41 = vld [vmem:[%s5377_s4 + $0x28] sm:$0xff] }
 0x13f   : > { %v712_v52 = vpop.permute.xlu2 %711  ;;  %v707_v58 = vpop.permute.xlu0 %706 }
 0x140   : > { %v781_v20 = vpop.permute.xlu1 %780 }
 0x145   : > { %3153 = vmatmul.msk.f32.gmra.mxu1 %vm724_vm3, %v697_v44  ;;  %v3163_v44 = vld [vmem:[%s5377_s4 + $0x38] sm:$0xff] }
 0x147   : > { %v786_v4 = vpop.permute.xlu0 %785  ;;  %v791_v10 = vpop.permute.xlu2 %790 }
 0x14d   : > { %3154 = vmatmul.msk.f32.gmra.mxu1 %vm724_vm3, %v698_v45 }
 0x155   : > { %3155 = vmatmul.msk.f32.gmra.mxu1 %vm724_vm3, %v699_v46 }
 0x1ba   : > { %v754_v47 = vpop.f32.mrf.mxu1 }
 0x1bb   : > { %v755_v59 = vadd.f32 %v754_v47, %v707_v58 }
 0x1bd   : > { %v766_v62 = vmax.f32 %v755_v59, 0.0 }
 0x1c2   : > { %v757_v48 = vpop.f32.mrf.mxu1 }
 0x1c3   : > { %v758_v56 = vadd.f32 %v757_v48, %v712_v52 }
 0x1c5   : > { %v767_v61 = vmax.f32 %v758_v56, 0.0 }
 0x1ca   : > { %v760_v49 = vpop.f32.mrf.mxu1 }
 0x1cb   : > { %v761_v54 = vadd.f32 %v760_v49, %v717_v51 }
 0x1cd   : > { %v768_v60 = vmax.f32 %v761_v54, 0.0 }
 0x1d2   : > { %v763_v53 = vpop.f32.mrf.mxu1 }
 0x1d3   : > { %v764_v55 = vadd.f32 %v763_v53, %v722_v50 }
 0x1d5   : > { %v769_v57 = vmax.f32 %v764_v55, 0.0 }
 0x1d7   : > { %822 = vmatpush.msra.mxu2 %v769_v57 }
 0x1d9   : > { %823 = vmatpush.msra.mxu2 %v768_v60 }
 0x1db   : > { %824 = vmatpush.msra.mxu2 %v767_v61  ;;  %v3180_v61 = vld [vmem:[%s5378_s6 + $0x20] sm:$0xff] }
 0x1dd   : > { %825 = vmatpush.msra.mxu2 %v766_v62  ;;  %v3181_v62 = vld [vmem:[%s5378_s6 + $0x28] sm:$0xff] }
 0x1de   : > { %3156 = vmatmul.msk.f32.vlgmr.msra.gmra.mxu2 %vm628_vm0, %v770_v63  ;;  %v3182_v63 = vld [vmem:[%s5378_s6 + $0x30] sm:$0xff] }
 0x1e6   : > { %3157 = vmatmul.msk.f32.gmra.mxu2 %vm628_vm0, %v771_v0  ;;  %v3183_v0 = vld [vmem:[%s5378_s6 + $0x38] sm:$0xff] }
 0x1ee   : > { %3158 = vmatmul.msk.f32.gmra.mxu2 %vm628_vm0, %v772_v1 }
 0x1f6   : > { %3159 = vmatmul.msk.f32.gmra.mxu2 %vm628_vm0, %v773_v2 }
 0x261   : > { %v827_v3 = vpop.f32.mrf.mxu2 }
 0x262   : > { %v828_v22 = vadd.f32 %v827_v3, %v781_v20 }
 0x264   : > { %v839_v24 = vadd.f32 %v828_v22, %v3848_v16  ;;  %v3165_v16 = vld [vmem:[%s5376_s5 + $0x28] sm:$0xff] }
 0x269   : > { %v830_v5 = vpop.f32.mrf.mxu2 }
 0x26a   : > { %v831_v6 = vadd.f32 %v830_v5, %v786_v4 }
 0x26c   : > { %v840_v8 = vadd.f32 %v831_v6, %v3852_v19 }
 0x26e   : > { %v3957_v9 = vmul.f32 %v3953_v7, %v840_v8 }
 0x270   : > { %863 = vrot.lane.b32.xlu1 %v3957_v9, %s5345_s29 }
 0x271   : > { %v833_v11 = vpop.f32.mrf.mxu2 }
 0x272   : > { %v834_v12 = vadd.f32 %v833_v11, %v791_v10 }
 0x274   : > { %v841_v14 = vadd.f32 %v834_v12, %v3861_v23 }
 0x276   : > { %v3963_v15 = vmul.f32 %v3953_v7, %v841_v14 }
 0x278   : > { %865 = vrot.lane.b32.xlu0 %v3963_v15, %s5345_s29  ;;  %852 = vrot.lane.b32.xlu1 %v3963_v15, %s5337_s27 }
 0x279   : > { %v836_v17 = vpop.f32.mrf.mxu2 }
 0x27a   : > { %v837_v18 = vadd.f32 %v836_v17, %v796_v13 }
 0x27c   : > { %v842_v19 = vadd.f32 %v837_v18, %v3868_v26  ;;  %v3985_v26 = vmul.f32 %v3953_v7, %v839_v24  ;;  %v3196_v24 = vld [vmem:[%s5376_s5 + $0x40] sm:$0xff] }
 0x27e   : > { %v3974_v23 = vmul.f32 %v3953_v7, %v842_v19 }
 0x280   : > { %900 = vperm.xlu1 %3587, %v3167_v21   ;;  %854 = vrot.lane.b32.xlu0 %v3974_v23, %s5337_s27 }
 0x281   : > { %867 = vrot.lane.b32.xlu2 %v3974_v23, %s5345_s29 }
 0x288   : > { %885 = vperm.xlu1 %3587, %v3164_v25   ;;  %848 = vrot.lane.b32.xlu0 %v3985_v26, %s5337_s27  ;;  %v3197_v25 = vld [vmem:[%s5376_s5 + $0x48] sm:$0xff] }
 0x289   : > { %861 = vrot.lane.b32.xlu2 %v3985_v26, %s5345_s29 }
 0x290   : > { %965 = vperm.xlu1 %3587, %v3185_v27   ;;  %890 = vperm.xlu0 %3586, %v3165_v16   ;;  %v3218_v27 = vld [vmem:[%s5315_s7 + $0x50] sm:$0xff] }
 0x291   : > { %850 = vrot.lane.b32.xlu2 %v3957_v9, %s5337_s27  ;;  %v3198_v16 = vld [vmem:[%s5376_s5 + $0x50] sm:$0xff]  ;;  %s5341_s27 = smov 120  }
 0x298   : > { %970 = vperm.xlu0 %3586, %v3186_v28   ;;  %v3219_v28 = vld [vmem:[%s5315_s7 + $0x58] sm:$0xff] }
 0x299   : > { %895 = vperm.xlu2 %3588, %v3166_v29   ;;  %v3216_v29 = vld [vmem:[%s5315_s7 + $0x40] sm:$0xff] }
 0x2a1   : > { %975 = vperm.xlu2 %3588, %v3187_v30  }
 0x2a9   : > { %960 = vperm.xlu2 %3588, %v3184_v31  }
 0x2db   : > { %v868_v33 = vpop.permute.xlu2 %867 }
 0x2dc   : > { %3168 = vmatpush.msk.msrb.mxu0 %vm860_vm4, %v868_v33  ;;  %3523 = vmatpush.msk.msra.mxu3 %vm860_vm4, %v868_v33 }
 0x2e2   : > { %v864_v35 = vpop.permute.xlu1 %863 }
 0x2e3   : > { %v862_v36 = vpop.permute.xlu2 %861 }
 0x2ea   : > { %v866_v34 = vpop.permute.xlu0 %865  ;;  %v853_v38 = vpop.permute.xlu1 %852 }
 0x2eb   : > { %3169 = vmatpush.msk.msrb.mxu0 %vm860_vm4, %v866_v34  ;;  %3524 = vmatpush.msk.msra.mxu3 %vm860_vm4, %v866_v34  ;;  %v851_v39 = vpop.permute.xlu2 %850 }
 0x2ed   : > { %3170 = vmatpush.msk.msrb.mxu0 %vm860_vm4, %v864_v35  ;;  %3525 = vmatpush.msk.msra.mxu3 %vm860_vm4, %v864_v35 }
 0x2ef   : > { %3171 = vmatpush.msk.msrb.mxu0 %vm860_vm4, %v862_v36  ;;  %3526 = vmatpush.msk.msra.mxu3 %vm860_vm4, %v862_v36 }
 0x2f1   : > { %923 = vmatpush.msrb.mxu0 %v3974_v23  ;;  %3527 = vmatpush.msra.mxu3 %v3974_v23 }
 0x2f2   : > { %v855_v37 = vpop.permute.xlu0 %854  ;;  %v901_v47 = vpop.permute.xlu1 %900 }
 0x2f3   : > { %924 = vmatpush.msrb.mxu0 %v3963_v15  ;;  %3528 = vmatpush.msra.mxu3 %v3963_v15  ;;  %v896_v48 = vpop.permute.xlu2 %895 }
 0x2f5   : > { %925 = vmatpush.msrb.mxu0 %v3957_v9  ;;  %3529 = vmatpush.msra.mxu3 %v3957_v9 }
 0x2f7   : > { %926 = vmatpush.msrb.mxu0 %v3985_v26  ;;  %3530 = vmatpush.msra.mxu3 %v3985_v26 }
 0x2f9   : > { %3172 = vmatpush.msk.msrb.mxu0 %vm847_vm5, %v855_v37  ;;  %3531 = vmatpush.msk.msra.mxu3 %vm847_vm5, %v855_v37 }
 0x2fa   : > { %v849_v42 = vpop.permute.xlu0 %848  ;;  %v886_v56 = vpop.permute.xlu1 %885 }
 0x2fb   : > { %3173 = vmatpush.msk.msrb.mxu0 %vm847_vm5, %v853_v38  ;;  %3532 = vmatpush.msk.msra.mxu3 %vm847_vm5, %v853_v38  ;;  %v976_v12 = vpop.permute.xlu2 %975  ;;  %v3192_v38 = vld [vmem:[%s5377_s4 + $0x40] sm:$0xff] }
 0x2fd   : > { %3174 = vmatpush.msk.msrb.mxu0 %vm847_vm5, %v851_v39  ;;  %3533 = vmatpush.msk.msra.mxu3 %vm847_vm5, %v851_v39 }
 0x2ff   : > { %3175 = vmatpush.msk.msrb.mxu0 %vm847_vm5, %v849_v42  ;;  %3534 = vmatpush.msk.msra.mxu3 %vm847_vm5, %v849_v42  ;;  %v3195_v42 = vld [vmem:[%s5377_s4 + $0x58] sm:$0xff] }
 0x300   : > { %3176 = vmatmul.msk.f32.vlgmr.msrb.gmra.mxu0 %vm724_vm3, %v3160_v40  ;;  %3177 = vmatmul.msk.f32.vlgmr.msra.gmra.mxu3 %vm724_vm3, %v3161_v41  ;;  %v3193_v40 = vld [vmem:[%s5377_s4 + $0x48] sm:$0xff]  ;;  %v3194_v41 = vld [vmem:[%s5377_s4 + $0x50] sm:$0xff] }
 0x302   : > { %v891_v52 = vpop.permute.xlu0 %890  ;;  %v966_v2 = vpop.permute.xlu1 %965 }
 0x303   : > { %v961_v19 = vpop.permute.xlu2 %960 }
 0x308   : > { %3178 = vmatmul.msk.f32.gmra.mxu3 %vm724_vm3, %v3162_v43 }
 0x30a   : > { %v971_v8 = vpop.permute.xlu0 %970 }
 0x310   : > { %3179 = vmatmul.msk.f32.gmra.mxu3 %vm724_vm3, %v3163_v44 }
 0x37d   : > { %v932_v53 = vpop.f32.mrf.mxu0 }
 0x37e   : > { %v933_v57 = vadd.f32 %v932_v53, %v886_v56 }
 0x380   : > { %v944_v60 = vmax.f32 %v933_v57, 0.0 }
 0x383   : > { %v935_v45 = vpop.f32.mrf.mxu3 }
 0x384   : > { %v936_v54 = vadd.f32 %v935_v45, %v891_v52 }
 0x386   : > { %v945_v59 = vmax.f32 %v936_v54, 0.0 }
 0x38b   : > { %v938_v46 = vpop.f32.mrf.mxu3 }
 0x38c   : > { %v939_v50 = vadd.f32 %v938_v46, %v896_v48 }
 0x38e   : > { %v946_v58 = vmax.f32 %v939_v50, 0.0 }
 0x393   : > { %v941_v49 = vpop.f32.mrf.mxu3 }
 0x394   : > { %v942_v51 = vadd.f32 %v941_v49, %v901_v47 }
 0x396   : > { %v947_v55 = vmax.f32 %v942_v51, 0.0 }
 0x398   : > { %1002 = vmatpush.msra.mxu0 %v947_v55 }
 0x39a   : > { %1003 = vmatpush.msra.mxu0 %v946_v58 }
 0x39c   : > { %1004 = vmatpush.msra.mxu0 %v945_v59  ;;  %v3212_v59 = vld [vmem:[%s5378_s6 + $0x40] sm:$0xff] }
 0x39e   : > { %1005 = vmatpush.msra.mxu0 %v944_v60  ;;  %v3213_v60 = vld [vmem:[%s5378_s6 + $0x48] sm:$0xff] }
 0x39f   : > { %3188 = vmatmul.msk.f32.vlgmr.msra.gmra.mxu0 %vm628_vm0, %v3180_v61  ;;  %v3214_v61 = vld [vmem:[%s5378_s6 + $0x50] sm:$0xff] }
 0x3a7   : > { %3189 = vmatmul.msk.f32.gmra.mxu0 %vm628_vm0, %v3181_v62  ;;  %v3215_v62 = vld [vmem:[%s5378_s6 + $0x58] sm:$0xff] }
 0x3af   : > { %3190 = vmatmul.msk.f32.gmra.mxu0 %vm628_vm0, %v3182_v63 }
 0x3b7   : > { %3191 = vmatmul.msk.f32.gmra.mxu0 %vm628_vm0, %v3183_v0 }
 0x41c   : > { %v1007_v1 = vpop.f32.mrf.mxu0 }
 0x41d   : > { %v1008_v20 = vadd.f32 %v1007_v1, %v961_v19  ;;  %v3231_v19 = vld [vmem:[%s5376_s5 + $0x78] sm:$0xff] }
 0x41f   : > { %v1019_v22 = vadd.f32 %v1008_v20, %v3985_v26  ;;  %v3217_v26 = vld [vmem:[%s5315_s7 + $0x48] sm:$0xff] }
 0x424   : > { %v1010_v3 = vpop.f32.mrf.mxu0 }
 0x425   : > { %v1011_v4 = vadd.f32 %v1010_v3, %v966_v2 }
 0x427   : > { %v1020_v5 = vadd.f32 %v1011_v4, %v3957_v9 }
 0x429   : > { %v4087_v6 = vmul.f32 %v3953_v7, %v1020_v5 }
 0x42b   : > { %1043 = vrot.lane.b32.xlu2 %v4087_v6, %s5339_s22 }
 0x42c   : > { %v1013_v10 = vpop.f32.mrf.mxu0 }
 0x42d   : > { %v1014_v11 = vadd.f32 %v1013_v10, %v971_v8 }
 0x42f   : > { %v1021_v13 = vadd.f32 %v1014_v11, %v3963_v15  ;;  %v3199_v15 = vld [vmem:[%s5376_s5 + $0x58] sm:$0xff] }
 0x431   : > { %v4093_v14 = vmul.f32 %v3953_v7, %v1021_v13 }
 0x433   : > { %1045 = vrot.lane.b32.xlu1 %v4093_v14, %s5339_s22  ;;  %1032 = vrot.lane.b32.xlu2 %v4093_v14, %s5343_s2 }
 0x434   : > { %v1016_v9 = vpop.f32.mrf.mxu0 }
 0x435   : > { %v1017_v17 = vadd.f32 %v1016_v9, %v976_v12 }
 0x437   : > { %v1022_v18 = vadd.f32 %v1017_v17, %v3974_v23  ;;  %v4112_v23 = vmul.f32 %v3953_v7, %v1019_v22 }
 0x439   : > { %v4101_v21 = vmul.f32 %v3953_v7, %v1022_v18 }
 0x43b   : > { %1047 = vrot.lane.b32.xlu0 %v4101_v21, %s5339_s22  ;;  %1034 = vrot.lane.b32.xlu1 %v4101_v21, %s5343_s2 }
 0x43c   : > { %1080 = vperm.xlu2 %3588, %v3199_v15  }
 0x443   : > { %1028 = vrot.lane.b32.xlu1 %v4112_v23, %s5343_s2  ;;  %1041 = vrot.lane.b32.xlu0 %v4112_v23, %s5339_s22  ;;  %s5347_s22 = smov 8  }
 0x444   : > { %1065 = vperm.xlu2 %3588, %v3196_v24   ;;  %v3249_v24 = vld [vmem:[%s5315_s7 + $0x68] sm:$0xff] }
 0x44b   : > { %1070 = vperm.xlu1 %3587, %v3197_v25   ;;  %1030 = vrot.lane.b32.xlu0 %v4087_v6, %s5343_s2  ;;  %v3230_v25 = vld [vmem:[%s5376_s5 + $0x70] sm:$0xff]  ;;  %s5386_s2 = smov 1  }
 0x44c   : > { %1145 = vperm.xlu2 %3588, %v3217_v26   ;;  %v1425_v26 = vld [vmem:[%s5319_s11 + $0x18] sm:$0xff] }
 0x453   : > { %1150 = vperm.xlu1 %3587, %v3218_v27   ;;  %1075 = vperm.xlu0 %3586, %v3198_v16   ;;  %v3250_v27 = vld [vmem:[%s5315_s7 + $0x70] sm:$0xff]  ;;  %v3251_v16 = vld [vmem:[%s5315_s7 + $0x78] sm:$0xff] }
 0x45b   : > { %1155 = vperm.xlu0 %3586, %v3219_v28   ;;  %v1422_v28 = vld [vmem:[%s5319_s11] sm:$0xff] }
 0x463   : > { %1140 = vperm.xlu0 %3586, %v3216_v29   ;;  %v607_v29 = vld [vmem:[%s5317_s9] sm:$0xff] }
 0x485   : > { %v1044_v33 = vpop.permute.xlu2 %1043 }
 0x48d   : > { %v1033_v36 = vpop.permute.xlu2 %1032 }
 0x496   : > { %v1081_v46 = vpop.permute.xlu2 %1080 }
 0x49e   : > { %v1066_v54 = vpop.permute.xlu2 %1065 }
 0x4a5   : > { %v1046_v31 = vpop.permute.xlu1 %1045 }
 0x4a6   : > { %v1146_v0 = vpop.permute.xlu2 %1145 }
 0x4ad   : > { %v1048_v30 = vpop.permute.xlu0 %1047  ;;  %v1035_v35 = vpop.permute.xlu1 %1034 }
 0x4ae   : > { %3200 = vmatpush.msk.msrb.mxu2 %vm1040_vm6, %v1048_v30  ;;  %v3248_v30 = vld [vmem:[%s5315_s7 + $0x60] sm:$0xff] }
 0x4b0   : > { %3201 = vmatpush.msk.msrb.mxu2 %vm1040_vm6, %v1046_v31  ;;  %v1423_v31 = vld [vmem:[%s5319_s11 + $0x8] sm:$0xff] }
 0x4b2   : > { %3202 = vmatpush.msk.msrb.mxu2 %vm1040_vm6, %v1044_v33  ;;  %v1424_v33 = vld [vmem:[%s5319_s11 + $0x10] sm:$0xff] }
 0x4b5   : > { %v1042_v34 = vpop.permute.xlu0 %1041  ;;  %v1029_v39 = vpop.permute.xlu1 %1028 }
 0x4b6   : > { %3203 = vmatpush.msk.msrb.mxu2 %vm1040_vm6, %v1042_v34 }
 0x4b8   : > { %1103 = vmatpush.msrb.mxu2 %v4101_v21 }
 0x4ba   : > { %1104 = vmatpush.msrb.mxu2 %v4093_v14 }
 0x4bc   : > { %1105 = vmatpush.msrb.mxu2 %v4087_v6 }
 0x4bd   : > { %v1031_v37 = vpop.permute.xlu0 %1030  ;;  %v1071_v51 = vpop.permute.xlu1 %1070 }
 0x4be   : > { %1106 = vmatpush.msrb.mxu2 %v4112_v23 }
 0x4c0   : > { %3204 = vmatpush.msk.msrb.mxu2 %vm1027_vm7, %v1035_v35 }
 0x4c2   : > { %3205 = vmatpush.msk.msrb.mxu2 %vm1027_vm7, %v1033_v36 }
 0x4c4   : > { %3206 = vmatpush.msk.msrb.mxu2 %vm1027_vm7, %v1031_v37 }
 0x4c5   : > { %v1076_v47 = vpop.permute.xlu0 %1075  ;;  %v1151_v5 = vpop.permute.xlu1 %1150 }
 0x4c6   : > { %3207 = vmatpush.msk.msrb.mxu2 %vm1027_vm7, %v1029_v39 }
 0x4c7   : > { %3208 = vmatmul.msk.f32.vlgmr.msrb.gmra.mxu2 %vm724_vm3, %v3192_v38 }
 0x4cd   : > { %v1156_v11 = vpop.permute.xlu0 %1155 }
 0x4cf   : > { %3209 = vmatmul.msk.f32.gmra.mxu2 %vm724_vm3, %v3193_v40 }
 0x4d5   : > { %v1141_v18 = vpop.permute.xlu0 %1140 }
 0x4d7   : > { %3210 = vmatmul.msk.f32.gmra.mxu2 %vm724_vm3, %v3194_v41  ;;  %v3224_v41 = vld [vmem:[%s5377_s4 + $0x60] sm:$0xff] }
 0x4df   : > { %3211 = vmatmul.msk.f32.gmra.mxu2 %vm724_vm3, %v3195_v42 }
 0x54a   : > { %v1112_v43 = vpop.f32.mrf.mxu2 }
 0x54b   : > { %v1113_v55 = vadd.f32 %v1112_v43, %v1066_v54  ;;  %v3225_v43 = vld [vmem:[%s5377_s4 + $0x68] sm:$0xff] }
 0x54d   : > { %v1124_v58 = vmax.f32 %v1113_v55, 0.0 }
 0x552   : > { %v1115_v44 = vpop.f32.mrf.mxu2 }
 0x553   : > { %v1116_v52 = vadd.f32 %v1115_v44, %v1071_v51  ;;  %v3226_v44 = vld [vmem:[%s5377_s4 + $0x70] sm:$0xff] }
 0x555   : > { %v1125_v57 = vmax.f32 %v1116_v52, 0.0 }
 0x55a   : > { %v1118_v45 = vpop.f32.mrf.mxu2 }
 0x55b   : > { %v1119_v49 = vadd.f32 %v1118_v45, %v1076_v47  ;;  %v3227_v45 = vld [vmem:[%s5377_s4 + $0x78] sm:$0xff] }
 0x55d   : > { %v1126_v56 = vmax.f32 %v1119_v49, 0.0 }
 0x562   : > { %v1121_v48 = vpop.f32.mrf.mxu2 }
 0x563   : > { %v1122_v50 = vadd.f32 %v1121_v48, %v1081_v46 }
 0x565   : > { %v1127_v53 = vmax.f32 %v1122_v50, 0.0 }
 0x567   : > { %1182 = vmatpush.msrb.mxu1 %v1127_v53 }
 0x569   : > { %1183 = vmatpush.msrb.mxu1 %v1126_v56 }
 0x56b   : > { %1184 = vmatpush.msrb.mxu1 %v1125_v57 }
 0x56d   : > { %1185 = vmatpush.msrb.mxu1 %v1124_v58 }
 0x56e   : > { %3220 = vmatmul.msk.f32.vlgmr.msrb.gmra.mxu1 %vm628_vm0, %v3212_v59 }
 0x576   : > { %3221 = vmatmul.msk.f32.gmra.mxu1 %vm628_vm0, %v3213_v60 }
 0x57e   : > { %3222 = vmatmul.msk.f32.gmra.mxu1 %vm628_vm0, %v3214_v61 }
 0x586   : > { %3223 = vmatmul.msk.f32.gmra.mxu1 %vm628_vm0, %v3215_v62  ;;  %v3244_v62 = vld [vmem:[%s5378_s6 + $0x60] sm:$0xff] }
 0x5eb   : > { %v1187_v63 = vpop.f32.mrf.mxu1 }
 0x5f3   : > { %v1190_v1 = vpop.f32.mrf.mxu1 }
 0x5f4   : > { %v1191_v2 = vadd.f32 %v1190_v1, %v1146_v0  ;;  %v3246_v0 = vld [vmem:[%s5378_s6 + $0x70] sm:$0xff]  ;;  %v3247_v1 = vld [vmem:[%s5378_s6 + $0x78] sm:$0xff] }
 0x5f6   : > { %v1200_v3 = vadd.f32 %v1191_v2, %v4087_v6 }
 0x5f8   : > { %v4197_v4 = vmul.f32 %v3953_v7, %v1200_v3 }
 0x5fa   : > { %1223 = vrot.lane.b32.xlu0 %v4197_v4, %s5341_s27 }
 0x5fb   : > { %v1193_v8 = vpop.f32.mrf.mxu1 }
 0x5fc   : > { %v1194_v10 = vadd.f32 %v1193_v8, %v1151_v5 }
 0x5fe   : > { %v1201_v12 = vadd.f32 %v1194_v10, %v4093_v14  ;;  %v1188_v14 = vadd.f32 %v1187_v63, %v1141_v18  ;;  %v3245_v63 = vld [vmem:[%s5378_s6 + $0x68] sm:$0xff] }
 0x600   : > { %v4203_v13 = vmul.f32 %v3953_v7, %v1201_v12  ;;  %v1199_v15 = vadd.f32 %v1188_v14, %v4112_v23  ;;  %v3229_v23 = vld [vmem:[%s5376_s5 + $0x68] sm:$0xff] }
 0x602   : > { %1212 = vrot.lane.b32.xlu0 %v4203_v13, %s5347_s22  ;;  %1225 = vrot.lane.b32.xlu2 %v4203_v13, %s5341_s27  ;;  %v4225_v22 = vmul.f32 %v3953_v7, %v1199_v15 }
 0x603   : > { %v1196_v6 = vpop.f32.mrf.mxu1 }
 0x604   : > { %v1197_v9 = vadd.f32 %v1196_v6, %v1156_v11 }
 0x606   : > { %v1202_v17 = vadd.f32 %v1197_v9, %v4101_v21  ;;  %v3228_v21 = vld [vmem:[%s5376_s5 + $0x60] sm:$0xff]  ;;  %s5385_s5 = smov 127  }
 0x608   : > { %v4214_v20 = vmul.f32 %v3953_v7, %v1202_v17 }
 0x60a   : > { %1227 = vrot.lane.b32.xlu1 %v4214_v20, %s5341_s27  ;;  %1260 = vperm.xlu0 %3586, %v3231_v19  }
 0x60b   : > { %1214 = vrot.lane.b32.xlu2 %v4214_v20, %s5347_s22 }
 0x612   : > { %1221 = vrot.lane.b32.xlu1 %v4225_v22, %s5341_s27  ;;  %1245 = vperm.xlu0 %3586, %v3228_v21   ;;  %s5387_s27 = sld [smem:[#allocation19_spill]] }
 0x613   : > { %1208 = vrot.lane.b32.xlu2 %v4225_v22, %s5347_s22 }
 0x61a   : > { %1210 = vrot.lane.b32.xlu1 %v4197_v4, %s5347_s22  ;;  %1325 = vperm.xlu0 %3586, %v3249_v24   ;;  %s3535_s22 = smul.u32 24, %s5349_s20  ;;  %s5382_s20 = smov 4  }
 0x61b   : > { %1250 = vperm.xlu2 %3588, %v3229_v23  }
 0x61c   : > { %s4336_s30 = scalar_lea.vmem [#allocation2], %s3535_s22  ;;  %s5390_s22 = sand.u32 1, %s3646_s28  }
 0x622   : > { %1255 = vperm.xlu1 %3587, %v3230_v25   ;;  %1445 = vperm.xlu0 %3586, %v1425_v26  }
 0x623   : > { %1330 = vperm.xlu2 %3588, %v3250_v27  }
 0x62a   : > { %1335 = vperm.xlu1 %3587, %v3251_v16   ;;  %1430 = vperm.xlu0 %3586, %v1422_v28  }
 0x62b   : > { %1389 = vperm.xlu2 %3588, %v607_v29   ;;  %v1418_v29 = vld [vmem:[%s5318_s10] sm:$0xff] }
 0x632   : > { %1320 = vperm.xlu1 %3587, %v3248_v30   ;;  %v1419_v30 = vld [vmem:[%s5318_s10 + $0x8] sm:$0xff] }
 0x633   : > { %1435 = vperm.xlu2 %3588, %v1423_v31   ;;  %v1420_v31 = vld [vmem:[%s5318_s10 + $0x10] sm:$0xff] }
 0x63a   : > { %1440 = vperm.xlu1 %3587, %v1424_v33   ;;  %v1421_v33 = vld [vmem:[%s5318_s10 + $0x18] sm:$0xff] }
 0x65c   : > { %v1226_v35 = vpop.permute.xlu2 %1225 }
 0x665   : > { %v1215_v38 = vpop.permute.xlu2 %1214 }
 0x66c   : > { %v1224_v36 = vpop.permute.xlu0 %1223 }
 0x66d   : > { %v1209_v42 = vpop.permute.xlu2 %1208 }
 0x674   : > { %v1213_v39 = vpop.permute.xlu0 %1212 }
 0x675   : > { %v1251_v54 = vpop.permute.xlu2 %1250 }
 0x67c   : > { %v1228_v34 = vpop.permute.xlu1 %1227  ;;  %v1261_v49 = vpop.permute.xlu0 %1260 }
 0x67d   : > { %3232 = vmatpush.msk.msrb.mxu3 %vm1220_vm8, %v1228_v34  ;;  %v1331_v10 = vpop.permute.xlu2 %1330 }
 0x67f   : > { %3233 = vmatpush.msk.msrb.mxu3 %vm1220_vm8, %v1226_v35 }
 0x681   : > { %3234 = vmatpush.msk.msrb.mxu3 %vm1220_vm8, %v1224_v36 }
 0x684   : > { %v1222_v37 = vpop.permute.xlu1 %1221  ;;  %v1246_v57 = vpop.permute.xlu0 %1245 }
 0x685   : > { %3235 = vmatpush.msk.msrb.mxu3 %vm1220_vm8, %v1222_v37 }
 0x687   : > { %1283 = vmatpush.msrb.mxu3 %v4214_v20 }
 0x689   : > { %1284 = vmatpush.msrb.mxu3 %v4203_v13 }
 0x68b   : > { %1285 = vmatpush.msrb.mxu3 %v4197_v4 }
 0x68c   : > { %v1211_v40 = vpop.permute.xlu1 %1210  ;;  %v1326_v12 = vpop.permute.xlu0 %1325 }
 0x68d   : > { %1286 = vmatpush.msrb.mxu3 %v4225_v22 }
 0x68f   : > { %3236 = vmatpush.msk.msrb.mxu3 %vm1207_vm9, %v1215_v38 }
 0x691   : > { %3237 = vmatpush.msk.msrb.mxu3 %vm1207_vm9, %v1213_v39 }
 0x693   : > { %3238 = vmatpush.msk.msrb.mxu3 %vm1207_vm9, %v1211_v40 }
 0x694   : > { %v1256_v50 = vpop.permute.xlu1 %1255 }
 0x695   : > { %3239 = vmatpush.msk.msrb.mxu3 %vm1207_vm9, %v1209_v42 }
 0x696   : > { %3240 = vmatmul.msk.f32.vlgmr.msrb.gmra.mxu3 %vm724_vm3, %v3224_v41  ;;  %v1446_v41 = vpop.permute.xlu0 %1445 }
 0x69c   : > { %v1336_v5 = vpop.permute.xlu1 %1335 }
 0x69e   : > { %3241 = vmatmul.msk.f32.gmra.mxu3 %vm724_vm3, %v3225_v43  ;;  %v1521_v43 = vld [vmem:[%s5321_s13 + $0x18] sm:$0xff] }
 0x6a4   : > { %v1321_v18 = vpop.permute.xlu1 %1320 }
 0x6a6   : > { %3242 = vmatmul.msk.f32.gmra.mxu3 %vm724_vm3, %v3226_v44 }
 0x6ac   : > { %v1441_v38 = vpop.permute.xlu1 %1440 }
 0x6ae   : > { %3243 = vmatmul.msk.f32.gmra.mxu3 %vm724_vm3, %v3227_v45  ;;  %v1431_v45 = vpop.permute.xlu0 %1430 }
 0x719   : > { %v1292_v46 = vpop.f32.mrf.mxu3 }
 0x71a   : > { %v1293_v58 = vadd.f32 %v1292_v46, %v1246_v57  ;;  %v1518_v46 = vld [vmem:[%s5321_s13] sm:$0xff] }
 0x71c   : > { %v1304_v61 = vmax.f32 %v1293_v58, 0.0 }
 0x721   : > { %v1295_v47 = vpop.f32.mrf.mxu3 }
 0x722   : > { %v1296_v55 = vadd.f32 %v1295_v47, %v1251_v54 }
 0x724   : > { %v1305_v60 = vmax.f32 %v1296_v55, 0.0 }
 0x729   : > { %v1298_v48 = vpop.f32.mrf.mxu3 }
 0x72a   : > { %v1299_v52 = vadd.f32 %v1298_v48, %v1256_v50  ;;  %v1592_v48 = vld [vmem:[%s5323_s15 + $0x8] sm:$0xff]  ;;  %v1520_v50 = vld [vmem:[%s5321_s13 + $0x10] sm:$0xff] }
 0x72c   : > { %v1306_v59 = vmax.f32 %v1299_v52, 0.0  ;;  %v1594_v52 = vld [vmem:[%s5323_s15 + $0x18] sm:$0xff] }
 0x731   : > { %v1301_v51 = vpop.f32.mrf.mxu3 }
 0x732   : > { %v1302_v53 = vadd.f32 %v1301_v51, %v1261_v49  ;;  %v1519_v49 = vld [vmem:[%s5321_s13 + $0x8] sm:$0xff]  ;;  %v1593_v51 = vld [vmem:[%s5323_s15 + $0x10] sm:$0xff] }
 0x734   : > { %v1307_v56 = vmax.f32 %v1302_v53, 0.0  ;;  %v1591_v53 = vld [vmem:[%s5323_s15] sm:$0xff] }
 0x736   : > { %1362 = vmatpush.msrb.mxu0 %v1307_v56 }
 0x738   : > { %1363 = vmatpush.msrb.mxu0 %v1306_v59 }
 0x73a   : > { %1364 = vmatpush.msrb.mxu0 %v1305_v60 }
 0x73c   : > { %1365 = vmatpush.msrb.mxu0 %v1304_v61  ;;  %v1514_v61 = vld [vmem:[%s5320_s12] sm:$0xff] }
 0x73d   : > { %3252 = vmatmul.msk.f32.vlgmr.msrb.gmra.mxu0 %vm628_vm0, %v3244_v62 }
 0x745   : > { %3253 = vmatmul.msk.f32.gmra.mxu0 %vm628_vm0, %v3245_v63  ;;  %v1515_v63 = vld [vmem:[%s5320_s12 + $0x8] sm:$0xff] }
 0x74d   : > { %3254 = vmatmul.msk.f32.gmra.mxu0 %vm628_vm0, %v3246_v0  ;;  %v1516_v0 = vld [vmem:[%s5320_s12 + $0x10] sm:$0xff] }
 0x755   : > { %3255 = vmatmul.msk.f32.gmra.mxu0 %vm628_vm0, %v3247_v1  ;;  %v1517_v1 = vld [vmem:[%s5320_s12 + $0x18] sm:$0xff] }
 0x7ba   : > { %v1367_v2 = vpop.f32.mrf.mxu0 }
 0x7bb   : > { %v1368_v19 = vadd.f32 %v1367_v2, %v1321_v18 }
 0x7bd   : > { %v1379_v23 = vadd.f32 %v1368_v19, %v4225_v22 }
 0x7bf   : > { %v1383_v27 = vmul.f32 %v3953_v7, %v1379_v23  ;;  %v1587_v23 = vld [vmem:[%s5322_s14] sm:$0xff] }
 0x7c2   : > { %v1370_v3 = vpop.f32.mrf.mxu0 }
 0x7c3   : > { %v1371_v9 = vadd.f32 %v1370_v3, %v1326_v12 }
 0x7c5   : > { %v1380_v21 = vadd.f32 %v1371_v9, %v4197_v4  ;;  %v1390_v4 = vpop.permute.xlu2 %1389 }
 0x7c7   : > { %v1384_v26 = vmul.f32 %v3953_v7, %v1380_v21 }
 0x7ca   : > { %v1373_v8 = vpop.f32.mrf.mxu0 }
 0x7cb   : > { %v1374_v11 = vadd.f32 %v1373_v8, %v1331_v10 }
 0x7cd   : > { %v1381_v14 = vadd.f32 %v1374_v11, %v4203_v13  ;;  %v606_v13 = vld [vmem:[%s5316_s8] sm:$0xff]  ;;  %v1436_v35 = vpop.permute.xlu2 %1435 }
 0x7cf   : > { %v1385_v25 = vmul.f32 %v3953_v7, %v1381_v14 }
 0x7d2   : > { %v1376_v6 = vpop.f32.mrf.mxu0 }
 0x7d3   : > { %v1377_v17 = vadd.f32 %v1376_v6, %v1336_v5 }
 0x7d5   : > { %v1382_v15 = vadd.f32 %v1377_v17, %v4214_v20 }
 0x7d7   : > { %v1386_v24 = vmul.f32 %v3953_v7, %v1382_v15 }
 0x7d9   : > { %1407 = vmatpush.msra.mxu2 %v1386_v24 }
 0x7db   : > { %1408 = vmatpush.msra.mxu2 %v1385_v25  ;;  %v1588_v25 = vld [vmem:[%s5322_s14 + $0x8] sm:$0xff] }
 0x7dd   : > { %1409 = vmatpush.msra.mxu2 %v1384_v26  ;;  %v1589_v26 = vld [vmem:[%s5322_s14 + $0x10] sm:$0xff] }
 0x7df   : > { %1410 = vmatpush.msra.mxu2 %v1383_v27  ;;  %v1590_v27 = vld [vmem:[%s5322_s14 + $0x18] sm:$0xff] }
 0x7e0   : > { %3256 = vmatmul.msk.f32.vlgmr.msra.gmra.mxu2 %vm628_vm0, %v606_v13 }
 0x863   : > { %v1412_v20 = vpop.f32.mrf.mxu2 }
 0x864   : > { %v1413_v22 = vadd.f32 %v1412_v20, %v1390_v4 }
 0x866   : > { %v1415_v16 = vmul.f32 %v3953_v7, %v1413_v22 }
 0x868   : > { %1416 = vst [vmem:[%s4336_s30] sm:$0xff] %v1415_v16  ;;  %v1417_v28 = vmul.f32 %v3953_v7, %v1415_v16 }
 0x86a   : > { %1476 = vmatpush.msrb.mxu2 %v1417_v28 }
 0x86b   : > { %3257 = vmatmul.msk.f32.vlgmr.msrb.gmra.mxu2 %vm1448_vm10, %v1418_v29 }
 0x873   : > { %3258 = vmatmul.msk.f32.gmra.mxu2 %vm1448_vm10, %v1419_v30 }
 0x87b   : > { %3259 = vmatmul.msk.f32.gmra.mxu2 %vm1448_vm10, %v1420_v31 }
 0x883   : > { %3260 = vmatmul.msk.f32.gmra.mxu2 %vm1448_vm10, %v1421_v33 }
 0x8ee   : > { %v1478_v34 = vpop.f32.mrf.mxu2 }
 0x8ef   : > { %v4378_v47 = vadd.f32 %v1478_v34, %v1431_v45 }
 0x8f6   : > { %v1481_v36 = vpop.f32.mrf.mxu2 }
 0x8f7   : > { %v4356_v37 = vadd.f32 %v1481_v36, %v1436_v35 }
 0x8f9   : > { %1504 = vrot.lane.b32.xlu0 %v4356_v37, %s5352_s24 }
 0x8fe   : > { %v1484_v39 = vpop.f32.mrf.mxu2 }
 0x8ff   : > { %v4360_v40 = vadd.f32 %v1484_v39, %v1441_v38 }
 0x901   : > { %1494 = vrot.lane.b32.xlu0 %v4360_v40, %s5350_s25  ;;  %1506 = vrot.lane.b32.xlu2 %v4360_v40, %s5352_s24 }
 0x906   : > { %v1487_v42 = vpop.f32.mrf.mxu2 }
 0x907   : > { %v4369_v44 = vadd.f32 %v1487_v42, %v1446_v41  ;;  %v3284_v41 = vld [vmem:[%s5321_s13 + $0x38] sm:$0xff] }
 0x909   : > { %1508 = vrot.lane.b32.xlu1 %v4369_v44, %s5352_s24  ;;  %1539 = vperm.xlu0 %3586, %v1521_v43  }
 0x90a   : > { %1496 = vrot.lane.b32.xlu2 %v4369_v44, %s5350_s25 }
 0x911   : > { %1502 = vrot.lane.b32.xlu1 %v4378_v47, %s5352_s24  ;;  %1524 = vperm.xlu0 %3586, %v1518_v46   ;;  %v3302_v46 = vld [vmem:[%s5323_s15 + $0x28] sm:$0xff]  ;;  %s5384_s24 = smov 8  }
 0x912   : > { %1490 = vrot.lane.b32.xlu2 %v4378_v47, %s5350_s25 }
 0x919   : > { %1492 = vrot.lane.b32.xlu1 %v4356_v37, %s5350_s25  ;;  %1602 = vperm.xlu0 %3586, %v1592_v48   ;;  %v3283_v48 = vld [vmem:[%s5321_s13 + $0x30] sm:$0xff]  ;;  %s5381_s25 = smov 124  }
 0x91a   : > { %1529 = vperm.xlu2 %3588, %v1519_v49   ;;  %v3304_v49 = vld [vmem:[%s5323_s15 + $0x38] sm:$0xff] }
 0x921   : > { %1534 = vperm.xlu1 %3587, %v1520_v50   ;;  %v3301_v50 = vld [vmem:[%s5323_s15 + $0x20] sm:$0xff] }
 0x922   : > { %1607 = vperm.xlu2 %3588, %v1593_v51  }
 0x929   : > { %1612 = vperm.xlu1 %3587, %v1594_v52  }
 0x931   : > { %1597 = vperm.xlu1 %3587, %v1591_v53  }
 0x95b   : > { %v1507_v55 = vpop.permute.xlu2 %1506 }
 0x964   : > { %v1497_v58 = vpop.permute.xlu2 %1496 }
 0x96b   : > { %v1505_v56 = vpop.permute.xlu0 %1504 }
 0x96c   : > { %v1491_v62 = vpop.permute.xlu2 %1490 }
 0x973   : > { %v1495_v59 = vpop.permute.xlu0 %1494 }
 0x974   : > { %v1530_v9 = vpop.permute.xlu2 %1529 }
 0x97b   : > { %v1509_v54 = vpop.permute.xlu1 %1508  ;;  %v1540_v8 = vpop.permute.xlu0 %1539 }
 0x97c   : > { %3261 = vmatpush.msk.msra.mxu1 %vm683_vm1, %v1509_v54  ;;  %v1608_v29 = vpop.permute.xlu2 %1607 }
 0x97e   : > { %3262 = vmatpush.msk.msra.mxu1 %vm683_vm1, %v1507_v55 }
 0x980   : > { %3263 = vmatpush.msk.msra.mxu1 %vm683_vm1, %v1505_v56 }
 0x983   : > { %v1503_v57 = vpop.permute.xlu1 %1502  ;;  %v1525_v19 = vpop.permute.xlu0 %1524 }
 0x984   : > { %3264 = vmatpush.msk.msra.mxu1 %vm683_vm1, %v1503_v57 }
 0x986   : > { %1562 = vmatpush.msra.mxu1 %v4369_v44 }
 0x988   : > { %1563 = vmatpush.msra.mxu1 %v4360_v40 }
 0x98a   : > { %1564 = vmatpush.msra.mxu1 %v4356_v37 }
 0x98b   : > { %v1493_v60 = vpop.permute.xlu1 %1492  ;;  %v1603_v4 = vpop.permute.xlu0 %1602 }
 0x98c   : > { %1565 = vmatpush.msra.mxu1 %v4378_v47 }
 0x98e   : > { %3265 = vmatpush.msk.msra.mxu1 %vm670_vm2, %v1497_v58  ;;  %v3277_v58 = vld [vmem:[%s5320_s12 + $0x20] sm:$0xff] }
 0x990   : > { %3266 = vmatpush.msk.msra.mxu1 %vm670_vm2, %v1495_v59 }
 0x992   : > { %3267 = vmatpush.msk.msra.mxu1 %vm670_vm2, %v1493_v60  ;;  %v3278_v60 = vld [vmem:[%s5320_s12 + $0x28] sm:$0xff] }
 0x993   : > { %v1535_v10 = vpop.permute.xlu1 %1534 }
 0x994   : > { %3268 = vmatpush.msk.msra.mxu1 %vm670_vm2, %v1491_v62  ;;  %v3280_v62 = vld [vmem:[%s5320_s12 + $0x38] sm:$0xff] }
 0x995   : > { %3269 = vmatmul.msk.f32.vlgmr.msra.gmra.mxu1 %vm724_vm3, %v1514_v61  ;;  %v3279_v61 = vld [vmem:[%s5320_s12 + $0x30] sm:$0xff] }
 0x99b   : > { %v1613_v33 = vpop.permute.xlu1 %1612 }
 0x99d   : > { %3270 = vmatmul.msk.f32.gmra.mxu1 %vm724_vm3, %v1515_v63 }
 0x9a3   : > { %v1598_v39 = vpop.permute.xlu1 %1597 }
 0x9a5   : > { %3271 = vmatmul.msk.f32.gmra.mxu1 %vm724_vm3, %v1516_v0 }
 0x9ad   : > { %3272 = vmatmul.msk.f32.gmra.mxu1 %vm724_vm3, %v1517_v1 }
 0xa12   : > { %v1571_v2 = vpop.f32.mrf.mxu1 }
 0xa13   : > { %v1572_v14 = vadd.f32 %v1571_v2, %v1525_v19 }
 0xa15   : > { %v1583_v24 = vmax.f32 %v1572_v14, 0.0 }
 0xa1a   : > { %v1574_v3 = vpop.f32.mrf.mxu1 }
 0xa1b   : > { %v1575_v17 = vadd.f32 %v1574_v3, %v1530_v9 }
 0xa1d   : > { %v1584_v21 = vmax.f32 %v1575_v17, 0.0 }
 0xa22   : > { %v1577_v5 = vpop.f32.mrf.mxu1 }
 0xa23   : > { %v1578_v12 = vadd.f32 %v1577_v5, %v1535_v10 }
 0xa25   : > { %v1585_v15 = vmax.f32 %v1578_v12, 0.0 }
 0xa2a   : > { %v1580_v11 = vpop.f32.mrf.mxu1 }
 0xa2b   : > { %v1581_v6 = vadd.f32 %v1580_v11, %v1540_v8 }
 0xa2d   : > { %v1586_v18 = vmax.f32 %v1581_v6, 0.0 }
 0xa2f   : > { %1639 = vmatpush.msra.mxu3 %v1586_v18 }
 0xa31   : > { %1640 = vmatpush.msra.mxu3 %v1585_v15  ;;  %v3297_v15 = vld [vmem:[%s5322_s14 + $0x20] sm:$0xff] }
 0xa33   : > { %1641 = vmatpush.msra.mxu3 %v1584_v21  ;;  %v3298_v21 = vld [vmem:[%s5322_s14 + $0x28] sm:$0xff] }
 0xa35   : > { %1642 = vmatpush.msra.mxu3 %v1583_v24  ;;  %v3299_v24 = vld [vmem:[%s5322_s14 + $0x30] sm:$0xff] }
 0xa36   : > { %3273 = vmatmul.msk.f32.vlgmr.msra.gmra.mxu3 %vm628_vm0, %v1587_v23  ;;  %v3300_v23 = vld [vmem:[%s5322_s14 + $0x38] sm:$0xff] }
 0xa3e   : > { %3274 = vmatmul.msk.f32.gmra.mxu3 %vm628_vm0, %v1588_v25 }
 0xa46   : > { %3275 = vmatmul.msk.f32.gmra.mxu3 %vm628_vm0, %v1589_v26 }
 0xa4e   : > { %3276 = vmatmul.msk.f32.gmra.mxu3 %vm628_vm0, %v1590_v27 }
 0xab9   : > { %v1644_v13 = vpop.f32.mrf.mxu3 }
 0xaba   : > { %v1645_v42 = vadd.f32 %v1644_v13, %v1598_v39 }
 0xabc   : > { %v1656_v43 = vadd.f32 %v1645_v42, %v4378_v47  ;;  %v3282_v47 = vld [vmem:[%s5321_s13 + $0x28] sm:$0xff] }
 0xabe   : > { %v4486_v45 = vmul.f32 %v3953_v7, %v1656_v43  ;;  %v3313_v43 = vld [vmem:[%s5321_s13 + $0x40] sm:$0xff] }
 0xac1   : > { %v1647_v20 = vpop.f32.mrf.mxu3 }
 0xac2   : > { %v1648_v22 = vadd.f32 %v1647_v20, %v1603_v4  ;;  %v4566_v20 = vld [vmem:[%s3821_s23] ss:$0 sm:$0xff] }
 0xac4   : > { %v1657_v16 = vadd.f32 %v1648_v22, %v4356_v37 }
 0xac6   : > { %v4458_v28 = vmul.f32 %v3953_v7, %v1657_v16 }
 0xac8   : > { %1678 = vrot.lane.b32.xlu1 %v4458_v28, %s5379_s21 }
 0xac9   : > { %v1650_v30 = vpop.f32.mrf.mxu3 }
 0xaca   : > { %v1651_v31 = vadd.f32 %v1650_v30, %v1608_v29 }
 0xacc   : > { %v1658_v34 = vadd.f32 %v1651_v31, %v4360_v40 }
 0xace   : > { %v4464_v35 = vmul.f32 %v3953_v7, %v1658_v34 }
 0xad0   : > { %1680 = vrot.lane.b32.xlu0 %v4464_v35, %s5379_s21  ;;  %1668 = vrot.lane.b32.xlu1 %v4464_v35, %s5380_s26 }
 0xad1   : > { %v1653_v36 = vpop.f32.mrf.mxu3 }
 0xad2   : > { %v1654_v37 = vadd.f32 %v1653_v36, %v1613_v33 }
 0xad4   : > { %v1659_v38 = vadd.f32 %v1654_v37, %v4369_v44  ;;  %v3281_v44 = vld [vmem:[%s5321_s13 + $0x20] sm:$0xff] }
 0xad6   : > { %v4475_v40 = vmul.f32 %v3953_v7, %v1659_v38  ;;  %v3303_v7 = vld [vmem:[%s5323_s15 + $0x30] sm:$0xff] }
 0xad8   : > { %1715 = vperm.xlu1 %3587, %v3284_v41   ;;  %1670 = vrot.lane.b32.xlu0 %v4475_v40, %s5380_s26 }
 0xad9   : > { %1682 = vrot.lane.b32.xlu2 %v4475_v40, %s5379_s21 }
 0xae0   : > { %1700 = vperm.xlu1 %3587, %v3281_v44   ;;  %1664 = vrot.lane.b32.xlu0 %v4486_v45, %s5380_s26  ;;  %v3314_v44 = vld [vmem:[%s5321_s13 + $0x48] sm:$0xff] }
 0xae1   : > { %1676 = vrot.lane.b32.xlu2 %v4486_v45, %s5379_s21 }
 0xae8   : > { %1780 = vperm.xlu1 %3587, %v3302_v46   ;;  %1705 = vperm.xlu0 %3586, %v3282_v47   ;;  %v3335_v46 = vld [vmem:[%s5323_s15 + $0x50] sm:$0xff] }
 0xae9   : > { %1666 = vrot.lane.b32.xlu2 %v4458_v28, %s5380_s26  ;;  %v3315_v47 = vld [vmem:[%s5321_s13 + $0x50] sm:$0xff] }
 0xaf0   : > { %1785 = vperm.xlu0 %3586, %v3303_v7   ;;  %v3336_v7 = vld [vmem:[%s5323_s15 + $0x58] sm:$0xff] }
 0xaf1   : > { %1710 = vperm.xlu2 %3588, %v3283_v48   ;;  %v3333_v48 = vld [vmem:[%s5323_s15 + $0x40] sm:$0xff] }
 0xaf9   : > { %1790 = vperm.xlu2 %3588, %v3304_v49  }
 0xb01   : > { %1775 = vperm.xlu2 %3588, %v3301_v50  }
 0xb33   : > { %v1683_v51 = vpop.permute.xlu2 %1682 }
 0xb34   : > { %3285 = vmatpush.msk.msra.mxu0 %vm860_vm4, %v1683_v51 }
 0xb3a   : > { %v1679_v53 = vpop.permute.xlu1 %1678 }
 0xb3b   : > { %v1677_v54 = vpop.permute.xlu2 %1676 }
 0xb42   : > { %v1681_v52 = vpop.permute.xlu0 %1680  ;;  %v1669_v56 = vpop.permute.xlu1 %1668 }
 0xb43   : > { %3286 = vmatpush.msk.msra.mxu0 %vm860_vm4, %v1681_v52  ;;  %v1667_v57 = vpop.permute.xlu2 %1666 }
 0xb45   : > { %3287 = vmatpush.msk.msra.mxu0 %vm860_vm4, %v1679_v53 }
 0xb47   : > { %3288 = vmatpush.msk.msra.mxu0 %vm860_vm4, %v1677_v54 }
 0xb49   : > { %1738 = vmatpush.msra.mxu0 %v4475_v40 }
 0xb4a   : > { %v1671_v55 = vpop.permute.xlu0 %1670  ;;  %v1716_v2 = vpop.permute.xlu1 %1715 }
 0xb4b   : > { %1739 = vmatpush.msra.mxu0 %v4464_v35  ;;  %v1711_v3 = vpop.permute.xlu2 %1710 }
 0xb4d   : > { %1740 = vmatpush.msra.mxu0 %v4458_v28 }
 0xb4f   : > { %1741 = vmatpush.msra.mxu0 %v4486_v45 }
 0xb51   : > { %3289 = vmatpush.msk.msra.mxu0 %vm847_vm5, %v1671_v55 }
 0xb52   : > { %v1665_v59 = vpop.permute.xlu0 %1664  ;;  %v1701_v9 = vpop.permute.xlu1 %1700 }
 0xb53   : > { %3290 = vmatpush.msk.msra.mxu0 %vm847_vm5, %v1669_v56  ;;  %v1791_v31 = vpop.permute.xlu2 %1790  ;;  %v3309_v56 = vld [vmem:[%s5320_s12 + $0x40] sm:$0xff] }
 0xb55   : > { %3291 = vmatpush.msk.msra.mxu0 %vm847_vm5, %v1667_v57 }
 0xb57   : > { %3292 = vmatpush.msk.msra.mxu0 %vm847_vm5, %v1665_v59  ;;  %v3311_v59 = vld [vmem:[%s5320_s12 + $0x50] sm:$0xff] }
 0xb58   : > { %3293 = vmatmul.msk.f32.vlgmr.msra.gmra.mxu0 %vm724_vm3, %v3277_v58  ;;  %v3310_v58 = vld [vmem:[%s5320_s12 + $0x48] sm:$0xff] }
 0xb5a   : > { %v1706_v11 = vpop.permute.xlu0 %1705  ;;  %v1781_v26 = vpop.permute.xlu1 %1780 }
 0xb5b   : > { %v1776_v38 = vpop.permute.xlu2 %1775 }
 0xb60   : > { %3294 = vmatmul.msk.f32.gmra.mxu0 %vm724_vm3, %v3278_v60  ;;  %v3312_v60 = vld [vmem:[%s5320_s12 + $0x58] sm:$0xff] }
 0xb62   : > { %v1786_v16 = vpop.permute.xlu0 %1785 }
 0xb68   : > { %3295 = vmatmul.msk.f32.gmra.mxu0 %vm724_vm3, %v3279_v61 }
 0xb70   : > { %3296 = vmatmul.msk.f32.gmra.mxu0 %vm724_vm3, %v3280_v62 }
 0xbd5   : > { %v1747_v63 = vpop.f32.mrf.mxu0 }
 0xbd6   : > { %v1748_v17 = vadd.f32 %v1747_v63, %v1701_v9 }
 0xbd8   : > { %v1759_v14 = vmax.f32 %v1748_v17, 0.0 }
 0xbdd   : > { %v1750_v0 = vpop.f32.mrf.mxu0 }
 0xbde   : > { %v1751_v12 = vadd.f32 %v1750_v0, %v1706_v11 }
 0xbe0   : > { %v1760_v19 = vmax.f32 %v1751_v12, 0.0 }
 0xbe5   : > { %v1753_v1 = vpop.f32.mrf.mxu0 }
 0xbe6   : > { %v1754_v8 = vadd.f32 %v1753_v1, %v1711_v3 }
 0xbe8   : > { %v1761_v18 = vmax.f32 %v1754_v8, 0.0 }
 0xbed   : > { %v1756_v5 = vpop.f32.mrf.mxu0 }
 0xbee   : > { %v1757_v10 = vadd.f32 %v1756_v5, %v1716_v2 }
 0xbf0   : > { %v1762_v6 = vmax.f32 %v1757_v10, 0.0 }
 0xbf2   : > { %1817 = vmatpush.msra.mxu2 %v1762_v6 }
 0xbf4   : > { %1818 = vmatpush.msra.mxu2 %v1761_v18 }
 0xbf6   : > { %1819 = vmatpush.msra.mxu2 %v1760_v19  ;;  %v3329_v19 = vld [vmem:[%s5322_s14 + $0x40] sm:$0xff] }
 0xbf8   : > { %1820 = vmatpush.msra.mxu2 %v1759_v14  ;;  %v3330_v14 = vld [vmem:[%s5322_s14 + $0x48] sm:$0xff] }
 0xbf9   : > { %3305 = vmatmul.msk.f32.vlgmr.msra.gmra.mxu2 %vm628_vm0, %v3297_v15  ;;  %v3331_v15 = vld [vmem:[%s5322_s14 + $0x50] sm:$0xff] }
 0xc01   : > { %3306 = vmatmul.msk.f32.gmra.mxu2 %vm628_vm0, %v3298_v21  ;;  %v3332_v21 = vld [vmem:[%s5322_s14 + $0x58] sm:$0xff] }
 0xc09   : > { %3307 = vmatmul.msk.f32.gmra.mxu2 %vm628_vm0, %v3299_v24 }
 0xc11   : > { %3308 = vmatmul.msk.f32.gmra.mxu2 %vm628_vm0, %v3300_v23 }
 0xc7c   : > { %v1822_v25 = vpop.f32.mrf.mxu2 }
 0xc7d   : > { %v1823_v39 = vadd.f32 %v1822_v25, %v1776_v38  ;;  %v3348_v38 = vld [vmem:[%s5321_s13 + $0x78] sm:$0xff] }
 0xc7f   : > { %v1834_v42 = vadd.f32 %v1823_v39, %v4486_v45  ;;  %v3334_v45 = vld [vmem:[%s5323_s15 + $0x48] sm:$0xff] }
 0xc84   : > { %v1825_v27 = vpop.f32.mrf.mxu2 }
 0xc85   : > { %v1826_v13 = vadd.f32 %v1825_v27, %v1781_v26 }
 0xc87   : > { %v1835_v4 = vadd.f32 %v1826_v13, %v4458_v28 }
 0xc89   : > { %v4569_v22 = vmul.f32 %v4566_v20, %v1835_v4 }
 0xc8b   : > { %1856 = vrot.lane.b32.xlu2 %v4569_v22, %s5381_s25 }
 0xc8c   : > { %v1828_v29 = vpop.f32.mrf.mxu2 }
 0xc8d   : > { %v1829_v30 = vadd.f32 %v1828_v29, %v1786_v16 }
 0xc8f   : > { %v1836_v33 = vadd.f32 %v1829_v30, %v4464_v35  ;;  %v3316_v35 = vld [vmem:[%s5321_s13 + $0x58] sm:$0xff] }
 0xc91   : > { %v4575_v34 = vmul.f32 %v4566_v20, %v1836_v33 }
 0xc93   : > { %1858 = vrot.lane.b32.xlu1 %v4575_v34, %s5381_s25  ;;  %1846 = vrot.lane.b32.xlu2 %v4575_v34, %s5382_s20 }
 0xc94   : > { %v1831_v28 = vpop.f32.mrf.mxu2 }
 0xc95   : > { %v1832_v36 = vadd.f32 %v1831_v28, %v1791_v31 }
 0xc97   : > { %v1837_v37 = vadd.f32 %v1832_v36, %v4475_v40  ;;  %v4594_v40 = vmul.f32 %v4566_v20, %v1834_v42 }
 0xc99   : > { %v4583_v41 = vmul.f32 %v4566_v20, %v1837_v37 }
 0xc9b   : > { %1860 = vrot.lane.b32.xlu0 %v4583_v41, %s5381_s25  ;;  %1848 = vrot.lane.b32.xlu1 %v4583_v41, %s5382_s20 }
 0xc9c   : > { %1893 = vperm.xlu2 %3588, %v3316_v35  }
 0xca3   : > { %1842 = vrot.lane.b32.xlu1 %v4594_v40, %s5382_s20  ;;  %1854 = vrot.lane.b32.xlu0 %v4594_v40, %s5381_s25 }
 0xca4   : > { %1878 = vperm.xlu2 %3588, %v3313_v43   ;;  %v3366_v43 = vld [vmem:[%s5323_s15 + $0x68] sm:$0xff] }
 0xcab   : > { %1883 = vperm.xlu1 %3587, %v3314_v44   ;;  %1844 = vrot.lane.b32.xlu0 %v4569_v22, %s5382_s20  ;;  %v3347_v44 = vld [vmem:[%s5321_s13 + $0x70] sm:$0xff] }
 0xcac   : > { %1958 = vperm.xlu2 %3588, %v3334_v45   ;;  %v3382_v45 = vld [vmem:[%s5319_s11 + $0x38] sm:$0xff] }
 0xcb3   : > { %1963 = vperm.xlu1 %3587, %v3335_v46   ;;  %1888 = vperm.xlu0 %3586, %v3315_v47   ;;  %v3367_v46 = vld [vmem:[%s5323_s15 + $0x70] sm:$0xff]  ;;  %v3368_v47 = vld [vmem:[%s5323_s15 + $0x78] sm:$0xff] }
 0xcbb   : > { %1968 = vperm.xlu0 %3586, %v3336_v7   ;;  %v3379_v7 = vld [vmem:[%s5319_s11 + $0x20] sm:$0xff] }
 0xcc3   : > { %1953 = vperm.xlu0 %3586, %v3333_v48   ;;  %v1427_v48 = vld [vmem:[%s5325_s17] sm:$0xff] }
 0xce5   : > { %v1857_v51 = vpop.permute.xlu2 %1856 }
 0xced   : > { %v1847_v54 = vpop.permute.xlu2 %1846 }
 0xcf6   : > { %v1894_v0 = vpop.permute.xlu2 %1893 }
 0xcfe   : > { %v1879_v12 = vpop.permute.xlu2 %1878 }
 0xd05   : > { %v1859_v50 = vpop.permute.xlu1 %1858 }
 0xd06   : > { %v1959_v23 = vpop.permute.xlu2 %1958 }
 0xd0d   : > { %v1861_v49 = vpop.permute.xlu0 %1860  ;;  %v1849_v53 = vpop.permute.xlu1 %1848 }
 0xd0e   : > { %3317 = vmatpush.msk.msrb.mxu1 %vm1040_vm6, %v1861_v49  ;;  %v3365_v49 = vld [vmem:[%s5323_s15 + $0x60] sm:$0xff] }
 0xd10   : > { %3318 = vmatpush.msk.msrb.mxu1 %vm1040_vm6, %v1859_v50  ;;  %v3380_v50 = vld [vmem:[%s5319_s11 + $0x28] sm:$0xff] }
 0xd12   : > { %3319 = vmatpush.msk.msrb.mxu1 %vm1040_vm6, %v1857_v51  ;;  %v3381_v51 = vld [vmem:[%s5319_s11 + $0x30] sm:$0xff] }
 0xd15   : > { %v1855_v52 = vpop.permute.xlu0 %1854  ;;  %v1843_v57 = vpop.permute.xlu1 %1842 }
 0xd16   : > { %3320 = vmatpush.msk.msrb.mxu1 %vm1040_vm6, %v1855_v52 }
 0xd18   : > { %1916 = vmatpush.msrb.mxu1 %v4583_v41 }
 0xd1a   : > { %1917 = vmatpush.msrb.mxu1 %v4575_v34 }
 0xd1c   : > { %1918 = vmatpush.msrb.mxu1 %v4569_v22 }
 0xd1d   : > { %v1845_v55 = vpop.permute.xlu0 %1844  ;;  %v1884_v8 = vpop.permute.xlu1 %1883 }
 0xd1e   : > { %1919 = vmatpush.msrb.mxu1 %v4594_v40 }
 0xd20   : > { %3321 = vmatpush.msk.msrb.mxu1 %vm1027_vm7, %v1849_v53 }
 0xd22   : > { %3322 = vmatpush.msk.msrb.mxu1 %vm1027_vm7, %v1847_v54 }
 0xd24   : > { %3323 = vmatpush.msk.msrb.mxu1 %vm1027_vm7, %v1845_v55 }
 0xd25   : > { %v1889_v1 = vpop.permute.xlu0 %1888  ;;  %v1964_v4 = vpop.permute.xlu1 %1963 }
 0xd26   : > { %3324 = vmatpush.msk.msrb.mxu1 %vm1027_vm7, %v1843_v57 }
 0xd27   : > { %3325 = vmatmul.msk.f32.vlgmr.msrb.gmra.mxu1 %vm724_vm3, %v3309_v56 }
 0xd2d   : > { %v1969_v30 = vpop.permute.xlu0 %1968 }
 0xd2f   : > { %3326 = vmatmul.msk.f32.gmra.mxu1 %vm724_vm3, %v3310_v58 }
 0xd35   : > { %v1954_v37 = vpop.permute.xlu0 %1953 }
 0xd37   : > { %3327 = vmatmul.msk.f32.gmra.mxu1 %vm724_vm3, %v3311_v59  ;;  %v3341_v59 = vld [vmem:[%s5320_s12 + $0x60] sm:$0xff] }
 0xd3f   : > { %3328 = vmatmul.msk.f32.gmra.mxu1 %vm724_vm3, %v3312_v60 }
 0xda4   : > { %v1925_v61 = vpop.f32.mrf.mxu1 }
 0xda5   : > { %v1926_v6 = vadd.f32 %v1925_v61, %v1879_v12  ;;  %v3342_v61 = vld [vmem:[%s5320_s12 + $0x68] sm:$0xff] }
 0xda7   : > { %v1937_v18 = vmax.f32 %v1926_v6, 0.0 }
 0xdac   : > { %v1928_v62 = vpop.f32.mrf.mxu1 }
 0xdad   : > { %v1929_v10 = vadd.f32 %v1928_v62, %v1884_v8  ;;  %v3343_v62 = vld [vmem:[%s5320_s12 + $0x70] sm:$0xff] }
 0xdaf   : > { %v1938_v17 = vmax.f32 %v1929_v10, 0.0 }
 0xdb4   : > { %v1931_v63 = vpop.f32.mrf.mxu1 }
 0xdb5   : > { %v1932_v3 = vadd.f32 %v1931_v63, %v1889_v1  ;;  %v3344_v63 = vld [vmem:[%s5320_s12 + $0x78] sm:$0xff] }
 0xdb7   : > { %v1939_v9 = vmax.f32 %v1932_v3, 0.0 }
 0xdbc   : > { %v1934_v2 = vpop.f32.mrf.mxu1 }
 0xdbd   : > { %v1935_v5 = vadd.f32 %v1934_v2, %v1894_v0 }
 0xdbf   : > { %v1940_v11 = vmax.f32 %v1935_v5, 0.0 }
 0xdc1   : > { %1995 = vmatpush.msrb.mxu3 %v1940_v11 }
 0xdc3   : > { %1996 = vmatpush.msrb.mxu3 %v1939_v9 }
 0xdc5   : > { %1997 = vmatpush.msrb.mxu3 %v1938_v17 }
 0xdc7   : > { %1998 = vmatpush.msrb.mxu3 %v1937_v18 }
 0xdc8   : > { %3337 = vmatmul.msk.f32.vlgmr.msrb.gmra.mxu3 %vm628_vm0, %v3329_v19 }
 0xdd0   : > { %3338 = vmatmul.msk.f32.gmra.mxu3 %vm628_vm0, %v3330_v14 }
 0xdd8   : > { %3339 = vmatmul.msk.f32.gmra.mxu3 %vm628_vm0, %v3331_v15 }
 0xde0   : > { %3340 = vmatmul.msk.f32.gmra.mxu3 %vm628_vm0, %v3332_v21  ;;  %v3361_v21 = vld [vmem:[%s5322_s14 + $0x60] sm:$0xff] }
 0xe4b   : > { %v2000_v24 = vpop.f32.mrf.mxu3 }
 0xe4c   : > { %v2001_v39 = vadd.f32 %v2000_v24, %v1954_v37  ;;  %v3362_v24 = vld [vmem:[%s5322_s14 + $0x68] sm:$0xff] }
 0xe4e   : > { %v2012_v35 = vadd.f32 %v2001_v39, %v4594_v40  ;;  %v3346_v40 = vld [vmem:[%s5321_s13 + $0x68] sm:$0xff] }
 0xe50   : > { %v4705_v42 = vmul.f32 %v4566_v20, %v2012_v35 }
 0xe53   : > { %v2003_v25 = vpop.f32.mrf.mxu3 }
 0xe54   : > { %v2004_v26 = vadd.f32 %v2003_v25, %v1959_v23  ;;  %v3363_v23 = vld [vmem:[%s5322_s14 + $0x70] sm:$0xff]  ;;  %v3364_v25 = vld [vmem:[%s5322_s14 + $0x78] sm:$0xff] }
 0xe56   : > { %v2013_v27 = vadd.f32 %v2004_v26, %v4569_v22 }
 0xe58   : > { %v4677_v13 = vmul.f32 %v4566_v20, %v2013_v27 }
 0xe5a   : > { %2034 = vrot.lane.b32.xlu0 %v4677_v13, %s5383_s1 }
 0xe5b   : > { %v2006_v16 = vpop.f32.mrf.mxu3 }
 0xe5c   : > { %v2007_v29 = vadd.f32 %v2006_v16, %v1964_v4 }
 0xe5e   : > { %v2014_v31 = vadd.f32 %v2007_v29, %v4575_v34 }
 0xe60   : > { %v4683_v33 = vmul.f32 %v4566_v20, %v2014_v31 }
 0xe62   : > { %2024 = vrot.lane.b32.xlu0 %v4683_v33, %s5384_s24  ;;  %2036 = vrot.lane.b32.xlu2 %v4683_v33, %s5383_s1 }
 0xe63   : > { %v2009_v22 = vpop.f32.mrf.mxu3 }
 0xe64   : > { %v2010_v28 = vadd.f32 %v2009_v22, %v1969_v30 }
 0xe66   : > { %v2015_v36 = vadd.f32 %v2010_v28, %v4583_v41  ;;  %v3345_v41 = vld [vmem:[%s5321_s13 + $0x60] sm:$0xff] }
 0xe68   : > { %v4694_v34 = vmul.f32 %v4566_v20, %v2015_v36 }
 0xe6a   : > { %2038 = vrot.lane.b32.xlu1 %v4694_v34, %s5383_s1  ;;  %2071 = vperm.xlu0 %3586, %v3348_v38  }
 0xe6b   : > { %2026 = vrot.lane.b32.xlu2 %v4694_v34, %s5384_s24 }
 0xe72   : > { %2032 = vrot.lane.b32.xlu1 %v4705_v42, %s5383_s1  ;;  %2056 = vperm.xlu0 %3586, %v3345_v41  }
 0xe73   : > { %2020 = vrot.lane.b32.xlu2 %v4705_v42, %s5384_s24 }
 0xe7a   : > { %2022 = vrot.lane.b32.xlu1 %v4677_v13, %s5384_s24  ;;  %2136 = vperm.xlu0 %3586, %v3366_v43  }
 0xe7b   : > { %2061 = vperm.xlu2 %3588, %v3346_v40  }
 0xe82   : > { %2066 = vperm.xlu1 %3587, %v3347_v44   ;;  %2261 = vperm.xlu0 %3586, %v3382_v45  }
 0xe83   : > { %2141 = vperm.xlu2 %3588, %v3367_v46  }
 0xe8a   : > { %2146 = vperm.xlu1 %3587, %v3368_v47   ;;  %2246 = vperm.xlu0 %3586, %v3379_v7  }
 0xe8b   : > { %2200 = vperm.xlu2 %3588, %v1427_v48   ;;  %v3375_v48 = vld [vmem:[%s5318_s10 + $0x20] sm:$0xff] }
 0xe92   : > { %2131 = vperm.xlu1 %3587, %v3365_v49   ;;  %v3376_v49 = vld [vmem:[%s5318_s10 + $0x28] sm:$0xff] }
 0xe93   : > { %2251 = vperm.xlu2 %3588, %v3380_v50   ;;  %v3377_v50 = vld [vmem:[%s5318_s10 + $0x30] sm:$0xff] }
 0xe9a   : > { %2256 = vperm.xlu1 %3587, %v3381_v51   ;;  %v3378_v51 = vld [vmem:[%s5318_s10 + $0x38] sm:$0xff] }
 0xebc   : > { %v2037_v53 = vpop.permute.xlu2 %2036 }
 0xec5   : > { %v2027_v56 = vpop.permute.xlu2 %2026 }
 0xecc   : > { %v2035_v54 = vpop.permute.xlu0 %2034 }
 0xecd   : > { %v2021_v60 = vpop.permute.xlu2 %2020 }
 0xed4   : > { %v2025_v57 = vpop.permute.xlu0 %2024 }
 0xed5   : > { %v2062_v12 = vpop.permute.xlu2 %2061 }
 0xedc   : > { %v2039_v52 = vpop.permute.xlu1 %2038  ;;  %v2072_v3 = vpop.permute.xlu0 %2071 }
 0xedd   : > { %3349 = vmatpush.msk.msrb.mxu0 %vm1220_vm8, %v2039_v52  ;;  %v2142_v29 = vpop.permute.xlu2 %2141 }
 0xedf   : > { %3350 = vmatpush.msk.msrb.mxu0 %vm1220_vm8, %v2037_v53 }
 0xee1   : > { %3351 = vmatpush.msk.msrb.mxu0 %vm1220_vm8, %v2035_v54 }
 0xee4   : > { %v2033_v55 = vpop.permute.xlu1 %2032  ;;  %v2057_v17 = vpop.permute.xlu0 %2056 }
 0xee5   : > { %3352 = vmatpush.msk.msrb.mxu0 %vm1220_vm8, %v2033_v55 }
 0xee7   : > { %2094 = vmatpush.msrb.mxu0 %v4694_v34 }
 0xee9   : > { %2095 = vmatpush.msrb.mxu0 %v4683_v33 }
 0xeeb   : > { %2096 = vmatpush.msrb.mxu0 %v4677_v13 }
 0xeec   : > { %v2023_v58 = vpop.permute.xlu1 %2022  ;;  %v2137_v31 = vpop.permute.xlu0 %2136 }
 0xeed   : > { %2097 = vmatpush.msrb.mxu0 %v4705_v42 }
 0xeef   : > { %3353 = vmatpush.msk.msrb.mxu0 %vm1207_vm9, %v2027_v56 }
 0xef1   : > { %3354 = vmatpush.msk.msrb.mxu0 %vm1207_vm9, %v2025_v57 }
 0xef3   : > { %3355 = vmatpush.msk.msrb.mxu0 %vm1207_vm9, %v2023_v58 }
 0xef4   : > { %v2067_v5 = vpop.permute.xlu1 %2066 }
 0xef5   : > { %3356 = vmatpush.msk.msrb.mxu0 %vm1207_vm9, %v2021_v60 }
 0xef6   : > { %3357 = vmatmul.msk.f32.vlgmr.msrb.gmra.mxu0 %vm724_vm3, %v3341_v59  ;;  %v2262_v59 = vpop.permute.xlu0 %2261 }
 0xefc   : > { %v2147_v4 = vpop.permute.xlu1 %2146 }
 0xefe   : > { %3358 = vmatmul.msk.f32.gmra.mxu0 %vm724_vm3, %v3342_v61  ;;  %v3396_v61 = vld [vmem:[%s5321_s13 + $0x98] sm:$0xff] }
 0xf04   : > { %v2132_v37 = vpop.permute.xlu1 %2131 }
 0xf06   : > { %3359 = vmatmul.msk.f32.gmra.mxu0 %vm724_vm3, %v3343_v62 }
 0xf0c   : > { %v2257_v56 = vpop.permute.xlu1 %2256 }
 0xf0e   : > { %3360 = vmatmul.msk.f32.gmra.mxu0 %vm724_vm3, %v3344_v63  ;;  %v2247_v63 = vpop.permute.xlu0 %2246 }
 0xf73   : > { %v2103_v0 = vpop.f32.mrf.mxu0 }
 0xf74   : > { %v2104_v18 = vadd.f32 %v2103_v0, %v2057_v17  ;;  %v3393_v0 = vld [vmem:[%s5321_s13 + $0x80] sm:$0xff] }
 0xf76   : > { %v2115_v15 = vmax.f32 %v2104_v18, 0.0 }
 0xf7b   : > { %v2106_v1 = vpop.f32.mrf.mxu0 }
 0xf7c   : > { %v2107_v6 = vadd.f32 %v2106_v1, %v2062_v12 }
 0xf7e   : > { %v2116_v14 = vmax.f32 %v2107_v6, 0.0 }
 0xf83   : > { %v2109_v2 = vpop.f32.mrf.mxu0 }
 0xf84   : > { %v2110_v10 = vadd.f32 %v2109_v2, %v2067_v5  ;;  %v3414_v2 = vld [vmem:[%s5323_s15 + $0x88] sm:$0xff]  ;;  %v3395_v5 = vld [vmem:[%s5321_s13 + $0x90] sm:$0xff] }
 0xf86   : > { %v2117_v19 = vmax.f32 %v2110_v10, 0.0  ;;  %v3416_v10 = vld [vmem:[%s5323_s15 + $0x98] sm:$0xff] }
 0xf8b   : > { %v2112_v8 = vpop.f32.mrf.mxu0 }
 0xf8c   : > { %v2113_v11 = vadd.f32 %v2112_v8, %v2072_v3  ;;  %v3394_v3 = vld [vmem:[%s5321_s13 + $0x88] sm:$0xff]  ;;  %v3415_v8 = vld [vmem:[%s5323_s15 + $0x90] sm:$0xff] }
 0xf8e   : > { %v2118_v9 = vmax.f32 %v2113_v11, 0.0  ;;  %v3413_v11 = vld [vmem:[%s5323_s15 + $0x80] sm:$0xff] }
 0xf90   : > { %2173 = vmatpush.msrb.mxu2 %v2118_v9 }
 0xf92   : > { %2174 = vmatpush.msrb.mxu2 %v2117_v19 }
 0xf94   : > { %2175 = vmatpush.msrb.mxu2 %v2116_v14 }
 0xf96   : > { %2176 = vmatpush.msrb.mxu2 %v2115_v15  ;;  %v3389_v15 = vld [vmem:[%s5320_s12 + $0x80] sm:$0xff] }
 0xf97   : > { %3369 = vmatmul.msk.f32.vlgmr.msrb.gmra.mxu2 %vm628_vm0, %v3361_v21 }
 0xf9f   : > { %3370 = vmatmul.msk.f32.gmra.mxu2 %vm628_vm0, %v3362_v24  ;;  %v3390_v24 = vld [vmem:[%s5320_s12 + $0x88] sm:$0xff] }
 0xfa7   : > { %3371 = vmatmul.msk.f32.gmra.mxu2 %vm628_vm0, %v3363_v23  ;;  %v3391_v23 = vld [vmem:[%s5320_s12 + $0x90] sm:$0xff] }
 0xfaf   : > { %3372 = vmatmul.msk.f32.gmra.mxu2 %vm628_vm0, %v3364_v25  ;;  %v3392_v25 = vld [vmem:[%s5320_s12 + $0x98] sm:$0xff] }
0x101a   : > { %v2178_v26 = vpop.f32.mrf.mxu2 }
0x101b   : > { %v2179_v38 = vadd.f32 %v2178_v26, %v2132_v37 }
0x101d   : > { %v2190_v40 = vadd.f32 %v2179_v38, %v4705_v42 }
0x101f   : > { %v2194_v46 = vmul.f32 %v4566_v20, %v2190_v40  ;;  %v3409_v40 = vld [vmem:[%s5322_s14 + $0x80] sm:$0xff] }
0x1022   : > { %v2181_v27 = vpop.f32.mrf.mxu2 }
0x1023   : > { %v2182_v28 = vadd.f32 %v2181_v27, %v2137_v31 }
0x1025   : > { %v2191_v41 = vadd.f32 %v2182_v28, %v4677_v13  ;;  %v2201_v13 = vpop.permute.xlu2 %2200 }
0x1027   : > { %v2195_v45 = vmul.f32 %v4566_v20, %v2191_v41 }
0x102a   : > { %v2184_v16 = vpop.f32.mrf.mxu2 }
0x102b   : > { %v2185_v30 = vadd.f32 %v2184_v16, %v2142_v29 }
0x102d   : > { %v2192_v39 = vadd.f32 %v2185_v30, %v4683_v33  ;;  %v1426_v33 = vld [vmem:[%s5324_s16] sm:$0xff]  ;;  %v2252_v53 = vpop.permute.xlu2 %2251 }
0x102f   : > { %v2196_v44 = vmul.f32 %v4566_v20, %v2192_v39 }
0x1032   : > { %v2187_v22 = vpop.f32.mrf.mxu2 }
0x1033   : > { %v2188_v36 = vadd.f32 %v2187_v22, %v2147_v4 }
0x1035   : > { %v2193_v35 = vadd.f32 %v2188_v36, %v4694_v34 }
0x1037   : > { %v2197_v43 = vmul.f32 %v4566_v20, %v2193_v35 }
0x1039   : > { %2218 = vmatpush.msra.mxu1 %v2197_v43 }
0x103b   : > { %2219 = vmatpush.msra.mxu1 %v2196_v44  ;;  %v3410_v44 = vld [vmem:[%s5322_s14 + $0x88] sm:$0xff] }
0x103d   : > { %2220 = vmatpush.msra.mxu1 %v2195_v45  ;;  %v3411_v45 = vld [vmem:[%s5322_s14 + $0x90] sm:$0xff] }
0x103f   : > { %2221 = vmatpush.msra.mxu1 %v2194_v46  ;;  %v3412_v46 = vld [vmem:[%s5322_s14 + $0x98] sm:$0xff] }
0x1040   : > { %3373 = vmatmul.msk.f32.vlgmr.msra.gmra.mxu1 %vm628_vm0, %v1426_v33 }
0x10bd   : > { %v2223_v34 = vpop.f32.mrf.mxu1 }
0x10be   : > { %v2224_v47 = vadd.f32 %v2223_v34, %v2201_v13 }
0x10c0   : > { %v2226_v42 = vmul.f32 %v4566_v20, %v2224_v47 }
0x10c2   : > { %3374 = vst [vmem:[%s4336_s30 + $0x8] sm:$0xff] %v2226_v42  ;;  %v2229_v7 = vmul.f32 %v4566_v20, %v2226_v42 }
0x10c4   : > { %2291 = vmatpush.msra.mxu3 %v2229_v7 }
0x10c5   : > { %3385 = vmatmul.msk.f32.vlgmr.msra.gmra.mxu3 %vm1448_vm10, %v3375_v48 }
0x10cd   : > { %3386 = vmatmul.msk.f32.gmra.mxu3 %vm1448_vm10, %v3376_v49 }
0x10d5   : > { %3387 = vmatmul.msk.f32.gmra.mxu3 %vm1448_vm10, %v3377_v50 }
0x10dd   : > { %3388 = vmatmul.msk.f32.gmra.mxu3 %vm1448_vm10, %v3378_v51 }
0x1148   : > { %v2293_v52 = vpop.f32.mrf.mxu3 }
0x1149   : > { %v4851_v1 = vadd.f32 %v2293_v52, %v2247_v63 }
0x1150   : > { %v2296_v54 = vpop.f32.mrf.mxu3 }
0x1151   : > { %v4829_v55 = vadd.f32 %v2296_v54, %v2252_v53 }
0x1153   : > { %2319 = vrot.lane.b32.xlu0 %v4829_v55, %s5385_s5 }
0x1158   : > { %v2299_v57 = vpop.f32.mrf.mxu3 }
0x1159   : > { %v4833_v58 = vadd.f32 %v2299_v57, %v2257_v56 }
0x115b   : > { %2309 = vrot.lane.b32.xlu0 %v4833_v58, %s5386_s2  ;;  %2321 = vrot.lane.b32.xlu2 %v4833_v58, %s5385_s5 }
0x1160   : > { %v2302_v60 = vpop.f32.mrf.mxu3 }
0x1161   : > { %v4842_v62 = vadd.f32 %v2302_v60, %v2262_v59  ;;  %v3428_v59 = vld [vmem:[%s5321_s13 + $0xb8] sm:$0xff] }
0x1163   : > { %2323 = vrot.lane.b32.xlu1 %v4842_v62, %s5385_s5  ;;  %2356 = vperm.xlu0 %3586, %v3396_v61  }
0x1164   : > { %2311 = vrot.lane.b32.xlu2 %v4842_v62, %s5386_s2 }
0x116b   : > { %2317 = vrot.lane.b32.xlu1 %v4851_v1, %s5385_s5  ;;  %2341 = vperm.xlu0 %3586, %v3393_v0   ;;  %v3446_v0 = vld [vmem:[%s5323_s15 + $0xa8] sm:$0xff]  ;;  %s3060_s5 = sshll.u32 %s4336_s30, 4  ;;  %s3061_s5 = int_to_ptr.vmem [resolvable:$true] %s3060_s5 }
0x116c   : > { %2305 = vrot.lane.b32.xlu2 %v4851_v1, %s5386_s2 }
0x1173   : > { %2307 = vrot.lane.b32.xlu1 %v4829_v55, %s5386_s2  ;;  %2421 = vperm.xlu0 %3586, %v3414_v2   ;;  %v3447_v2 = vld [vmem:[%s5323_s15 + $0xb0] sm:$0xff]  ;;  %s3519_s2 = sshll.u32 %s3783_s0, 3 }
0x1174   : > { %2346 = vperm.xlu2 %3588, %v3394_v3   ;;  %v3427_v3 = vld [vmem:[%s5321_s13 + $0xb0] sm:$0xff] }
0x117b   : > { %2351 = vperm.xlu1 %3587, %v3395_v5   ;;  %v3448_v5 = vld [vmem:[%s5323_s15 + $0xb8] sm:$0xff] }
0x117c   : > { %2426 = vperm.xlu2 %3588, %v3415_v8   ;;  %v3445_v8 = vld [vmem:[%s5323_s15 + $0xa0] sm:$0xff] }
0x1183   : > { %2431 = vperm.xlu1 %3587, %v3416_v10  }
0x118b   : > { %2416 = vperm.xlu1 %3587, %v3413_v11  }
0x11b5   : > { %v2322_v6 = vpop.permute.xlu2 %2321 }
0x11be   : > { %v2312_v18 = vpop.permute.xlu2 %2311 }
0x11c5   : > { %v2320_v9 = vpop.permute.xlu0 %2319 }
0x11c6   : > { %v2306_v21 = vpop.permute.xlu2 %2305 }
0x11cd   : > { %v2310_v19 = vpop.permute.xlu0 %2309 }
0x11ce   : > { %v2347_v28 = vpop.permute.xlu2 %2346 }
0x11d5   : > { %v2324_v12 = vpop.permute.xlu1 %2323  ;;  %v2357_v16 = vpop.permute.xlu0 %2356 }
0x11d6   : > { %3397 = vmatpush.msk.msra.mxu0 %vm683_vm1, %v2324_v12  ;;  %v2427_v48 = vpop.permute.xlu2 %2426 }
0x11d8   : > { %3398 = vmatpush.msk.msra.mxu0 %vm683_vm1, %v2322_v6 }
0x11da   : > { %3399 = vmatpush.msk.msra.mxu0 %vm683_vm1, %v2320_v9 }
0x11dd   : > { %v2318_v17 = vpop.permute.xlu1 %2317  ;;  %v2342_v38 = vpop.permute.xlu0 %2341 }
0x11de   : > { %3400 = vmatpush.msk.msra.mxu0 %vm683_vm1, %v2318_v17 }
0x11e0   : > { %2379 = vmatpush.msra.mxu0 %v4842_v62 }
0x11e2   : > { %2380 = vmatpush.msra.mxu0 %v4833_v58 }
0x11e4   : > { %2381 = vmatpush.msra.mxu0 %v4829_v55 }
0x11e5   : > { %v2308_v14 = vpop.permute.xlu1 %2307  ;;  %v2422_v13 = vpop.permute.xlu0 %2421 }
0x11e6   : > { %2382 = vmatpush.msra.mxu0 %v4851_v1 }
0x11e8   : > { %3401 = vmatpush.msk.msra.mxu0 %vm670_vm2, %v2312_v18 }
0x11ea   : > { %3402 = vmatpush.msk.msra.mxu0 %vm670_vm2, %v2310_v19  ;;  %v3421_v19 = vld [vmem:[%s5320_s12 + $0xa0] sm:$0xff] }
0x11ec   : > { %3403 = vmatpush.msk.msra.mxu0 %vm670_vm2, %v2308_v14 }
0x11ed   : > { %v2352_v29 = vpop.permute.xlu1 %2351 }
0x11ee   : > { %3404 = vmatpush.msk.msra.mxu0 %vm670_vm2, %v2306_v21  ;;  %v3423_v21 = vld [vmem:[%s5320_s12 + $0xb0] sm:$0xff] }
0x11ef   : > { %3405 = vmatmul.msk.f32.vlgmr.msra.gmra.mxu0 %vm724_vm3, %v3389_v15  ;;  %v3422_v15 = vld [vmem:[%s5320_s12 + $0xa8] sm:$0xff] }
0x11f5   : > { %v2432_v51 = vpop.permute.xlu1 %2431 }
0x11f7   : > { %3406 = vmatmul.msk.f32.gmra.mxu0 %vm724_vm3, %v3390_v24  ;;  %v3424_v24 = vld [vmem:[%s5320_s12 + $0xb8] sm:$0xff] }
0x11fd   : > { %v2417_v57 = vpop.permute.xlu1 %2416 }
0x11ff   : > { %3407 = vmatmul.msk.f32.gmra.mxu0 %vm724_vm3, %v3391_v23 }
0x1207   : > { %3408 = vmatmul.msk.f32.gmra.mxu0 %vm724_vm3, %v3392_v25 }
0x126c   : > { %v2388_v26 = vpop.f32.mrf.mxu0 }
0x126d   : > { %v2389_v39 = vadd.f32 %v2388_v26, %v2342_v38 }
0x126f   : > { %v2400_v43 = vmax.f32 %v2389_v39, 0.0 }
0x1274   : > { %v2391_v27 = vpop.f32.mrf.mxu0 }
0x1275   : > { %v2392_v36 = vadd.f32 %v2391_v27, %v2347_v28 }
0x1277   : > { %v2401_v41 = vmax.f32 %v2392_v36, 0.0 }
0x127c   : > { %v2394_v4 = vpop.f32.mrf.mxu0 }
0x127d   : > { %v2395_v31 = vadd.f32 %v2394_v4, %v2352_v29 }
0x127f   : > { %v2402_v35 = vmax.f32 %v2395_v31, 0.0 }
0x1284   : > { %v2397_v30 = vpop.f32.mrf.mxu0 }
0x1285   : > { %v2398_v22 = vadd.f32 %v2397_v30, %v2357_v16 }
0x1287   : > { %v2403_v37 = vmax.f32 %v2398_v22, 0.0 }
0x1289   : > { %2458 = vmatpush.msrb.mxu1 %v2403_v37 }
0x128b   : > { %2459 = vmatpush.msrb.mxu1 %v2402_v35 }
0x128d   : > { %2460 = vmatpush.msrb.mxu1 %v2401_v41  ;;  %v3441_v41 = vld [vmem:[%s5322_s14 + $0xa0] sm:$0xff] }
0x128f   : > { %2461 = vmatpush.msrb.mxu1 %v2400_v43  ;;  %v3442_v43 = vld [vmem:[%s5322_s14 + $0xa8] sm:$0xff] }
0x1290   : > { %3417 = vmatmul.msk.f32.vlgmr.msrb.gmra.mxu1 %vm628_vm0, %v3409_v40  ;;  %v3443_v40 = vld [vmem:[%s5322_s14 + $0xb0] sm:$0xff] }
0x1298   : > { %3418 = vmatmul.msk.f32.gmra.mxu1 %vm628_vm0, %v3410_v44  ;;  %v3444_v44 = vld [vmem:[%s5322_s14 + $0xb8] sm:$0xff] }
0x12a0   : > { %3419 = vmatmul.msk.f32.gmra.mxu1 %vm628_vm0, %v3411_v45 }
0x12a8   : > { %3420 = vmatmul.msk.f32.gmra.mxu1 %vm628_vm0, %v3412_v46 }
0x130d   : > { %v2463_v33 = vpop.f32.mrf.mxu1 }
0x130e   : > { %v2464_v60 = vadd.f32 %v2463_v33, %v2417_v57 }
0x1310   : > { %v2475_v61 = vadd.f32 %v2464_v60, %v4851_v1  ;;  %v3426_v1 = vld [vmem:[%s5321_s13 + $0xa8] sm:$0xff] }
0x1312   : > { %v4959_v63 = vmul.f32 %v4566_v20, %v2475_v61  ;;  %v3457_v61 = vld [vmem:[%s5321_s13 + $0xc0] sm:$0xff] }
0x1315   : > { %v2466_v34 = vpop.f32.mrf.mxu1 }
0x1316   : > { %v2467_v47 = vadd.f32 %v2466_v34, %v2422_v13 }
0x1318   : > { %v2476_v42 = vadd.f32 %v2467_v47, %v4829_v55 }
0x131a   : > { %v4931_v7 = vmul.f32 %v4566_v20, %v2476_v42 }
0x131c   : > { %2497 = vrot.lane.b32.xlu1 %v4931_v7, %s5379_s21 }
0x131d   : > { %v2469_v49 = vpop.f32.mrf.mxu1 }
0x131e   : > { %v2470_v50 = vadd.f32 %v2469_v49, %v2427_v48 }
0x1320   : > { %v2477_v52 = vadd.f32 %v2470_v50, %v4833_v58 }
0x1322   : > { %v4937_v53 = vmul.f32 %v4566_v20, %v2477_v52 }
0x1324   : > { %2499 = vrot.lane.b32.xlu0 %v4937_v53, %s5379_s21  ;;  %2487 = vrot.lane.b32.xlu1 %v4937_v53, %s5380_s26 }
0x1325   : > { %v2472_v54 = vpop.f32.mrf.mxu1 }
0x1326   : > { %v2473_v55 = vadd.f32 %v2472_v54, %v2432_v51 }
0x1328   : > { %v2478_v56 = vadd.f32 %v2473_v55, %v4842_v62  ;;  %v3425_v62 = vld [vmem:[%s5321_s13 + $0xa0] sm:$0xff] }
0x132a   : > { %v4948_v58 = vmul.f32 %v4566_v20, %v2478_v56 }
0x132c   : > { %2534 = vperm.xlu1 %3587, %v3428_v59   ;;  %2489 = vrot.lane.b32.xlu0 %v4948_v58, %s5380_s26 }
0x132d   : > { %2501 = vrot.lane.b32.xlu2 %v4948_v58, %s5379_s21 }
0x1334   : > { %2519 = vperm.xlu1 %3587, %v3425_v62   ;;  %2483 = vrot.lane.b32.xlu0 %v4959_v63, %s5380_s26  ;;  %v3458_v62 = vld [vmem:[%s5321_s13 + $0xc8] sm:$0xff] }
0x1335   : > { %2495 = vrot.lane.b32.xlu2 %v4959_v63, %s5379_s21 }
0x133c   : > { %2599 = vperm.xlu1 %3587, %v3446_v0   ;;  %2524 = vperm.xlu0 %3586, %v3426_v1   ;;  %v3459_v0 = vld [vmem:[%s5321_s13 + $0xd0] sm:$0xff]  ;;  %v3480_v1 = vld [vmem:[%s5323_s15 + $0xd8] sm:$0xff] }
0x133d   : > { %2485 = vrot.lane.b32.xlu2 %v4931_v7, %s5380_s26 }
0x1344   : > { %2604 = vperm.xlu0 %3586, %v3447_v2   ;;  %v3477_v2 = vld [vmem:[%s5323_s15 + $0xc0] sm:$0xff] }
0x1345   : > { %2529 = vperm.xlu2 %3588, %v3427_v3  }
0x134d   : > { %2609 = vperm.xlu2 %3588, %v3448_v5  }
0x1355   : > { %2594 = vperm.xlu2 %3588, %v3445_v8  }
0x1387   : > { %v2502_v10 = vpop.permute.xlu2 %2501 }
0x1388   : > { %3429 = vmatpush.msk.msra.mxu2 %vm860_vm4, %v2502_v10 }
0x138e   : > { %v2498_v12 = vpop.permute.xlu1 %2497 }
0x138f   : > { %v2496_v6 = vpop.permute.xlu2 %2495 }
0x1396   : > { %v2500_v11 = vpop.permute.xlu0 %2499  ;;  %v2488_v17 = vpop.permute.xlu1 %2487 }
0x1397   : > { %3430 = vmatpush.msk.msra.mxu2 %vm860_vm4, %v2500_v11  ;;  %v2486_v18 = vpop.permute.xlu2 %2485 }
0x1399   : > { %3431 = vmatpush.msk.msra.mxu2 %vm860_vm4, %v2498_v12 }
0x139b   : > { %3432 = vmatpush.msk.msra.mxu2 %vm860_vm4, %v2496_v6 }
0x139d   : > { %2557 = vmatpush.msra.mxu2 %v4948_v58 }
0x139e   : > { %v2490_v9 = vpop.permute.xlu0 %2489  ;;  %v2535_v27 = vpop.permute.xlu1 %2534 }
0x139f   : > { %2558 = vmatpush.msra.mxu2 %v4937_v53  ;;  %v2530_v4 = vpop.permute.xlu2 %2529 }
0x13a1   : > { %2559 = vmatpush.msra.mxu2 %v4931_v7 }
0x13a3   : > { %2560 = vmatpush.msra.mxu2 %v4959_v63 }
0x13a5   : > { %3433 = vmatpush.msk.msra.mxu2 %vm847_vm5, %v2490_v9  ;;  %v3453_v9 = vld [vmem:[%s5320_s12 + $0xc0] sm:$0xff] }
0x13a6   : > { %v2484_v14 = vpop.permute.xlu0 %2483  ;;  %v2520_v36 = vpop.permute.xlu1 %2519 }
0x13a7   : > { %3434 = vmatpush.msk.msra.mxu2 %vm847_vm5, %v2488_v17  ;;  %v2610_v50 = vpop.permute.xlu2 %2609 }
0x13a9   : > { %3435 = vmatpush.msk.msra.mxu2 %vm847_vm5, %v2486_v18  ;;  %v3454_v18 = vld [vmem:[%s5320_s12 + $0xc8] sm:$0xff] }
0x13ab   : > { %3436 = vmatpush.msk.msra.mxu2 %vm847_vm5, %v2484_v14  ;;  %v3456_v14 = vld [vmem:[%s5320_s12 + $0xd8] sm:$0xff] }
0x13ac   : > { %3437 = vmatmul.msk.f32.vlgmr.msra.gmra.mxu2 %vm724_vm3, %v3421_v19  ;;  %v3455_v19 = vld [vmem:[%s5320_s12 + $0xd0] sm:$0xff] }
0x13ae   : > { %v2525_v31 = vpop.permute.xlu0 %2524  ;;  %v2600_v46 = vpop.permute.xlu1 %2599 }
0x13af   : > { %v2595_v56 = vpop.permute.xlu2 %2594 }
0x13b4   : > { %3438 = vmatmul.msk.f32.gmra.mxu2 %vm724_vm3, %v3422_v15 }
0x13b6   : > { %v2605_v42 = vpop.permute.xlu0 %2604 }
0x13bc   : > { %3439 = vmatmul.msk.f32.gmra.mxu2 %vm724_vm3, %v3423_v21 }
0x13c4   : > { %3440 = vmatmul.msk.f32.gmra.mxu2 %vm724_vm3, %v3424_v24 }
0x142f   : > { %v2566_v23 = vpop.f32.mrf.mxu2 }
0x1430   : > { %v2567_v37 = vadd.f32 %v2566_v23, %v2520_v36 }
0x1432   : > { %v2578_v35 = vmax.f32 %v2567_v37, 0.0 }
0x1437   : > { %v2569_v25 = vpop.f32.mrf.mxu2 }
0x1438   : > { %v2570_v22 = vadd.f32 %v2569_v25, %v2525_v31 }
0x143a   : > { %v2579_v39 = vmax.f32 %v2570_v22, 0.0 }
0x143f   : > { %v2572_v26 = vpop.f32.mrf.mxu2 }
0x1440   : > { %v2573_v29 = vadd.f32 %v2572_v26, %v2530_v4 }
0x1442   : > { %v2580_v38 = vmax.f32 %v2573_v29, 0.0 }
0x1447   : > { %v2575_v16 = vpop.f32.mrf.mxu2 }
0x1448   : > { %v2576_v30 = vadd.f32 %v2575_v16, %v2535_v27 }
0x144a   : > { %v2581_v28 = vmax.f32 %v2576_v30, 0.0 }
0x144c   : > { %2636 = vmatpush.msrb.mxu3 %v2581_v28 }
0x144e   : > { %2637 = vmatpush.msrb.mxu3 %v2580_v38  ;;  %v3473_v38 = vld [vmem:[%s5322_s14 + $0xc0] sm:$0xff] }
0x1450   : > { %2638 = vmatpush.msrb.mxu3 %v2579_v39  ;;  %v3474_v39 = vld [vmem:[%s5322_s14 + $0xc8] sm:$0xff] }
0x1452   : > { %2639 = vmatpush.msrb.mxu3 %v2578_v35  ;;  %v3475_v35 = vld [vmem:[%s5322_s14 + $0xd0] sm:$0xff] }
0x1453   : > { %3449 = vmatmul.msk.f32.vlgmr.msrb.gmra.mxu3 %vm628_vm0, %v3441_v41  ;;  %v3476_v41 = vld [vmem:[%s5322_s14 + $0xd8] sm:$0xff] }
0x145b   : > { %3450 = vmatmul.msk.f32.gmra.mxu3 %vm628_vm0, %v3442_v43 }
0x1463   : > { %3451 = vmatmul.msk.f32.gmra.mxu3 %vm628_vm0, %v3443_v40 }
0x146b   : > { %3452 = vmatmul.msk.f32.gmra.mxu3 %vm628_vm0, %v3444_v44 }
0x14d6   : > { %v2641_v45 = vpop.f32.mrf.mxu3 }
0x14d7   : > { %v2642_v57 = vadd.f32 %v2641_v45, %v2595_v56  ;;  %v3492_v56 = vld [vmem:[%s5321_s13 + $0xf8] sm:$0xff] }
0x14d9   : > { %v2653_v60 = vadd.f32 %v2642_v57, %v4959_v63  ;;  %v3479_v63 = vld [vmem:[%s5323_s15 + $0xd0] sm:$0xff] }
0x14de   : > { %v2644_v33 = vpop.f32.mrf.mxu3 }
0x14df   : > { %v2645_v13 = vadd.f32 %v2644_v33, %v2600_v46  ;;  %v5147_v33 = vld [vmem:[%s3821_s23] ss:$0 sm:$0xff] }
0x14e1   : > { %v2654_v34 = vadd.f32 %v2645_v13, %v4931_v7 }
0x14e3   : > { %v5039_v47 = vmul.f32 %v4566_v20, %v2654_v34 }
0x14e5   : > { %2675 = vrot.lane.b32.xlu2 %v5039_v47, %s5381_s25 }
0x14e6   : > { %v2647_v48 = vpop.f32.mrf.mxu3 }
0x14e7   : > { %v2648_v49 = vadd.f32 %v2647_v48, %v2605_v42 }
0x14e9   : > { %v2655_v51 = vadd.f32 %v2648_v49, %v4937_v53  ;;  %v3460_v53 = vld [vmem:[%s5321_s13 + $0xd8] sm:$0xff] }
0x14eb   : > { %v5045_v52 = vmul.f32 %v4566_v20, %v2655_v51 }
0x14ed   : > { %2677 = vrot.lane.b32.xlu1 %v5045_v52, %s5381_s25  ;;  %2665 = vrot.lane.b32.xlu2 %v5045_v52, %s5382_s20 }
0x14ee   : > { %v2650_v7 = vpop.f32.mrf.mxu3 }
0x14ef   : > { %v2651_v54 = vadd.f32 %v2650_v7, %v2610_v50 }
0x14f1   : > { %v2656_v55 = vadd.f32 %v2651_v54, %v4948_v58  ;;  %v5064_v58 = vmul.f32 %v4566_v20, %v2653_v60 }
0x14f3   : > { %v5053_v59 = vmul.f32 %v4566_v20, %v2656_v55  ;;  %v3478_v20 = vld [vmem:[%s5323_s15 + $0xc8] sm:$0xff] }
0x14f5   : > { %2679 = vrot.lane.b32.xlu0 %v5053_v59, %s5381_s25  ;;  %2667 = vrot.lane.b32.xlu1 %v5053_v59, %s5382_s20 }
0x14f6   : > { %2712 = vperm.xlu2 %3588, %v3460_v53  }
0x14fd   : > { %2661 = vrot.lane.b32.xlu1 %v5064_v58, %s5382_s20  ;;  %2673 = vrot.lane.b32.xlu0 %v5064_v58, %s5381_s25  ;;  %s5388_s25 = smov %s5387_s27 }
0x14fe   : > { %2697 = vperm.xlu2 %3588, %v3457_v61   ;;  %v3510_v61 = vld [vmem:[%s5323_s15 + $0xe8] sm:$0xff]  ;;  %s3612_s29 = scalar_lea.hbm %s5388_s25, 48 }
0x1505   : > { %2702 = vperm.xlu1 %3587, %v3458_v62   ;;  %2663 = vrot.lane.b32.xlu0 %v5039_v47, %s5382_s20  ;;  %v3491_v62 = vld [vmem:[%s5321_s13 + $0xf0] sm:$0xff]  ;;  %s3049_s20 = scalar_lea.sflag [#allocation3], %s5390_s22 }
0x1506   : > { %2777 = vperm.xlu2 %3588, %v3478_v20   ;;  %v3511_v20 = vld [vmem:[%s5323_s15 + $0xf0] sm:$0xff] }
0x150d   : > { %2782 = vperm.xlu1 %3587, %v3479_v63   ;;  %2707 = vperm.xlu0 %3586, %v3459_v0   ;;  %v3512_v63 = vld [vmem:[%s5323_s15 + $0xf8] sm:$0xff]  ;;  %v3384_v0 = vld [vmem:[%s5325_s17 + $0x8] sm:$0xff] }
0x1515   : > { %2787 = vperm.xlu0 %3586, %v3480_v1   ;;  %v3509_v1 = vld [vmem:[%s5323_s15 + $0xe0] sm:$0xff] }
0x151d   : > { %2772 = vperm.xlu0 %3586, %v3477_v2  }
0x153f   : > { %v2676_v8 = vpop.permute.xlu2 %2675 }
0x1547   : > { %v2666_v12 = vpop.permute.xlu2 %2665 }
0x1550   : > { %v2713_v23 = vpop.permute.xlu2 %2712 }
0x1558   : > { %v2698_v31 = vpop.permute.xlu2 %2697 }
0x155f   : > { %v2678_v5 = vpop.permute.xlu1 %2677 }
0x1560   : > { %v2778_v40 = vpop.permute.xlu2 %2777 }
0x1567   : > { %v2680_v3 = vpop.permute.xlu0 %2679  ;;  %v2668_v11 = vpop.permute.xlu1 %2667 }
0x1568   : > { %3461 = vmatpush.msk.msra.mxu1 %vm1040_vm6, %v2680_v3 }
0x156a   : > { %3462 = vmatpush.msk.msra.mxu1 %vm1040_vm6, %v2678_v5 }
0x156c   : > { %3463 = vmatpush.msk.msra.mxu1 %vm1040_vm6, %v2676_v8 }
0x156f   : > { %v2674_v10 = vpop.permute.xlu0 %2673  ;;  %v2662_v17 = vpop.permute.xlu1 %2661 }
0x1570   : > { %3464 = vmatpush.msk.msra.mxu1 %vm1040_vm6, %v2674_v10 }
0x1572   : > { %2735 = vmatpush.msra.mxu1 %v5053_v59 }
0x1574   : > { %2736 = vmatpush.msra.mxu1 %v5045_v52 }
0x1576   : > { %2737 = vmatpush.msra.mxu1 %v5039_v47 }
0x1577   : > { %v2664_v6 = vpop.permute.xlu0 %2663  ;;  %v2703_v16 = vpop.permute.xlu1 %2702 }
0x1578   : > { %2738 = vmatpush.msra.mxu1 %v5064_v58 }
0x157a   : > { %3465 = vmatpush.msk.msra.mxu1 %vm1027_vm7, %v2668_v11 }
0x157c   : > { %3466 = vmatpush.msk.msra.mxu1 %vm1027_vm7, %v2666_v12 }
0x157e   : > { %3467 = vmatpush.msk.msra.mxu1 %vm1027_vm7, %v2664_v6  ;;  %v3485_v6 = vld [vmem:[%s5320_s12 + $0xe0] sm:$0xff] }
0x157f   : > { %v2708_v25 = vpop.permute.xlu0 %2707  ;;  %v2783_v34 = vpop.permute.xlu1 %2782 }
0x1580   : > { %3468 = vmatpush.msk.msra.mxu1 %vm1027_vm7, %v2662_v17  ;;  %v3486_v17 = vld [vmem:[%s5320_s12 + $0xe8] sm:$0xff] }
0x1581   : > { %3469 = vmatmul.msk.f32.vlgmr.msra.gmra.mxu1 %vm724_vm3, %v3453_v9 }
0x1587   : > { %v2788_v49 = vpop.permute.xlu0 %2787 }
0x1589   : > { %3470 = vmatmul.msk.f32.gmra.mxu1 %vm724_vm3, %v3454_v18  ;;  %v3487_v18 = vld [vmem:[%s5320_s12 + $0xf0] sm:$0xff] }
0x158f   : > { %v2773_v55 = vpop.permute.xlu0 %2772 }
0x1591   : > { %3471 = vmatmul.msk.f32.gmra.mxu1 %vm724_vm3, %v3455_v19  ;;  %v3488_v19 = vld [vmem:[%s5320_s12 + $0xf8] sm:$0xff] }
0x1599   : > { %3472 = vmatmul.msk.f32.gmra.mxu1 %vm724_vm3, %v3456_v14 }
0x15fe   : > { %v2744_v15 = vpop.f32.mrf.mxu1 }
0x15ff   : > { %v2745_v22 = vadd.f32 %v2744_v15, %v2698_v31 }
0x1601   : > { %v2756_v37 = vmax.f32 %v2745_v22, 0.0 }
0x1606   : > { %v2747_v21 = vpop.f32.mrf.mxu1 }
0x1607   : > { %v2748_v29 = vadd.f32 %v2747_v21, %v2703_v16 }
0x1609   : > { %v2757_v36 = vmax.f32 %v2748_v29, 0.0 }
0x160e   : > { %v2750_v24 = vpop.f32.mrf.mxu1 }
0x160f   : > { %v2751_v27 = vadd.f32 %v2750_v24, %v2708_v25 }
0x1611   : > { %v2758_v28 = vmax.f32 %v2751_v27, 0.0 }
0x1616   : > { %v2753_v26 = vpop.f32.mrf.mxu1 }
0x1617   : > { %v2754_v4 = vadd.f32 %v2753_v26, %v2713_v23 }
0x1619   : > { %v2759_v30 = vmax.f32 %v2754_v4, 0.0 }
0x161b   : > { %2814 = vmatpush.msrb.mxu0 %v2759_v30 }
0x161d   : > { %2815 = vmatpush.msrb.mxu0 %v2758_v28 }
0x161f   : > { %2816 = vmatpush.msrb.mxu0 %v2757_v36  ;;  %v3505_v36 = vld [vmem:[%s5322_s14 + $0xe0] sm:$0xff] }
0x1621   : > { %2817 = vmatpush.msrb.mxu0 %v2756_v37  ;;  %v3506_v37 = vld [vmem:[%s5322_s14 + $0xe8] sm:$0xff] }
0x1622   : > { %3481 = vmatmul.msk.f32.vlgmr.msrb.gmra.mxu0 %vm628_vm0, %v3473_v38  ;;  %v3507_v38 = vld [vmem:[%s5322_s14 + $0xf0] sm:$0xff] }
0x162a   : > { %3482 = vmatmul.msk.f32.gmra.mxu0 %vm628_vm0, %v3474_v39  ;;  %v3508_v39 = vld [vmem:[%s5322_s14 + $0xf8] sm:$0xff] }
0x1632   : > { %3483 = vmatmul.msk.f32.gmra.mxu0 %vm628_vm0, %v3475_v35 }
0x163a   : > { %3484 = vmatmul.msk.f32.gmra.mxu0 %vm628_vm0, %v3476_v41 }
0x169f   : > { %v2819_v43 = vpop.f32.mrf.mxu0 }
0x16a0   : > { %v2820_v57 = vadd.f32 %v2819_v43, %v2773_v55 }
0x16a2   : > { %v2831_v53 = vadd.f32 %v2820_v57, %v5064_v58  ;;  %v3490_v58 = vld [vmem:[%s5321_s13 + $0xe8] sm:$0xff] }
0x16a4   : > { %v5178_v60 = vmul.f32 %v5147_v33, %v2831_v53 }
0x16a7   : > { %v2822_v44 = vpop.f32.mrf.mxu0 }
0x16a8   : > { %v2823_v45 = vadd.f32 %v2822_v44, %v2778_v40 }
0x16aa   : > { %v2832_v46 = vadd.f32 %v2823_v45, %v5039_v47 }
0x16ac   : > { %v5150_v13 = vmul.f32 %v5147_v33, %v2832_v46 }
0x16ae   : > { %2853 = vrot.lane.b32.xlu0 %v5150_v13, %s5383_s1 }
0x16af   : > { %v2825_v42 = vpop.f32.mrf.mxu0 }
0x16b0   : > { %v2826_v48 = vadd.f32 %v2825_v42, %v2783_v34 }
0x16b2   : > { %v2833_v50 = vadd.f32 %v2826_v48, %v5045_v52 }
0x16b4   : > { %v5156_v51 = vmul.f32 %v5147_v33, %v2833_v50 }
0x16b6   : > { %2843 = vrot.lane.b32.xlu0 %v5156_v51, %s5384_s24  ;;  %2855 = vrot.lane.b32.xlu2 %v5156_v51, %s5383_s1 }
0x16b7   : > { %v2828_v47 = vpop.f32.mrf.mxu0 }
0x16b8   : > { %v2829_v7 = vadd.f32 %v2828_v47, %v2788_v49 }
0x16ba   : > { %v2834_v54 = vadd.f32 %v2829_v7, %v5053_v59  ;;  %v3489_v59 = vld [vmem:[%s5321_s13 + $0xe0] sm:$0xff] }
0x16bc   : > { %v5167_v52 = vmul.f32 %v5147_v33, %v2834_v54 }
0x16be   : > { %2857 = vrot.lane.b32.xlu1 %v5167_v52, %s5383_s1  ;;  %2890 = vperm.xlu0 %3586, %v3492_v56  }
0x16bf   : > { %2845 = vrot.lane.b32.xlu2 %v5167_v52, %s5384_s24 }
0x16c6   : > { %2851 = vrot.lane.b32.xlu1 %v5178_v60, %s5383_s1  ;;  %2875 = vperm.xlu0 %3586, %v3489_v59   ;;  %s3059_s1 = scalar_lea.hbm %s5387_s27, %s3519_s2 }
0x16c7   : > { %2839 = vrot.lane.b32.xlu2 %v5178_v60, %s5384_s24  ;;  %s3062_s18 = sshll.u32 %s3059_s1, 4  ;;  %s3063_s18 = int_to_ptr.hbm [resolvable:$true] %s3062_s18 }
0x16c8   : > { %s3606_s19 = sshra.s32 %s3063_s18, 4  ;;  %s3607_s19 = int_to_ptr.hbm [resolvable:$true] %s3606_s19 }
0x16c9   : > { %s3608_s0 = scalar_lea.hbm %s3607_s19, 24  ;;  %p3613_p0 = scmp.lt.s32.totalorder %s3607_s19, %s5388_s25 }
0x16ca   : > { %p3609_p11 = scmp.ne.s32.totalorder %s3607_s19, %s3608_s0  ;;  %p3614_p1 = scmp.lt.s32.totalorder %s3612_s29, %s3608_s0 }
0x16cc   : > { %p3610_p12 = pnand %p3609_p11, %p3800_p5  ;;  %p3615_p2 = por %p3614_p1, %p3613_p0 }
0x16ce   : > { %2841 = vrot.lane.b32.xlu1 %v5150_v13, %s5384_s24  ;;  %2955 = vperm.xlu0 %3586, %v3510_v61   ;;  %p3611_p13 = pneg %p3610_p12 }
0x16cf   : > { %2880 = vperm.xlu2 %3588, %v3490_v58  }
0x16d0   : > { %p3616_p3 = pnand %p3615_p2, %p3611_p13 }
0x16d6   : > { %2885 = vperm.xlu1 %3587, %v3491_v62  }
0x16d7   : > { %2960 = vperm.xlu2 %3588, %v3511_v20  }
0x16de   : > { %2965 = vperm.xlu1 %3587, %v3512_v63  }
0x16df   : > { %3019 = vperm.xlu2 %3588, %v3384_v0  }
0x16e6   : > { %2950 = vperm.xlu1 %3587, %v3509_v1  }
0x1710   : > { %v2856_v3 = vpop.permute.xlu2 %2855 }
0x1719   : > { %v2846_v10 = vpop.permute.xlu2 %2845 }
0x1720   : > { %v2854_v5 = vpop.permute.xlu0 %2853 }
0x1721   : > { %v2840_v9 = vpop.permute.xlu2 %2839 }
0x1728   : > { %v2844_v11 = vpop.permute.xlu0 %2843 }
0x1729   : > { %v2881_v27 = vpop.permute.xlu2 %2880 }
0x1730   : > { %v2858_v2 = vpop.permute.xlu1 %2857  ;;  %v2891_v21 = vpop.permute.xlu0 %2890 }
0x1731   : > { %3493 = vmatpush.msk.msrb.mxu2 %vm1220_vm8, %v2858_v2  ;;  %v2961_v44 = vpop.permute.xlu2 %2960 }
0x1733   : > { %3494 = vmatpush.msk.msrb.mxu2 %vm1220_vm8, %v2856_v3 }
0x1735   : > { %3495 = vmatpush.msk.msrb.mxu2 %vm1220_vm8, %v2854_v5 }
0x1738   : > { %v2852_v8 = vpop.permute.xlu1 %2851  ;;  %v2876_v29 = vpop.permute.xlu0 %2875 }
0x1739   : > { %3496 = vmatpush.msk.msrb.mxu2 %vm1220_vm8, %v2852_v8 }
0x173b   : > { %2913 = vmatpush.msrb.mxu2 %v5167_v52 }
0x173d   : > { %2914 = vmatpush.msrb.mxu2 %v5156_v51 }
0x173f   : > { %2915 = vmatpush.msrb.mxu2 %v5150_v13 }
0x1740   : > { %v2842_v12 = vpop.permute.xlu1 %2841  ;;  %v2956_v46 = vpop.permute.xlu0 %2955 }
0x1741   : > { %2916 = vmatpush.msrb.mxu2 %v5178_v60 }
0x1743   : > { %3497 = vmatpush.msk.msrb.mxu2 %vm1207_vm9, %v2846_v10 }
0x1745   : > { %3498 = vmatpush.msk.msrb.mxu2 %vm1207_vm9, %v2844_v11 }
0x1747   : > { %3499 = vmatpush.msk.msrb.mxu2 %vm1207_vm9, %v2842_v12 }
0x1748   : > { %v2886_v24 = vpop.permute.xlu1 %2885 }
0x1749   : > { %3500 = vmatpush.msk.msrb.mxu2 %vm1207_vm9, %v2840_v9 }
0x174a   : > { %3501 = vmatmul.msk.f32.vlgmr.msrb.gmra.mxu2 %vm724_vm3, %v3485_v6 }
0x1750   : > { %v2966_v43 = vpop.permute.xlu1 %2965 }
0x1752   : > { %3502 = vmatmul.msk.f32.gmra.mxu2 %vm724_vm3, %v3486_v17 }
0x1758   : > { %v2951_v49 = vpop.permute.xlu1 %2950 }
0x175a   : > { %3503 = vmatmul.msk.f32.gmra.mxu2 %vm724_vm3, %v3487_v18 }
0x1762   : > { %3504 = vmatmul.msk.f32.gmra.mxu2 %vm724_vm3, %v3488_v19 }
0x17cd   : > { %v2922_v32 = vpop.f32.mrf.mxu2 }
0x17ce   : > { %v2923_v30 = vadd.f32 %v2922_v32, %v2876_v29 }
0x17d0   : > { %v2934_v28 = vmax.f32 %v2923_v30, 0.0 }
0x17d5   : > { %v2925_v14 = vpop.f32.mrf.mxu2 }
0x17d6   : > { %v2926_v4 = vadd.f32 %v2925_v14, %v2881_v27 }
0x17d8   : > { %v2935_v22 = vmax.f32 %v2926_v4, 0.0 }
0x17dd   : > { %v2928_v15 = vpop.f32.mrf.mxu2 }
0x17de   : > { %v2929_v25 = vadd.f32 %v2928_v15, %v2886_v24 }
0x17e0   : > { %v2936_v31 = vmax.f32 %v2929_v25, 0.0 }
0x17e5   : > { %v2931_v23 = vpop.f32.mrf.mxu2 }
0x17e6   : > { %v2932_v26 = vadd.f32 %v2931_v23, %v2891_v21 }
0x17e8   : > { %v2937_v16 = vmax.f32 %v2932_v26, 0.0 }
0x17ea   : > { %2992 = vmatpush.msra.mxu3 %v2937_v16 }
0x17ec   : > { %2993 = vmatpush.msra.mxu3 %v2936_v31 }
0x17ee   : > { %2994 = vmatpush.msra.mxu3 %v2935_v22 }
0x17f0   : > { %2995 = vmatpush.msra.mxu3 %v2934_v28 }
0x17f1   : > { %3513 = vmatmul.msk.f32.vlgmr.msra.gmra.mxu3 %vm628_vm0, %v3505_v36 }
0x17f9   : > { %3514 = vmatmul.msk.f32.gmra.mxu3 %vm628_vm0, %v3506_v37 }
0x1801   : > { %3515 = vmatmul.msk.f32.gmra.mxu3 %vm628_vm0, %v3507_v38 }
0x1809   : > { %3516 = vmatmul.msk.f32.gmra.mxu3 %vm628_vm0, %v3508_v39 }
0x1874   : > { %v2997_v35 = vpop.f32.mrf.mxu3 }
0x1875   : > { %v2998_v50 = vadd.f32 %v2997_v35, %v2951_v49 }
0x1877   : > { %v3009_v56 = vadd.f32 %v2998_v50, %v5178_v60 }
0x187c   : > { %v3000_v41 = vpop.f32.mrf.mxu3 }
0x187d   : > { %v3001_v42 = vadd.f32 %v3000_v41, %v2956_v46 }
0x187f   : > { %v3010_v54 = vadd.f32 %v3001_v42, %v5150_v13  ;;  %v3020_v13 = vpop.permute.xlu2 %3019 }
0x1881   : > { %v3014_v53 = vmul.f32 %v5147_v33, %v3010_v54 }
0x1884   : > { %v3003_v40 = vpop.f32.mrf.mxu3 }
0x1885   : > { %v3004_v45 = vadd.f32 %v3003_v40, %v2961_v44 }
0x1887   : > { %v3011_v47 = vadd.f32 %v3004_v45, %v5156_v51  ;;  %v3013_v51 = vmul.f32 %v5147_v33, %v3009_v56 }
0x1889   : > { %v3015_v57 = vmul.f32 %v5147_v33, %v3011_v47 }
0x188c   : > { %v3006_v34 = vpop.f32.mrf.mxu3 }
0x188d   : > { %v3007_v48 = vadd.f32 %v3006_v34, %v2966_v43 }
0x188f   : > { %v3012_v7 = vadd.f32 %v3007_v48, %v5167_v52  ;;  %v3383_v52 = vld [vmem:[%s5324_s16 + $0x8] sm:$0xff] }
0x1891   : > { %v3016_v55 = vmul.f32 %v5147_v33, %v3012_v7 }
0x1893   : > { %3037 = vmatpush.msrb.mxu1 %v3016_v55 }
0x1895   : > { %3038 = vmatpush.msrb.mxu1 %v3015_v57 }
0x1897   : > { %3039 = vmatpush.msrb.mxu1 %v3014_v53 }
0x1899   : > { %3040 = vmatpush.msrb.mxu1 %v3013_v51 }
0x189a   : > { %3517 = vmatmul.msk.f32.vlgmr.msrb.gmra.mxu1 %vm628_vm0, %v3383_v52 }
0x1917   : > { %v3042_v59 = vpop.f32.mrf.mxu1 }
0x1918   : > { %v3043_v60 = vadd.f32 %v3042_v59, %v3020_v13 }
0x191a   : > { %v3045_v61 = vmul.f32 %v5147_v33, %v3043_v60 }
0x191c   : > { %3518 = vst [vmem:[%s4336_s30 + $0x10] sm:$0xff] %v3045_v61 }
0x191d   : > { %3619 = shalt.err (!%p3616_p3)
}
0x191e   : > { %s3665_s30 = smov 128   ;;  %s3666_s26 = smov 256  }
0x191f   : > { %3536 = dma.vmem_to_hbm [thread:$0]  (%p3800_p5), %s3061_s5, 384, %s3063_s18, %s3049_s20, %s3665_s30, %s3666_s26, %s5384_s24  }
0x1920 PF: > { %s5391_s4 = sld [smem:[#allocation7_spill]] }
0x1921   : > { %s5392_s27 = sld [smem:[#allocation5_spill]] }
0x1926   : > { %p3542_p4 = scmp.ge.s32.totalorder %s5391_s4, 2 }
0x1927   : > { %s3077_s22 = sand.u32 1, %s5392_s27  }
0x1928   : > { %p3539_p7 = pnand %p3542_p4, %p3804_p6  ;;  %s3078_s19 = scalar_lea.sflag [#allocation3], %s3077_s22 }
0x192a   : > { %p3540_p8 = pneg %p3539_p7 }
0x192c   : > { %3637 = dma.done.wait (%p3540_p8), %s3078_s19, 384  }
0x192d   : > { %3639 = vsyncadd (%p3540_p8), %s3078_s19, 4294966912  ;;  %s5394_s30 = sld [smem:[#allocation8_spill]]  ;;  %s5397_s27 = smov %s3646_s28 }
0x192e   : > { %s5395_s0 = sld [smem:[#allocation6_spill]] }
0x192f   : > { %s5396_s29 = sld [smem:[#allocation9_spill]] }
0x1933   : > { %p28_p9 = scmp.ge.s32.totalorder %s5394_s30, 4  }
0x1934   : > { %s5398_s28 = smov %s5395_s0 }
0x1935   :  { %30 = sbr.rel (!%p28_p9) target bundleno = 12 (0xc), region = 176 }
0x193a   :  { %3084 = vsyncpa [#allocation3], 1 }
0x193b   :  { %3086 = vsyncpa [#allocation3 + $0x1], 1 }

</bundles_post_ra>
